<compile_context>
chip_gen: v7x
topology: tpu7x:2x2x1
jax: 0.10.0
libtpu: 0.0.40
codegen_flags: <defaults>
</compile_context>

<pallas_src>
import jax
import jax.numpy as jnp
from jax import lax
from jax.experimental import pallas as pl
from jax.experimental.pallas import tpu as pltpu


# -----------------------------------------------------------------------------
# Shared math helpers (used by both the Pallas kernel and the JAX reference so
# the numerics -- including bf16 quantization of the MXU matmuls -- match).
# -----------------------------------------------------------------------------

def _dense(x, w, b, *, relu, compute_dtype):
    """x @ w (+ b) (+ ReLU); matmul inputs in compute_dtype, f32 accumulation."""
    y = jnp.dot(x.astype(compute_dtype), w.astype(compute_dtype),
                preferred_element_type=jnp.float32)
    if b is not None:
        y = y + b
    if relu:
        y = jnp.maximum(y, 0.0)
    return y


def _k3_rows(x_bkn):
    """(Bblk, 3, Nchunk) -> (3, Bblk*Nchunk): concat the samples along the lane axis."""
    bblk = x_bkn.shape[0]
    if bblk == 1:
        return x_bkn[0]
    return jnp.concatenate([x_bkn[b] for b in range(bblk)], axis=1)


def _conv1_k3_mxu(x_km, w, b, *, compute_dtype):
    """Conv1d(kernel_size=1, C_in=3) + bias + ReLU on the MXU.

    x_km: (3, M) with points in lanes.  The K=3 channel axis (dim 0 of both operands) is
    contracted directly via dot_general -- the same orientation flash-attention backward
    uses -- so no transpose / relayout of the point data is required.  Returns (M, C).
    """
    y = lax.dot_general(x_km.astype(compute_dtype), w.astype(compute_dtype),
                        (((0,), (0,)), ((), ())),
                        preferred_element_type=jnp.float32)
    return jnp.maximum(y + b, 0.0)


def _apply_transform(x_bkn, t):
    """Apply the per-sample 3x3 STN transform in (Bblk, 3, Nchunk) layout.

    out[b, i, n] = sum_j x[b, j, n] * t[b, 3*j + i]   (i.e. x @ trans, trans row-major).
    ~9 cheap VPU MACs per point; stays in f32.
    """
    rows = []
    for i in range(3):
        r = (x_bkn[:, 0:1, :] * t[:, None, i + 0:i + 1]
             + x_bkn[:, 1:2, :] * t[:, None, i + 3:i + 4]
             + x_bkn[:, 2:3, :] * t[:, None, i + 6:i + 7])   # (Bblk, 1, Nchunk)
        rows.append(r)
    return jnp.concatenate(rows, axis=1)                     # (Bblk, 3, Nchunk)


# -----------------------------------------------------------------------------
# Kernel
# -----------------------------------------------------------------------------

def _make_pointnet_kernel(Bblk, Nchunk, compute_dtype):
    M = Bblk * Nchunk  # matmul rows per chunk

    def kernel(x_ref,
               w1s_ref, b1s_ref, w2s_ref, b2s_ref, w3s_ref, b3s_ref,
               wf1_ref, bf1_ref, wf2_ref, bf2_ref, wf3_ref, bf3_ref,
               wc1_ref, bc1_ref, wc2_ref, bc2_ref, wc3_ref, bc3_ref,
               out_ref, g_scr, t_scr):
        p = pl.program_id(1)                # 0 = STN pass, 1 = trunk pass
        c = pl.program_id(2)                # point-chunk index
        last_c = pl.num_programs(2) - 1

        xc = x_ref[...]                     # (Bblk, 3, Nchunk) f32, points lane-dense

        # ---------------- pass 0: STN conv stack (+ FC head at the last chunk) ----------
        @pl.when(p == 0)
        def _stn_pass():
            h = _conv1_k3_mxu(_k3_rows(xc), w1s_ref[...], b1s_ref[...],
                              compute_dtype=compute_dtype)              # (M, 128) MXU
            h = _dense(h, w2s_ref[...], b2s_ref[...], relu=True,
                       compute_dtype=compute_dtype)                     # (M, 256)
            h = _dense(h, w3s_ref[...], b3s_ref[...], relu=True,
                       compute_dtype=compute_dtype)                     # (M, 512)
            hmax = jnp.max(h.reshape(Bblk, Nchunk, 512), axis=1)        # (Bblk, 512)

            @pl.when(c == 0)
            def _():
                g_scr[...] = jnp.full((Bblk, 512), -jnp.inf, dtype=jnp.float32)

            g_scr[...] = jnp.maximum(g_scr[...], hmax)

            @pl.when(c == last_c)
            def _fc_head():
                g = _dense(g_scr[...], wf1_ref[...], bf1_ref[...], relu=True,
                           compute_dtype=compute_dtype)                 # (Bblk, 256)
                g = _dense(g, wf2_ref[...], bf2_ref[...], relu=True,
                           compute_dtype=compute_dtype)                 # (Bblk, 128)
                # bf3 already has the flattened 3x3 identity folded in (wrapper).
                t_scr[...] = _dense(g, wf3_ref[...], bf3_ref[...], relu=False,
                                    compute_dtype=compute_dtype)        # (Bblk, 9)

        # ---------------- pass 1: per-sample transform + feature trunk ------------------
        @pl.when(p == 1)
        def _trunk_pass():
            xt = _apply_transform(xc, t_scr[...])                       # (Bblk, 3, Nchunk)
            q = _conv1_k3_mxu(_k3_rows(xt), wc1_ref[...], bc1_ref[...],
                              compute_dtype=compute_dtype)              # (M, 512) MXU
            q = _dense(q, wc2_ref[...], bc2_ref[...], relu=True,
                       compute_dtype=compute_dtype)                     # (M, 256)
            q = _dense(q, wc3_ref[...], None, relu=False,
                       compute_dtype=compute_dtype)                     # (M, 128)
            qmax = jnp.max(q.reshape(Bblk, Nchunk, 128), axis=1)        # (Bblk, 128)

            @pl.when(c == 0)
            def _():
                out_ref[...] = jnp.full((Bblk, 128), -jnp.inf, dtype=jnp.float32)

            out_ref[...] = jnp.maximum(out_ref[...], qmax)

            @pl.when(c == last_c)
            def _():
                # conv3 bias is point-independent, so it commutes with the max-pool.
                out_ref[...] = out_ref[...] + bc3_ref[...]

    return kernel


# -----------------------------------------------------------------------------
# Parameters
# -----------------------------------------------------------------------------

# (name, (C_in, C_out)) for every weight; bias shape is (1, C_out).
_LAYER_DIMS = [
    ("stn_conv1", (3, 128)),
    ("stn_conv2", (128, 256)),
    ("stn_conv3", (256, 512)),
    ("stn_fc1", (512, 256)),
    ("stn_fc2", (256, 128)),
    ("stn_fc3", (128, 9)),
    ("feat_conv1", (3, 512)),
    ("feat_conv2", (512, 256)),
    ("feat_conv3", (256, 128)),
]


def init_params(key):
    """Deterministic PyTorch-like uniform(-1/sqrt(fan_in), +1/sqrt(fan_in)) init."""
    params = []
    for _, (cin, cout) in _LAYER_DIMS:
        key, kw, kb = jax.random.split(key, 3)
        bound = 1.0 / jnp.sqrt(jnp.float32(cin))
        params.append(jax.random.uniform(kw, (cin, cout), jnp.float32, -bound, bound))
        params.append(jax.random.uniform(kb, (1, cout), jnp.float32, -bound, bound))
    return params


# -----------------------------------------------------------------------------
# Wrapper
# -----------------------------------------------------------------------------

def _round_up(x, m):
    return ((x + m - 1) // m) * m


def pointnet_forward(x_ncw, params, *, compute_dtype=jnp.bfloat16, target_m=1024):
    """x_ncw: (B, 3, N) float32 (PyTorch Conv1d layout). Returns (B, 128) float32."""
    B, C, N = x_ncw.shape
    assert C == 3
    x = x_ncw.astype(jnp.float32)            # keep (B, 3, N): point axis is the lane axis

    LANE = 128
    # Batch block: keep >= ~4 "parallel" grid steps when possible (v7x has 2 TensorCores);
    # cap at 8 samples per block.
    Bblk = min(8, max(1, B // 4))
    nb = (B + Bblk - 1) // Bblk
    B_pad = nb * Bblk

    # Point chunk: lane-dense (multiple of 128), sized so each chunk feeds ~target_m rows
    # (M = Bblk * Nchunk) to the MXU matmuls.  VMEM is bounded by the chunk, not by N.
    Nchunk = max(LANE, (target_m // Bblk) // LANE * LANE)
    Nchunk = min(Nchunk, _round_up(N, LANE))
    N_pad = _round_up(N, Nchunk)
    num_chunks = N_pad // Nchunk

    # Replicate-padding (exact under the max-pool).
    if N_pad != N:
        x = jnp.concatenate(
            [x, jnp.broadcast_to(x[:, :, :1], (B, 3, N_pad - N))], axis=2)
    if B_pad != B:
        x = jnp.concatenate(
            [x, jnp.broadcast_to(x[-1:], (B_pad - B, 3, N_pad))], axis=0)

    # ---- parameter prep --------------------------------------------------------
    (w1s, b1s, w2s, b2s, w3s, b3s,
     wf1, bf1, wf2, bf2, wf3, bf3,
     wc1, bc1, wc2, bc2, wc3, bc3) = params
    iden = jnp.array([[1., 0., 0., 0., 1., 0., 0., 0., 1.]], dtype=jnp.float32)
    bf3 = bf3 + iden          # fold the 3x3 identity into fc3's bias (no in-kernel const)
    cd = compute_dtype
    # All weights feed the MXU -> bf16; all biases stay f32 (added after f32 accumulation).
    kparams = [w1s.astype(cd), b1s, w2s.astype(cd), b2s, w3s.astype(cd), b3s,
               wf1.astype(cd), bf1, wf2.astype(cd), bf2, wf3.astype(cd), bf3,
               wc1.astype(cd), bc1, wc2.astype(cd), bc2, wc3.astype(cd), bc3]

    kernel = _make_pointnet_kernel(Bblk, Nchunk, cd)

    # x: lane-dense (Bblk, 3, Nchunk) chunks; weights: full blocks, resident across steps.
    in_specs = [pl.BlockSpec((Bblk, 3, Nchunk), lambda b, p, c: (b, 0, c))]
    in_specs += [pl.BlockSpec(w.shape, lambda b, p, c: (0, 0)) for w in kparams]
    # Leading block dim squeezed so the (Bblk, 128) output store is dense for any Bblk.
    out_spec = pl.BlockSpec((None, Bblk, 128), lambda b, p, c: (b, 0, 0))

    conv_flops = 2 * B_pad * N_pad * (3 * 128 + 128 * 256 + 256 * 512      # STN convs
                                      + 3 * 3                              # 3x3 transform
                                      + 3 * 512 + 512 * 256 + 256 * 128)   # trunk convs
    fc_flops = 2 * B_pad * (512 * 256 + 256 * 128 + 128 * 9)
    bytes_accessed = (2 * int(x.size) * 4       # x is streamed once per pass
                      + sum(int(a.size) * a.dtype.itemsize for a in kparams)
                      + B_pad * 128 * 4)

    out = pl.pallas_call(
        kernel,
        out_shape=jax.ShapeDtypeStruct((nb, Bblk, 128), jnp.float32),
        grid_spec=pltpu.PrefetchScalarGridSpec(
            num_scalar_prefetch=0,
            grid=(nb, 2, num_chunks),           # (batch block, pass, point chunk)
            in_specs=in_specs,
            out_specs=out_spec,
            scratch_shapes=[pltpu.VMEM((Bblk, 512), jnp.float32),   # STN running max
                            pltpu.VMEM((Bblk, 9), jnp.float32)],    # per-sample transform
        ),
        compiler_params=pltpu.CompilerParams(
            dimension_semantics=("parallel", "arbitrary", "arbitrary")),
        cost_estimate=pl.CostEstimate(flops=int(conv_flops + fc_flops),
                                      transcendentals=0,
                                      bytes_accessed=int(bytes_accessed)),
    )(x, *kparams)

    return out.reshape(B_pad, 128)[:B]


# -----------------------------------------------------------------------------
# Plain-JAX reference (same bf16 quantization of the MXU matmuls as the kernel,
# so it matches tightly; a pure-f32 reference would differ by bf16 rounding).
# -----------------------------------------------------------------------------

def pointnet_reference(x_ncw, params, *, compute_dtype=jnp.bfloat16):
    (w1s, b1s, w2s, b2s, w3s, b3s,
     wf1, bf1, wf2, bf2, wf3, bf3,
     wc1, bc1, wc2, bc2, wc3, bc3) = params
    x = jnp.transpose(x_ncw, (0, 2, 1)).astype(jnp.float32)      # (B, N, 3)

    h = _dense(x, w1s, b1s, relu=True, compute_dtype=compute_dtype)
    h = _dense(h, w2s, b2s, relu=True, compute_dtype=compute_dtype)
    h = _dense(h, w3s, b3s, relu=True, compute_dtype=compute_dtype)
    g = jnp.max(h, axis=1)                                       # (B, 512)
    g = _dense(g, wf1, bf1, relu=True, compute_dtype=compute_dtype)
    g = _dense(g, wf2, bf2, relu=True, compute_dtype=compute_dtype)
    iden = jnp.array([[1., 0., 0., 0., 1., 0., 0., 0., 1.]], dtype=jnp.float32)
    t = _dense(g, wf3, bf3, relu=False, compute_dtype=compute_dtype) + iden   # (B, 9)

    # x @ trans with trans[b] = t[b].reshape(3, 3) (row-major), as f32 MACs.
    xt = (x[..., 0:1] * t[:, None, 0:3]
          + x[..., 1:2] * t[:, None, 3:6]
          + x[..., 2:3] * t[:, None, 6:9])                       # (B, N, 3)
    p = _dense(xt, wc1, bc1, relu=True, compute_dtype=compute_dtype)
    p = _dense(p, wc2, bc2, relu=True, compute_dtype=compute_dtype)
    p = _dense(p, wc3, None, relu=False, compute_dtype=compute_dtype)
    return jnp.max(p, axis=1) + bc3                              # (B, 128)


if __name__ == "__main__":
    key = jax.random.PRNGKey(0)
    k_param, k_x = jax.random.split(key)

    B, N = 2, 16
    params = init_params(k_param)
    x = jax.random.normal(k_x, (B, 3, N), dtype=jnp.float32)     # PyTorch (B, 3, n_pts)

    out = jax.block_until_ready(pointnet_forward(x, params))
    ref = pointnet_reference(x, params)

    assert out.shape == (B, 128)
    assert jnp.allclose(out, ref, atol=5e-3, rtol=5e-3), "Pallas output mismatch vs reference"
    print("KERNEL_OK")
</pallas_src>

<mosaic_0001>
module attributes {stable_mosaic.version = 11 : i64} {
  func.func @kernel(%arg0: i32, %arg1: i32, %arg2: i32, %arg3: memref<1x3x128xf32, #tpu.memory_space<vmem>>, %arg4: memref<3x128xbf16, #tpu.memory_space<vmem>>, %arg5: memref<1x128xf32, #tpu.memory_space<vmem>>, %arg6: memref<128x256xbf16, #tpu.memory_space<vmem>>, %arg7: memref<1x256xf32, #tpu.memory_space<vmem>>, %arg8: memref<256x512xbf16, #tpu.memory_space<vmem>>, %arg9: memref<1x512xf32, #tpu.memory_space<vmem>>, %arg10: memref<512x256xbf16, #tpu.memory_space<vmem>>, %arg11: memref<1x256xf32, #tpu.memory_space<vmem>>, %arg12: memref<256x128xbf16, #tpu.memory_space<vmem>>, %arg13: memref<1x128xf32, #tpu.memory_space<vmem>>, %arg14: memref<128x9xbf16, #tpu.memory_space<vmem>>, %arg15: memref<1x9xf32, #tpu.memory_space<vmem>>, %arg16: memref<3x512xbf16, #tpu.memory_space<vmem>>, %arg17: memref<1x512xf32, #tpu.memory_space<vmem>>, %arg18: memref<512x256xbf16, #tpu.memory_space<vmem>>, %arg19: memref<1x256xf32, #tpu.memory_space<vmem>>, %arg20: memref<256x128xbf16, #tpu.memory_space<vmem>>, %arg21: memref<1x128xf32, #tpu.memory_space<vmem>>, %arg22: memref<1x1x128xf32, #tpu.memory_space<vmem>>, %arg23: memref<1x512xf32, #tpu.memory_space<vmem>>, %arg24: memref<1x9xf32, #tpu.memory_space<vmem>>) attributes {dimension_semantics = [#tpu.dimension_semantics<parallel>, #tpu.dimension_semantics<arbitrary>, #tpu.dimension_semantics<arbitrary>], iteration_bounds = array<i64: 2, 2, 1>, scalar_prefetch = 0 : i64, scratch_operands = 2 : i64, tpu.core_type = #tpu.core_type<tc>, window_params = [{transform_indices = @transform_0, window_bounds = array<i64: 1, 3, 128>}, {pipeline_mode = #tpu.pipeline_mode<synchronous>, transform_indices = @transform_1, window_bounds = array<i64: 3, 128>}, {pipeline_mode = #tpu.pipeline_mode<synchronous>, transform_indices = @transform_2, window_bounds = array<i64: 1, 128>}, {pipeline_mode = #tpu.pipeline_mode<synchronous>, transform_indices = @transform_3, window_bounds = array<i64: 128, 256>}, {pipeline_mode = #tpu.pipeline_mode<synchronous>, transform_indices = @transform_4, window_bounds = array<i64: 1, 256>}, {pipeline_mode = #tpu.pipeline_mode<synchronous>, transform_indices = @transform_5, window_bounds = array<i64: 256, 512>}, {pipeline_mode = #tpu.pipeline_mode<synchronous>, transform_indices = @transform_6, window_bounds = array<i64: 1, 512>}, {pipeline_mode = #tpu.pipeline_mode<synchronous>, transform_indices = @transform_7, window_bounds = array<i64: 512, 256>}, {pipeline_mode = #tpu.pipeline_mode<synchronous>, transform_indices = @transform_8, window_bounds = array<i64: 1, 256>}, {pipeline_mode = #tpu.pipeline_mode<synchronous>, transform_indices = @transform_9, window_bounds = array<i64: 256, 128>}, {pipeline_mode = #tpu.pipeline_mode<synchronous>, transform_indices = @transform_10, window_bounds = array<i64: 1, 128>}, {pipeline_mode = #tpu.pipeline_mode<synchronous>, transform_indices = @transform_11, window_bounds = array<i64: 128, 9>}, {pipeline_mode = #tpu.pipeline_mode<synchronous>, transform_indices = @transform_12, window_bounds = array<i64: 1, 9>}, {pipeline_mode = #tpu.pipeline_mode<synchronous>, transform_indices = @transform_13, window_bounds = array<i64: 3, 512>}, {pipeline_mode = #tpu.pipeline_mode<synchronous>, transform_indices = @transform_14, window_bounds = array<i64: 1, 512>}, {pipeline_mode = #tpu.pipeline_mode<synchronous>, transform_indices = @transform_15, window_bounds = array<i64: 512, 256>}, {pipeline_mode = #tpu.pipeline_mode<synchronous>, transform_indices = @transform_16, window_bounds = array<i64: 1, 256>}, {pipeline_mode = #tpu.pipeline_mode<synchronous>, transform_indices = @transform_17, window_bounds = array<i64: 256, 128>}, {pipeline_mode = #tpu.pipeline_mode<synchronous>, transform_indices = @transform_18, window_bounds = array<i64: 1, 128>}, {transform_indices = @transform_19, window_bounds = array<i64: 1, 1, 128>}]} {
    %c0 = arith.constant 0 : index
    %c0_0 = arith.constant 0 : index
    %c0_1 = arith.constant 0 : index
    %0 = vector.load %arg3[%c0, %c0_0, %c0_1] : memref<1x3x128xf32, #tpu.memory_space<vmem>>, vector<1x3x128xf32>
    %c0_i32 = arith.constant 0 : i32
    %1 = arith.cmpi eq, %arg1, %c0_i32 : i32
    %2 = arith.extui %1 : i1 to i32
    %c0_i32_2 = arith.constant 0 : i32
    %3 = arith.cmpi ne, %2, %c0_i32_2 : i32
    scf.if %3 {
      %7 = vector.shape_cast %0 : vector<1x3x128xf32> to vector<3x128xf32>
      %c0_4 = arith.constant 0 : index
      %c0_5 = arith.constant 0 : index
      %8 = vector.load %arg4[%c0_4, %c0_5] : memref<3x128xbf16, #tpu.memory_space<vmem>>, vector<3x128xbf16>
      %c0_6 = arith.constant 0 : index
      %c0_7 = arith.constant 0 : index
      %9 = vector.load %arg5[%c0_6, %c0_7] : memref<1x128xf32, #tpu.memory_space<vmem>>, vector<1x128xf32>
      %10 = arith.truncf %7 : vector<3x128xf32> to vector<3x128xbf16>
      %cst = arith.constant dense<0.000000e+00> : vector<128x128xf32>
      %11 = tpu.matmul %10, %8, %cst {dimension_numbers = #tpu.dot_dimension_numbers<[0], [0], [1], [1], [0, 1, 1, 1], [], []>} : vector<3x128xbf16>, vector<3x128xbf16>, vector<128x128xf32> -> vector<128x128xf32>
      %12 = vector.broadcast %9 : vector<1x128xf32> to vector<128x128xf32>
      %13 = arith.addf %11, %12 : vector<128x128xf32>
      %cst_8 = arith.constant 0.000000e+00 : f32
      %14 = vector.broadcast %cst_8 : f32 to vector<128x128xf32>
      %15 = arith.maximumf %13, %14 : vector<128x128xf32>
      %c0_9 = arith.constant 0 : index
      %c0_10 = arith.constant 0 : index
      %16 = vector.load %arg6[%c0_9, %c0_10] : memref<128x256xbf16, #tpu.memory_space<vmem>>, vector<128x256xbf16>
      %c0_11 = arith.constant 0 : index
      %c0_12 = arith.constant 0 : index
      %17 = vector.load %arg7[%c0_11, %c0_12] : memref<1x256xf32, #tpu.memory_space<vmem>>, vector<1x256xf32>
      %18 = arith.truncf %15 : vector<128x128xf32> to vector<128x128xbf16>
      %cst_13 = arith.constant dense<0.000000e+00> : vector<128x256xf32>
      %19 = tpu.matmul %18, %16, %cst_13 {dimension_numbers = #tpu.dot_dimension_numbers<[1], [0], [0], [1], [0, 0, 1, 1], [], []>} : vector<128x128xbf16>, vector<128x256xbf16>, vector<128x256xf32> -> vector<128x256xf32>
      %20 = vector.broadcast %17 : vector<1x256xf32> to vector<128x256xf32>
      %21 = arith.addf %19, %20 : vector<128x256xf32>
      %cst_14 = arith.constant 0.000000e+00 : f32
      %22 = vector.broadcast %cst_14 : f32 to vector<128x256xf32>
      %23 = arith.maximumf %21, %22 : vector<128x256xf32>
      %c0_15 = arith.constant 0 : index
      %c0_16 = arith.constant 0 : index
      %24 = vector.load %arg8[%c0_15, %c0_16] : memref<256x512xbf16, #tpu.memory_space<vmem>>, vector<256x512xbf16>
      %c0_17 = arith.constant 0 : index
      %c0_18 = arith.constant 0 : index
      %25 = vector.load %arg9[%c0_17, %c0_18] : memref<1x512xf32, #tpu.memory_space<vmem>>, vector<1x512xf32>
      %26 = arith.truncf %23 : vector<128x256xf32> to vector<128x256xbf16>
      %cst_19 = arith.constant dense<0.000000e+00> : vector<128x512xf32>
      %27 = tpu.matmul %26, %24, %cst_19 {dimension_numbers = #tpu.dot_dimension_numbers<[1], [0], [0], [1], [0, 0, 1, 1], [], []>} : vector<128x256xbf16>, vector<256x512xbf16>, vector<128x512xf32> -> vector<128x512xf32>
      %28 = vector.broadcast %25 : vector<1x512xf32> to vector<128x512xf32>
      %29 = arith.addf %27, %28 : vector<128x512xf32>
      %cst_20 = arith.constant 0.000000e+00 : f32
      %30 = vector.broadcast %cst_20 : f32 to vector<128x512xf32>
      %31 = arith.maximumf %29, %30 : vector<128x512xf32>
      %32 = vector.shape_cast %31 : vector<128x512xf32> to vector<1x128x512xf32>
      %cst_21 = arith.constant dense<0xFF800000> : vector<1x512xf32>
      %33 = vector.multi_reduction <maximumf>, %32, %cst_21 [1] : vector<1x128x512xf32> to vector<1x512xf32>
      %c0_i32_22 = arith.constant 0 : i32
      %34 = arith.cmpi eq, %arg2, %c0_i32_22 : i32
      %35 = arith.extui %34 : i1 to i32
      %c0_i32_23 = arith.constant 0 : i32
      %36 = arith.cmpi ne, %35, %c0_i32_23 : i32
      scf.if %36 {
        %cst_30 = arith.constant 0xFF800000 : f32
        %43 = vector.broadcast %cst_30 : f32 to vector<1x512xf32>
        %c0_31 = arith.constant 0 : index
        %c0_32 = arith.constant 0 : index
        %44 = vector.load %arg23[%c0_31, %c0_32] : memref<1x512xf32, #tpu.memory_space<vmem>>, vector<1x512xf32>
        tpu.vector_store %arg23[%c0_31, %c0_32], %43 {strides = array<i32>} : memref<1x512xf32, #tpu.memory_space<vmem>>, vector<1x512xf32>,
      } else {
      }
      %c0_24 = arith.constant 0 : index
      %c0_25 = arith.constant 0 : index
      %37 = vector.load %arg23[%c0_24, %c0_25] : memref<1x512xf32, #tpu.memory_space<vmem>>, vector<1x512xf32>
      %38 = arith.maximumf %37, %33 : vector<1x512xf32>
      %c0_26 = arith.constant 0 : index
      %c0_27 = arith.constant 0 : index
      %39 = vector.load %arg23[%c0_26, %c0_27] : memref<1x512xf32, #tpu.memory_space<vmem>>, vector<1x512xf32>
      tpu.vector_store %arg23[%c0_26, %c0_27], %38 {strides = array<i32>} : memref<1x512xf32, #tpu.memory_space<vmem>>, vector<1x512xf32>,
      %c0_i32_28 = arith.constant 0 : i32
      %40 = arith.cmpi eq, %arg2, %c0_i32_28 : i32
      %41 = arith.extui %40 : i1 to i32
      %c0_i32_29 = arith.constant 0 : i32
      %42 = arith.cmpi ne, %41, %c0_i32_29 : i32
      scf.if %42 {
        %c0_30 = arith.constant 0 : index
        %c0_31 = arith.constant 0 : index
        %43 = vector.load %arg23[%c0_30, %c0_31] : memref<1x512xf32, #tpu.memory_space<vmem>>, vector<1x512xf32>
        %c0_32 = arith.constant 0 : index
        %c0_33 = arith.constant 0 : index
        %44 = vector.load %arg10[%c0_32, %c0_33] : memref<512x256xbf16, #tpu.memory_space<vmem>>, vector<512x256xbf16>
        %c0_34 = arith.constant 0 : index
        %c0_35 = arith.constant 0 : index
        %45 = vector.load %arg11[%c0_34, %c0_35] : memref<1x256xf32, #tpu.memory_space<vmem>>, vector<1x256xf32>
        %46 = arith.truncf %43 : vector<1x512xf32> to vector<1x512xbf16>
        %cst_36 = arith.constant dense<0.000000e+00> : vector<1x256xf32>
        %47 = tpu.matmul %46, %44, %cst_36 {dimension_numbers = #tpu.dot_dimension_numbers<[1], [0], [0], [1], [0, 0, 1, 1], [], []>} : vector<1x512xbf16>, vector<512x256xbf16>, vector<1x256xf32> -> vector<1x256xf32>
        %48 = arith.addf %47, %45 : vector<1x256xf32>
        %cst_37 = arith.constant 0.000000e+00 : f32
        %49 = vector.broadcast %cst_37 : f32 to vector<1x256xf32>
        %50 = arith.maximumf %48, %49 : vector<1x256xf32>
        %c0_38 = arith.constant 0 : index
        %c0_39 = arith.constant 0 : index
        %51 = vector.load %arg12[%c0_38, %c0_39] : memref<256x128xbf16, #tpu.memory_space<vmem>>, vector<256x128xbf16>
        %c0_40 = arith.constant 0 : index
        %c0_41 = arith.constant 0 : index
        %52 = vector.load %arg13[%c0_40, %c0_41] : memref<1x128xf32, #tpu.memory_space<vmem>>, vector<1x128xf32>
        %53 = arith.truncf %50 : vector<1x256xf32> to vector<1x256xbf16>
        %cst_42 = arith.constant dense<0.000000e+00> : vector<1x128xf32>
        %54 = tpu.matmul %53, %51, %cst_42 {dimension_numbers = #tpu.dot_dimension_numbers<[1], [0], [0], [1], [0, 0, 1, 1], [], []>} : vector<1x256xbf16>, vector<256x128xbf16>, vector<1x128xf32> -> vector<1x128xf32>
        %55 = arith.addf %54, %52 : vector<1x128xf32>
        %cst_43 = arith.constant 0.000000e+00 : f32
        %56 = vector.broadcast %cst_43 : f32 to vector<1x128xf32>
        %57 = arith.maximumf %55, %56 : vector<1x128xf32>
        %c0_44 = arith.constant 0 : index
        %c0_45 = arith.constant 0 : index
        %58 = vector.load %arg14[%c0_44, %c0_45] : memref<128x9xbf16, #tpu.memory_space<vmem>>, vector<128x9xbf16>
        %c0_46 = arith.constant 0 : index
        %c0_47 = arith.constant 0 : index
        %59 = vector.load %arg15[%c0_46, %c0_47] : memref<1x9xf32, #tpu.memory_space<vmem>>, vector<1x9xf32>
        %60 = arith.truncf %57 : vector<1x128xf32> to vector<1x128xbf16>
        %cst_48 = arith.constant dense<0.000000e+00> : vector<1x9xf32>
        %61 = tpu.matmul %60, %58, %cst_48 {dimension_numbers = #tpu.dot_dimension_numbers<[1], [0], [0], [1], [0, 0, 1, 1], [], []>} : vector<1x128xbf16>, vector<128x9xbf16>, vector<1x9xf32> -> vector<1x9xf32>
        %62 = arith.addf %61, %59 : vector<1x9xf32>
        %c0_49 = arith.constant 0 : index
        %c0_50 = arith.constant 0 : index
        %63 = vector.load %arg24[%c0_49, %c0_50] : memref<1x9xf32, #tpu.memory_space<vmem>>, vector<1x9xf32>
        tpu.vector_store %arg24[%c0_49, %c0_50], %62 {strides = array<i32>} : memref<1x9xf32, #tpu.memory_space<vmem>>, vector<1x9xf32>,
      } else {
      }
    } else {
    }
    %c1_i32 = arith.constant 1 : i32
    %4 = arith.cmpi eq, %arg1, %c1_i32 : i32
    %5 = arith.extui %4 : i1 to i32
    %c0_i32_3 = arith.constant 0 : i32
    %6 = arith.cmpi ne, %5, %c0_i32_3 : i32
    scf.if %6 {
      %c0_4 = arith.constant 0 : index
      %c0_5 = arith.constant 0 : index
      %7 = vector.load %arg24[%c0_4, %c0_5] : memref<1x9xf32, #tpu.memory_space<vmem>>, vector<1x9xf32>
      %8 = vector.extract_strided_slice %0 {offsets = [0, 0, 0], sizes = [1, 1, 128], strides = [1, 1, 1]} : vector<1x3x128xf32> to vector<1x1x128xf32>
      %9 = vector.extract_strided_slice %7 {offsets = [0, 0], sizes = [1, 1], strides = [1, 1]} : vector<1x9xf32> to vector<1x1xf32>
      %10 = vector.shape_cast %9 : vector<1x1xf32> to vector<1x1x1xf32>
      %11 = vector.broadcast %10 : vector<1x1x1xf32> to vector<1x1x128xf32>
      %12 = arith.mulf %8, %11 : vector<1x1x128xf32>
      %13 = vector.extract_strided_slice %0 {offsets = [0, 1, 0], sizes = [1, 1, 128], strides = [1, 1, 1]} : vector<1x3x128xf32> to vector<1x1x128xf32>
      %14 = vector.extract_strided_slice %7 {offsets = [0, 3], sizes = [1, 1], strides = [1, 1]} : vector<1x9xf32> to vector<1x1xf32>
      %15 = vector.shape_cast %14 : vector<1x1xf32> to vector<1x1x1xf32>
      %16 = vector.broadcast %15 : vector<1x1x1xf32> to vector<1x1x128xf32>
      %17 = arith.mulf %13, %16 : vector<1x1x128xf32>
      %18 = arith.addf %12, %17 : vector<1x1x128xf32>
      %19 = vector.extract_strided_slice %0 {offsets = [0, 2, 0], sizes = [1, 1, 128], strides = [1, 1, 1]} : vector<1x3x128xf32> to vector<1x1x128xf32>
      %20 = vector.extract_strided_slice %7 {offsets = [0, 6], sizes = [1, 1], strides = [1, 1]} : vector<1x9xf32> to vector<1x1xf32>
      %21 = vector.shape_cast %20 : vector<1x1xf32> to vector<1x1x1xf32>
      %22 = vector.broadcast %21 : vector<1x1x1xf32> to vector<1x1x128xf32>
      %23 = arith.mulf %19, %22 : vector<1x1x128xf32>
      %24 = arith.addf %18, %23 : vector<1x1x128xf32>
      %25 = vector.extract_strided_slice %0 {offsets = [0, 0, 0], sizes = [1, 1, 128], strides = [1, 1, 1]} : vector<1x3x128xf32> to vector<1x1x128xf32>
      %26 = vector.extract_strided_slice %7 {offsets = [0, 1], sizes = [1, 1], strides = [1, 1]} : vector<1x9xf32> to vector<1x1xf32>
      %27 = vector.shape_cast %26 : vector<1x1xf32> to vector<1x1x1xf32>
      %28 = vector.broadcast %27 : vector<1x1x1xf32> to vector<1x1x128xf32>
      %29 = arith.mulf %25, %28 : vector<1x1x128xf32>
      %30 = vector.extract_strided_slice %0 {offsets = [0, 1, 0], sizes = [1, 1, 128], strides = [1, 1, 1]} : vector<1x3x128xf32> to vector<1x1x128xf32>
      %31 = vector.extract_strided_slice %7 {offsets = [0, 4], sizes = [1, 1], strides = [1, 1]} : vector<1x9xf32> to vector<1x1xf32>
      %32 = vector.shape_cast %31 : vector<1x1xf32> to vector<1x1x1xf32>
      %33 = vector.broadcast %32 : vector<1x1x1xf32> to vector<1x1x128xf32>
      %34 = arith.mulf %30, %33 : vector<1x1x128xf32>
      %35 = arith.addf %29, %34 : vector<1x1x128xf32>
      %36 = vector.extract_strided_slice %0 {offsets = [0, 2, 0], sizes = [1, 1, 128], strides = [1, 1, 1]} : vector<1x3x128xf32> to vector<1x1x128xf32>
      %37 = vector.extract_strided_slice %7 {offsets = [0, 7], sizes = [1, 1], strides = [1, 1]} : vector<1x9xf32> to vector<1x1xf32>
      %38 = vector.shape_cast %37 : vector<1x1xf32> to vector<1x1x1xf32>
      %39 = vector.broadcast %38 : vector<1x1x1xf32> to vector<1x1x128xf32>
      %40 = arith.mulf %36, %39 : vector<1x1x128xf32>
      %41 = arith.addf %35, %40 : vector<1x1x128xf32>
      %42 = vector.extract_strided_slice %0 {offsets = [0, 0, 0], sizes = [1, 1, 128], strides = [1, 1, 1]} : vector<1x3x128xf32> to vector<1x1x128xf32>
      %43 = vector.extract_strided_slice %7 {offsets = [0, 2], sizes = [1, 1], strides = [1, 1]} : vector<1x9xf32> to vector<1x1xf32>
      %44 = vector.shape_cast %43 : vector<1x1xf32> to vector<1x1x1xf32>
      %45 = vector.broadcast %44 : vector<1x1x1xf32> to vector<1x1x128xf32>
      %46 = arith.mulf %42, %45 : vector<1x1x128xf32>
      %47 = vector.extract_strided_slice %0 {offsets = [0, 1, 0], sizes = [1, 1, 128], strides = [1, 1, 1]} : vector<1x3x128xf32> to vector<1x1x128xf32>
      %48 = vector.extract_strided_slice %7 {offsets = [0, 5], sizes = [1, 1], strides = [1, 1]} : vector<1x9xf32> to vector<1x1xf32>
      %49 = vector.shape_cast %48 : vector<1x1xf32> to vector<1x1x1xf32>
      %50 = vector.broadcast %49 : vector<1x1x1xf32> to vector<1x1x128xf32>
      %51 = arith.mulf %47, %50 : vector<1x1x128xf32>
      %52 = arith.addf %46, %51 : vector<1x1x128xf32>
      %53 = vector.extract_strided_slice %0 {offsets = [0, 2, 0], sizes = [1, 1, 128], strides = [1, 1, 1]} : vector<1x3x128xf32> to vector<1x1x128xf32>
      %54 = vector.extract_strided_slice %7 {offsets = [0, 8], sizes = [1, 1], strides = [1, 1]} : vector<1x9xf32> to vector<1x1xf32>
      %55 = vector.shape_cast %54 : vector<1x1xf32> to vector<1x1x1xf32>
      %56 = vector.broadcast %55 : vector<1x1x1xf32> to vector<1x1x128xf32>
      %57 = arith.mulf %53, %56 : vector<1x1x128xf32>
      %58 = arith.addf %52, %57 : vector<1x1x128xf32>
      %59 = tpu.concatenate %24, %41, %58 in 1 : vector<1x1x128xf32>, vector<1x1x128xf32>, vector<1x1x128xf32> -> vector<1x3x128xf32>
      %60 = vector.shape_cast %59 : vector<1x3x128xf32> to vector<3x128xf32>
      %c0_6 = arith.constant 0 : index
      %c0_7 = arith.constant 0 : index
      %61 = vector.load %arg16[%c0_6, %c0_7] : memref<3x512xbf16, #tpu.memory_space<vmem>>, vector<3x512xbf16>
      %c0_8 = arith.constant 0 : index
      %c0_9 = arith.constant 0 : index
      %62 = vector.load %arg17[%c0_8, %c0_9] : memref<1x512xf32, #tpu.memory_space<vmem>>, vector<1x512xf32>
      %63 = arith.truncf %60 : vector<3x128xf32> to vector<3x128xbf16>
      %cst = arith.constant dense<0.000000e+00> : vector<128x512xf32>
      %64 = tpu.matmul %63, %61, %cst {dimension_numbers = #tpu.dot_dimension_numbers<[0], [0], [1], [1], [0, 1, 1, 1], [], []>} : vector<3x128xbf16>, vector<3x512xbf16>, vector<128x512xf32> -> vector<128x512xf32>
      %65 = vector.broadcast %62 : vector<1x512xf32> to vector<128x512xf32>
      %66 = arith.addf %64, %65 : vector<128x512xf32>
      %cst_10 = arith.constant 0.000000e+00 : f32
      %67 = vector.broadcast %cst_10 : f32 to vector<128x512xf32>
      %68 = arith.maximumf %66, %67 : vector<128x512xf32>
      %c0_11 = arith.constant 0 : index
      %c0_12 = arith.constant 0 : index
      %69 = vector.load %arg18[%c0_11, %c0_12] : memref<512x256xbf16, #tpu.memory_space<vmem>>, vector<512x256xbf16>
      %c0_13 = arith.constant 0 : index
      %c0_14 = arith.constant 0 : index
      %70 = vector.load %arg19[%c0_13, %c0_14] : memref<1x256xf32, #tpu.memory_space<vmem>>, vector<1x256xf32>
      %71 = arith.truncf %68 : vector<128x512xf32> to vector<128x512xbf16>
      %cst_15 = arith.constant dense<0.000000e+00> : vector<128x256xf32>
      %72 = tpu.matmul %71, %69, %cst_15 {dimension_numbers = #tpu.dot_dimension_numbers<[1], [0], [0], [1], [0, 0, 1, 1], [], []>} : vector<128x512xbf16>, vector<512x256xbf16>, vector<128x256xf32> -> vector<128x256xf32>
      %73 = vector.broadcast %70 : vector<1x256xf32> to vector<128x256xf32>
      %74 = arith.addf %72, %73 : vector<128x256xf32>
      %cst_16 = arith.constant 0.000000e+00 : f32
      %75 = vector.broadcast %cst_16 : f32 to vector<128x256xf32>
      %76 = arith.maximumf %74, %75 : vector<128x256xf32>
      %c0_17 = arith.constant 0 : index
      %c0_18 = arith.constant 0 : index
      %77 = vector.load %arg20[%c0_17, %c0_18] : memref<256x128xbf16, #tpu.memory_space<vmem>>, vector<256x128xbf16>
      %78 = arith.truncf %76 : vector<128x256xf32> to vector<128x256xbf16>
      %cst_19 = arith.constant dense<0.000000e+00> : vector<128x128xf32>
      %79 = tpu.matmul %78, %77, %cst_19 {dimension_numbers = #tpu.dot_dimension_numbers<[1], [0], [0], [1], [0, 0, 1, 1], [], []>} : vector<128x256xbf16>, vector<256x128xbf16>, vector<128x128xf32> -> vector<128x128xf32>
      %80 = vector.shape_cast %79 : vector<128x128xf32> to vector<1x128x128xf32>
      %cst_20 = arith.constant dense<0xFF800000> : vector<1x128xf32>
      %81 = vector.multi_reduction <maximumf>, %80, %cst_20 [1] : vector<1x128x128xf32> to vector<1x128xf32>
      %c0_i32_21 = arith.constant 0 : i32
      %82 = arith.cmpi eq, %arg2, %c0_i32_21 : i32
      %83 = arith.extui %82 : i1 to i32
      %c0_i32_22 = arith.constant 0 : i32
      %84 = arith.cmpi ne, %83, %c0_i32_22 : i32
      scf.if %84 {
        %cst_31 = arith.constant 0xFF800000 : f32
        %94 = vector.broadcast %cst_31 : f32 to vector<1x128xf32>
        %c0_32 = arith.constant 0 : index
        %c0_33 = arith.constant 0 : index
        %c0_34 = arith.constant 0 : index
        %95 = vector.load %arg22[%c0_32, %c0_33, %c0_34] : memref<1x1x128xf32, #tpu.memory_space<vmem>>, vector<1x1x128xf32>
        %96 = vector.shape_cast %95 : vector<1x1x128xf32> to vector<1x128xf32>
        %97 = vector.shape_cast %94 : vector<1x128xf32> to vector<1x1x128xf32>
        tpu.vector_store %arg22[%c0_32, %c0_33, %c0_34], %97 {strides = array<i32>} : memref<1x1x128xf32, #tpu.memory_space<vmem>>, vector<1x1x128xf32>,
      } else {
      }
      %c0_23 = arith.constant 0 : index
      %c0_24 = arith.constant 0 : index
      %c0_25 = arith.constant 0 : index
      %85 = vector.load %arg22[%c0_23, %c0_24, %c0_25] : memref<1x1x128xf32, #tpu.memory_space<vmem>>, vector<1x1x128xf32>
      %86 = vector.shape_cast %85 : vector<1x1x128xf32> to vector<1x128xf32>
      %87 = arith.maximumf %86, %81 : vector<1x128xf32>
      %c0_26 = arith.constant 0 : index
      %c0_27 = arith.constant 0 : index
      %c0_28 = arith.constant 0 : index
      %88 = vector.load %arg22[%c0_26, %c0_27, %c0_28] : memref<1x1x128xf32, #tpu.memory_space<vmem>>, vector<1x1x128xf32>
      %89 = vector.shape_cast %88 : vector<1x1x128xf32> to vector<1x128xf32>
      %90 = vector.shape_cast %87 : vector<1x128xf32> to vector<1x1x128xf32>
      tpu.vector_store %arg22[%c0_26, %c0_27, %c0_28], %90 {strides = array<i32>} : memref<1x1x128xf32, #tpu.memory_space<vmem>>, vector<1x1x128xf32>,
      %c0_i32_29 = arith.constant 0 : i32
      %91 = arith.cmpi eq, %arg2, %c0_i32_29 : i32
      %92 = arith.extui %91 : i1 to i32
      %c0_i32_30 = arith.constant 0 : i32
      %93 = arith.cmpi ne, %92, %c0_i32_30 : i32
      scf.if %93 {
        %c0_31 = arith.constant 0 : index
        %c0_32 = arith.constant 0 : index
        %c0_33 = arith.constant 0 : index
        %94 = vector.load %arg22[%c0_31, %c0_32, %c0_33] : memref<1x1x128xf32, #tpu.memory_space<vmem>>, vector<1x1x128xf32>
        %95 = vector.shape_cast %94 : vector<1x1x128xf32> to vector<1x128xf32>
        %c0_34 = arith.constant 0 : index
        %c0_35 = arith.constant 0 : index
        %96 = vector.load %arg21[%c0_34, %c0_35] : memref<1x128xf32, #tpu.memory_space<vmem>>, vector<1x128xf32>
        %97 = arith.addf %95, %96 : vector<1x128xf32>
        %c0_36 = arith.constant 0 : index
        %c0_37 = arith.constant 0 : index
        %c0_38 = arith.constant 0 : index
        %98 = vector.load %arg22[%c0_36, %c0_37, %c0_38] : memref<1x1x128xf32, #tpu.memory_space<vmem>>, vector<1x1x128xf32>
        %99 = vector.shape_cast %98 : vector<1x1x128xf32> to vector<1x128xf32>
        %100 = vector.shape_cast %97 : vector<1x128xf32> to vector<1x1x128xf32>
        tpu.vector_store %arg22[%c0_36, %c0_37, %c0_38], %100 {strides = array<i32>} : memref<1x1x128xf32, #tpu.memory_space<vmem>>, vector<1x1x128xf32>,
      } else {
      }
    } else {
    }
    return
  }
  func.func @transform_0(%arg0: i32, %arg1: i32, %arg2: i32) -> (i32, i32, i32) {
    %c0_i32 = arith.constant 0 : i32
    %c0_i32_0 = arith.constant 0 : i32
    return %arg0, %c0_i32, %arg2 : i32, i32, i32
  }
  func.func @transform_1(%arg0: i32, %arg1: i32, %arg2: i32) -> (i32, i32) {
    %c0_i32 = arith.constant 0 : i32
    %c0_i32_0 = arith.constant 0 : i32
    %c0_i32_1 = arith.constant 0 : i32
    return %c0_i32, %c0_i32_0 : i32, i32
  }
  func.func @transform_2(%arg0: i32, %arg1: i32, %arg2: i32) -> (i32, i32) {
    %c0_i32 = arith.constant 0 : i32
    %c0_i32_0 = arith.constant 0 : i32
    %c0_i32_1 = arith.constant 0 : i32
    return %c0_i32, %c0_i32_0 : i32, i32
  }
  func.func @transform_3(%arg0: i32, %arg1: i32, %arg2: i32) -> (i32, i32) {
    %c0_i32 = arith.constant 0 : i32
    %c0_i32_0 = arith.constant 0 : i32
    %c0_i32_1 = arith.constant 0 : i32
    return %c0_i32, %c0_i32_0 : i32, i32
  }
  func.func @transform_4(%arg0: i32, %arg1: i32, %arg2: i32) -> (i32, i32) {
    %c0_i32 = arith.constant 0 : i32
    %c0_i32_0 = arith.constant 0 : i32
    %c0_i32_1 = arith.constant 0 : i32
    return %c0_i32, %c0_i32_0 : i32, i32
  }
  func.func @transform_5(%arg0: i32, %arg1: i32, %arg2: i32) -> (i32, i32) {
    %c0_i32 = arith.constant 0 : i32
    %c0_i32_0 = arith.constant 0 : i32
    %c0_i32_1 = arith.constant 0 : i32
    return %c0_i32, %c0_i32_0 : i32, i32
  }
  func.func @transform_6(%arg0: i32, %arg1: i32, %arg2: i32) -> (i32, i32) {
    %c0_i32 = arith.constant 0 : i32
    %c0_i32_0 = arith.constant 0 : i32
    %c0_i32_1 = arith.constant 0 : i32
    return %c0_i32, %c0_i32_0 : i32, i32
  }
  func.func @transform_7(%arg0: i32, %arg1: i32, %arg2: i32) -> (i32, i32) {
    %c0_i32 = arith.constant 0 : i32
    %c0_i32_0 = arith.constant 0 : i32
    %c0_i32_1 = arith.constant 0 : i32
    return %c0_i32, %c0_i32_0 : i32, i32
  }
  func.func @transform_8(%arg0: i32, %arg1: i32, %arg2: i32) -> (i32, i32) {
    %c0_i32 = arith.constant 0 : i32
    %c0_i32_0 = arith.constant 0 : i32
    %c0_i32_1 = arith.constant 0 : i32
    return %c0_i32, %c0_i32_0 : i32, i32
  }
  func.func @transform_9(%arg0: i32, %arg1: i32, %arg2: i32) -> (i32, i32) {
    %c0_i32 = arith.constant 0 : i32
    %c0_i32_0 = arith.constant 0 : i32
    %c0_i32_1 = arith.constant 0 : i32
    return %c0_i32, %c0_i32_0 : i32, i32
  }
  func.func @transform_10(%arg0: i32, %arg1: i32, %arg2: i32) -> (i32, i32) {
    %c0_i32 = arith.constant 0 : i32
    %c0_i32_0 = arith.constant 0 : i32
    %c0_i32_1 = arith.constant 0 : i32
    return %c0_i32, %c0_i32_0 : i32, i32
  }
  func.func @transform_11(%arg0: i32, %arg1: i32, %arg2: i32) -> (i32, i32) {
    %c0_i32 = arith.constant 0 : i32
    %c0_i32_0 = arith.constant 0 : i32
    %c0_i32_1 = arith.constant 0 : i32
    return %c0_i32, %c0_i32_0 : i32, i32
  }
  func.func @transform_12(%arg0: i32, %arg1: i32, %arg2: i32) -> (i32, i32) {
    %c0_i32 = arith.constant 0 : i32
    %c0_i32_0 = arith.constant 0 : i32
    %c0_i32_1 = arith.constant 0 : i32
    return %c0_i32, %c0_i32_0 : i32, i32
  }
  func.func @transform_13(%arg0: i32, %arg1: i32, %arg2: i32) -> (i32, i32) {
    %c0_i32 = arith.constant 0 : i32
    %c0_i32_0 = arith.constant 0 : i32
    %c0_i32_1 = arith.constant 0 : i32
    return %c0_i32, %c0_i32_0 : i32, i32
  }
  func.func @transform_14(%arg0: i32, %arg1: i32, %arg2: i32) -> (i32, i32) {
    %c0_i32 = arith.constant 0 : i32
    %c0_i32_0 = arith.constant 0 : i32
    %c0_i32_1 = arith.constant 0 : i32
    return %c0_i32, %c0_i32_0 : i32, i32
  }
  func.func @transform_15(%arg0: i32, %arg1: i32, %arg2: i32) -> (i32, i32) {
    %c0_i32 = arith.constant 0 : i32
    %c0_i32_0 = arith.constant 0 : i32
    %c0_i32_1 = arith.constant 0 : i32
    return %c0_i32, %c0_i32_0 : i32, i32
  }
  func.func @transform_16(%arg0: i32, %arg1: i32, %arg2: i32) -> (i32, i32) {
    %c0_i32 = arith.constant 0 : i32
    %c0_i32_0 = arith.constant 0 : i32
    %c0_i32_1 = arith.constant 0 : i32
    return %c0_i32, %c0_i32_0 : i32, i32
  }
  func.func @transform_17(%arg0: i32, %arg1: i32, %arg2: i32) -> (i32, i32) {
    %c0_i32 = arith.constant 0 : i32
    %c0_i32_0 = arith.constant 0 : i32
    %c0_i32_1 = arith.constant 0 : i32
    return %c0_i32, %c0_i32_0 : i32, i32
  }
  func.func @transform_18(%arg0: i32, %arg1: i32, %arg2: i32) -> (i32, i32) {
    %c0_i32 = arith.constant 0 : i32
    %c0_i32_0 = arith.constant 0 : i32
    %c0_i32_1 = arith.constant 0 : i32
    return %c0_i32, %c0_i32_0 : i32, i32
  }
  func.func @transform_19(%arg0: i32, %arg1: i32, %arg2: i32) -> (i32, i32, i32) {
    %c0_i32 = arith.constant 0 : i32
    %c0_i32_0 = arith.constant 0 : i32
    %c0_i32_1 = arith.constant 0 : i32
    return %arg0, %c0_i32, %c0_i32_0 : i32, i32, i32
  }
}

</mosaic_0001>

<bundles_post_ra>
// kernel: tpu_custom_call.1
= control target key start
LH: loop header
LB: loop body
LE: loop exit
PB: predicated region body
PF: predicated region fallthrough
CT: control target
= control target key end

     0   :  { %s7064_s0 = inlined_call_operand.vmem [shape: f32[2,3,128], index: 0, kind: input, shape index: {}]   ;;  %s7065_s1 = inlined_call_operand.vmem [shape: bf16[3,128], index: 1, kind: input, shape index: {}]   ;;  %s7066_s2 = inlined_call_operand.hbm [shape: f32[1,128], index: 2, kind: input, shape index: {}]   ;;  %s7067_s3 = inlined_call_operand.hbm [shape: bf16[128,256], index: 3, kind: input, shape index: {}]   ;;  %s7068_s4 = inlined_call_operand.vmem [shape: f32[1,256], index: 4, kind: input, shape index: {}]   ;;  %s7069_s5 = inlined_call_operand.hbm [shape: bf16[256,512], index: 5, kind: input, shape index: {}]   ;;  %s7070_s6 = inlined_call_operand.vmem [shape: f32[1,512], index: 6, kind: input, shape index: {}]   ;;  %s7071_s7 = inlined_call_operand.hbm [shape: bf16[512,256], index: 7, kind: input, shape index: {}]   ;;  %s7072_s8 = inlined_call_operand.vmem [shape: f32[1,256], index: 8, kind: input, shape index: {}]   ;;  %s7073_s9 = inlined_call_operand.hbm [shape: bf16[256,128], index: 9, kind: input, shape index: {}]   ;;  %s7074_s10 = inlined_call_operand.hbm [shape: f32[1,128], index: 10, kind: input, shape index: {}]   ;;  %s7075_s11 = inlined_call_operand.vmem [shape: bf16[128,9], index: 11, kind: input, shape index: {}]   ;;  %s7076_s12 = inlined_call_operand.hbm [shape: f32[1,9], index: 12, kind: input, shape index: {}]   ;;  %s7077_s13 = inlined_call_operand.vmem [shape: bf16[3,512], index: 13, kind: input, shape index: {}]   ;;  %s7078_s14 = inlined_call_operand.vmem [shape: f32[1,512], index: 14, kind: input, shape index: {}]   ;;  %s7079_s15 = inlined_call_operand.hbm [shape: bf16[512,256], index: 15, kind: input, shape index: {}]   ;;  %s7080_s16 = inlined_call_operand.hbm [shape: f32[1,256], index: 16, kind: input, shape index: {}]   ;;  %s7081_s17 = inlined_call_operand.vmem [shape: bf16[256,128], index: 17, kind: input, shape index: {}]   ;;  %s7082_s18 = inlined_call_operand.vmem [shape: f32[1,128], index: 18, kind: input, shape index: {}]   ;;  %s7083_s19 = inlined_call_operand.hbm [shape: f32[2,1,128], index: 19, kind: output, shape index: {}]  }
   0x1   :  { %7103 = sst [smem:[#allocation36_spill]] %s7064_s0 }
   0x2   :  { %7104 = sst [smem:[#allocation37_spill]] %s7065_s1 }
   0x3   :  { %7105 = sst [smem:[#allocation38_spill]] %s7066_s2 }
   0x4   :  { %7106 = sst [smem:[#allocation39_spill]] %s7067_s3 }
   0x5   :  { %7107 = sst [smem:[#allocation40_spill]] %s7071_s7 }
   0x6   :  { %7108 = sst [smem:[#allocation41_spill]] %s7072_s8 }
   0x7   :  { %7109 = sst [smem:[#allocation42_spill]] %s7074_s10 }
   0x8   :  { %7110 = sst [smem:[#allocation43_spill]] %s7075_s11 }
   0x9   :  { %7111 = sst [smem:[#allocation44_spill]] %s7077_s13 }
   0xa   :  { %7112 = sst [smem:[#allocation45_spill]] %s7078_s14 }
   0xb   :  { %7113 = sst [smem:[#allocation46_spill]] %s7081_s17 }
   0xc   :  { %7114 = sst [smem:[#allocation47_spill]] %s7082_s18 }
   0xd   :  { %7115 = sst [smem:[#allocation48_spill]] %s7083_s19 }
   0xe   :  { %24 = vsyncpa [#allocation5], 0 }
   0xf   :  { %25 = vsyncpa [#allocation8], 0 }
  0x10   :  { %26 = vsyncpa [#allocation11], 0 }
  0x11   :  { %27 = vsyncpa [#allocation14], 0 }
  0x12   :  { %28 = vsyncpa [#allocation17], 0 }
  0x13   :  { %29 = vsyncpa [#allocation6], 0 }
  0x14   :  { %31 = vsyncpa [#allocation6 + $0x1], 0  ;;  %s6058_s0 = smov 0   ;;  %s6060_s30 = smov 0  }
  0x15   :  { %s6062_s20 = smov 0   ;;  %s6064_s21 = smov 0  }
  0x16   :  { %s6066_s1 = smov 0   ;;  %s6068_s22 = smov 0  }
  0x17   :  { %s6070_s2 = smov 0   ;;  %s6072_s23 = smov 0  }
  0x18 LB: > { %7116 = sst [smem:[#allocation26_spill]] %s5894_s0  ;;  %s4461_s24 = sadd.s32 4294967295, %s5922_s23   ;;  %s5922_s23 = sphi %s6072_s23, %s37_s23   ;;  %s5918_s2 = sphi %s6070_s2, %s7162_s2   ;;  %s5914_s22 = sphi %s6068_s22, %s7161_s22   ;;  %s5910_s1 = sphi %s6066_s1, %s7160_s1   ;;  %s5906_s21 = sphi %s6064_s21, %s7159_s21   ;;  %s5902_s20 = sphi %s6062_s20, %s7158_s20   ;;  %s5898_s30 = sphi %s6060_s30, %s7164_s30   ;;  %s5894_s0 = sphi %s6058_s0, %s7163_s0  }
  0x19   : > { %7117 = sst [smem:[#allocation27_spill]] %s5902_s20  ;;  %s4462_s25 = sadd.s32 4294967294, %s5922_s23  }
  0x1a   : > { %7118 = sst [smem:[#allocation28_spill]] %s5914_s22  ;;  %s52_s3 = sadd.s32 1, %s5914_s22 }
  0x1b   : > { %7119 = sst [smem:[#allocation29_spill]] %s5918_s2  ;;  %s56_s26 = sadd.s32 1, %s5918_s2 }
  0x1c   : > { %7120 = sst [smem:[#allocation30_spill]] %s5922_s23  ;;  %p54_p0 = scmp.ge.s32.totalorder %s52_s3, 2 }
  0x1d   : > { %s469_s27 = sadd.s32 1, %s5902_s20  ;;  %p479_p1 = scmp.ne.s32.totalorder %s5902_s20, %s5898_s30 }
  0x1e   : > { %p480_p2 = scmp.eq.s32.totalorder %s4461_s24, 3  ;;  %s7166_s3 = smov (%p54_p0, %s52_s3), 0 }
  0x1f   : > { %7121 = sst [smem:[#allocation31_spill]] %s7166_s3  ;;  %s7168_s26 = smov (!%p54_p0, %s56_s26), %s5918_s2 }
  0x20   : > { %p6108_p3 = por %p480_p2, %p479_p1  ;;  %p485_p4 = scmp.ne.s32.totalorder %s5898_s30, %s5894_s0 }
  0x21   : > { %p58_p5 = scmp.ge.s32.totalorder %s7168_s26, 2  ;;  %p486_p6 = scmp.eq.s32.totalorder %s4462_s25, 3 }
  0x22   : > { %s7122_s28 = scalar_select %p6108_p3, 1, 0 }
  0x23   : > { %p4463_p7 = scmp.ge.s32.totalorder %s5922_s23, 1  ;;  %p493_p8 = scmp.lt.s32.totalorder %s5922_s23, 5 }
  0x24   : > { %7123 = sst [smem:[#allocation32_spill]] %s7122_s28  ;;  %s7170_s26 = smov (%p58_p5, %s7168_s26), 0 }
  0x25   : > { %7124 = sst [smem:[#allocation33_spill]] %s7170_s26  ;;  %p6118_p9 = por %p486_p6, %p485_p4 }
  0x26   : > { %p6122_p10 = pnand %p4463_p7, %p493_p8  ;;  %s466_s3 = ssub.s32 %s5918_s2, %s7170_s26 }
  0x27   : > { %s7125_s29 = scalar_select %p6118_p9, 1, 0 }
  0x28   : > { %s7127_s22 = scalar_select %p6122_p10, 1, 0 }
  0x29   : > { %7126 = sst [smem:[#allocation34_spill]] %s7125_s29  ;;  %p467_p11 = scmp.eq.s32.totalorder %s466_s3, 0 }
  0x2a   : > { %p5045_p12 = pneg %p6122_p10  ;;  %p6130_p13 = scmp.eq.s32.totalorder %s4461_s24, 0 }
  0x2b   : > { %s6135_s0 = scalar_select %p467_p11, %s5902_s20, %s469_s27  }
  0x2c   : > { %s7128_s25 = scalar_select %p6130_p13, 1, 0 }
  0x2d   : > { %7129 = sst [smem:[#allocation35_spill]] %s6135_s0  ;;  %p6139_p0 = pnand %p6130_p13, %p5045_p12 }
  0x2e   : > { %s5924_s29 = smov [#allocation7]   ;;  %s7131_s2 = sld [smem:[#allocation39_spill]] }
  0x2f   : > { %s519_s19 = sshll.u32 %s5924_s29, 4  ;;  %p6151_p2 = pneg %p6139_p0  ;;  %s520_s19 = int_to_ptr.vmem [resolvable:$true] %s519_s19 }
  0x34   : > { %s7132_s28 = smov %s7131_s2  ;;  %s5556_s18 = scalar_lea.hbm %s7131_s2, 2048 }
  0x35   : > { %p5557_p1 = scmp.ne.s32.totalorder %s7132_s28, %s5556_s18  ;;  %p5563_p6 = scmp.lt.u32.totalorder %s5556_s18, %s7132_s28 }
  0x37   : > { %p5559_p4 = pnand %p6151_p2, %p5557_p1 }
  0x39   : > { %p5560_p5 = pneg %p5559_p4 }
  0x3b   : > { %p5565_p7 = pnand %p5563_p6, %p5560_p5 }
  0x3d   : > { %5568 = shalt.err (!%p5565_p7)
}
  0x3e   : > { %s5569_s2 = scalar_lea.vmem %s520_s19, 2048  ;;  %p5577_p9 = scmp.lt.s32.totalorder %s520_s19, %s520_s19 }
  0x3f   : > { %p5570_p8 = scmp.ne.s32.totalorder %s520_s19, %s5569_s2  ;;  %p5578_p3 = scmp.lt.s32.totalorder %s5569_s2, %s5569_s2 }
  0x41   : > { %p5572_p11 = pnand %p5570_p8, %p6151_p2  ;;  %p5579_p13 = por %p5578_p3, %p5577_p9 }
  0x43   : > { %p5573_p12 = pneg %p5572_p11 }
  0x45   : > { %p5580_p10 = pnand %p5579_p13, %p5573_p12 }
  0x47   : > { %5583 = shalt.err (!%p5580_p10)
}
  0x48   : > { %s5925_s17 = smov 128   ;;  %s5926_s26 = smov 8  }
  0x49   : > { %5051 = dma.hbm_to_vmem [thread:$0]  (!%p6139_p0), %s7132_s28, 2048, %s520_s19, [#allocation8], %s5925_s17, %s5925_s17, %s5926_s26  }
  0x4a   : > { %s5927_s3 = smov [#allocation10]   ;;  %s5928_s29 = smov [#allocation13]  }
  0x4b   : > { %s551_s24 = sshll.u32 %s5927_s3, 4  ;;  %s581_s20 = sshll.u32 %s5928_s29, 4  ;;  %s552_s24 = int_to_ptr.vmem [resolvable:$true] %s551_s24  ;;  %s6170_s20 = int_to_ptr.vmem [resolvable:$true] %s581_s20 }
  0x4c   : > { %s7134_s7 = sld [smem:[#allocation40_spill]] }
  0x52   : > { %s5584_s13 = scalar_lea.hbm %s7134_s7, 8192 }
  0x53   : > { %p5585_p3 = scmp.ne.s32.totalorder %s7134_s7, %s5584_s13  ;;  %p5591_p13 = scmp.lt.u32.totalorder %s5584_s13, %s7134_s7 }
  0x55   : > { %p5587_p9 = pnand %p5585_p3, %p6151_p2 }
  0x57   : > { %p5588_p10 = pneg %p5587_p9 }
  0x59   : > { %p5593_p1 = pnand %p5591_p13, %p5588_p10 }
  0x5b   : > { %5596 = shalt.err (!%p5593_p1)
}
  0x5c   : > { %s5597_s0 = scalar_lea.vmem %s552_s24, 8192  ;;  %p5605_p7 = scmp.lt.s32.totalorder %s552_s24, %s552_s24 }
  0x5d   : > { %p5598_p4 = scmp.ne.s32.totalorder %s552_s24, %s5597_s0  ;;  %p5606_p8 = scmp.lt.s32.totalorder %s5597_s0, %s5597_s0 }
  0x5f   : > { %p5600_p5 = pnand %p5598_p4, %p6151_p2  ;;  %p5607_p11 = por %p5606_p8, %p5605_p7 }
  0x61   : > { %p5601_p6 = pneg %p5600_p5 }
  0x63   : > { %p5608_p12 = pnand %p5607_p11, %p5601_p6 }
  0x65   : > { %5611 = shalt.err (!%p5608_p12)
}
  0x66   : > { %5057 = dma.hbm_to_vmem [thread:$0]  (!%p6139_p0), %s7134_s7, 8192, %s552_s24, [#allocation11], %s5925_s17, %s5925_s17, %s5926_s26  }
  0x67   : > { %s7135_s10 = sld [smem:[#allocation42_spill]] }
  0x6d   : > { %s5612_s3 = scalar_lea.hbm %s7135_s10, 16 }
  0x6e   : > { %p5613_p3 = scmp.ne.s32.totalorder %s7135_s10, %s5612_s3  ;;  %p5619_p13 = scmp.lt.u32.totalorder %s5612_s3, %s7135_s10 }
  0x70   : > { %p5615_p9 = pnand %p5613_p3, %p6151_p2 }
  0x72   : > { %p5616_p10 = pneg %p5615_p9 }
  0x74   : > { %p5621_p1 = pnand %p5619_p13, %p5616_p10 }
  0x76   : > { %5624 = shalt.err (!%p5621_p1)
}
  0x77   : > { %s5625_s24 = scalar_lea.vmem %s6170_s20, 16  ;;  %s5632_s0 = scalar_lea.vmem %s6170_s20, 32 }
  0x78   : > { %p5626_p4 = scmp.ne.s32.totalorder %s6170_s20, %s5625_s24  ;;  %p5633_p7 = scmp.lt.s32.totalorder %s6170_s20, %s6170_s20 }
  0x79   : > { %p5634_p8 = scmp.lt.s32.totalorder %s5632_s0, %s5625_s24 }
  0x7a   : > { %p5628_p5 = pnand %p5626_p4, %p6151_p2 }
  0x7b   : > { %p5635_p11 = por %p5634_p8, %p5633_p7 }
  0x7c   : > { %p5629_p6 = pneg %p5628_p5 }
  0x7e   : > { %p5636_p12 = pnand %p5635_p11, %p5629_p6 }
  0x80   : > { %5639 = shalt.err (!%p5636_p12)
}
  0x81   : > { %5063 = dma.hbm_to_vmem [thread:$0]  (!%p6139_p0), %s7135_s10, 16, %s6170_s20, [#allocation14]  }
  0x82   : > { %s5929_s13 = smov [#allocation16]   ;;  %s5640_s2 = scalar_lea.hbm %s7079_s15, 8192 }
  0x83   : > { %s611_s14 = sshll.u32 %s5929_s13, 4  ;;  %p5641_p3 = scmp.ne.s32.totalorder %s7079_s15, %s5640_s2  ;;  %s612_s14 = int_to_ptr.vmem [resolvable:$true] %s611_s14 }
  0x84   : > { %p5647_p13 = scmp.lt.u32.totalorder %s5640_s2, %s7079_s15 }
  0x85   : > { %p5643_p9 = pnand %p5641_p3, %p6151_p2 }
  0x87   : > { %p5644_p10 = pneg %p5643_p9 }
  0x89   : > { %p5649_p1 = pnand %p5647_p13, %p5644_p10 }
  0x8b   : > { %5652 = shalt.err (!%p5649_p1)
}
  0x8c   : > { %s5653_s20 = scalar_lea.vmem %s612_s14, 8192  ;;  %p5661_p7 = scmp.lt.s32.totalorder %s612_s14, %s612_s14 }
  0x8d   : > { %p5654_p4 = scmp.ne.s32.totalorder %s612_s14, %s5653_s20  ;;  %p5662_p8 = scmp.lt.s32.totalorder %s5653_s20, %s5653_s20 }
  0x8f   : > { %p5656_p5 = pnand %p5654_p4, %p6151_p2  ;;  %p5663_p11 = por %p5662_p8, %p5661_p7 }
  0x91   : > { %p5657_p6 = pneg %p5656_p5 }
  0x93   : > { %p5664_p12 = pnand %p5663_p11, %p5657_p6 }
  0x95   : > { %5667 = shalt.err (!%p5664_p12)
}
  0x96   : > { %5069 = dma.hbm_to_vmem [thread:$0]  (!%p6139_p0), %s7079_s15, 8192, %s612_s14, [#allocation17], %s5925_s17, %s5925_s17, %s5926_s26  }
  0x97   : > { %s5930_s13 = smov [#allocation4]   ;;  %s5931_s29 = smov [#allocation9]  }
  0x98   : > { %s509_s3 = sshll.u32 %s5930_s13, 4  ;;  %s535_s2 = sshll.u32 %s5931_s29, 4  ;;  %s510_s3 = int_to_ptr.vmem [resolvable:$true] %s509_s3  ;;  %s536_s2 = int_to_ptr.vmem [resolvable:$true] %s535_s2 }
  0x99   : > { %s7136_s24 = sld [smem:[#allocation38_spill]] }
  0x9f   : > { %s5668_s0 = scalar_lea.hbm %s7136_s24, 16 }
  0xa0   : > { %p5669_p3 = scmp.ne.s32.totalorder %s7136_s24, %s5668_s0  ;;  %p5675_p13 = scmp.lt.u32.totalorder %s5668_s0, %s7136_s24 }
  0xa2   : > { %p5671_p9 = pnand %p5669_p3, %p6151_p2 }
  0xa4   : > { %p5672_p10 = pneg %p5671_p9 }
  0xa6   : > { %p5677_p1 = pnand %p5675_p13, %p5672_p10 }
  0xa8   : > { %5680 = shalt.err (!%p5677_p1)
}
  0xa9   : > { %s5681_s17 = scalar_lea.vmem %s510_s3, 16  ;;  %s5688_s26 = scalar_lea.vmem %s510_s3, 32 }
  0xaa   : > { %p5682_p4 = scmp.ne.s32.totalorder %s510_s3, %s5681_s17  ;;  %p5689_p7 = scmp.lt.s32.totalorder %s510_s3, %s510_s3 }
  0xab   : > { %p5690_p8 = scmp.lt.s32.totalorder %s5688_s26, %s5681_s17 }
  0xac   : > { %p5684_p5 = pnand %p5682_p4, %p6151_p2 }
  0xad   : > { %p5691_p11 = por %p5690_p8, %p5689_p7 }
  0xae   : > { %p5685_p6 = pneg %p5684_p5 }
  0xb0   : > { %p5692_p12 = pnand %p5691_p11, %p5685_p6 }
  0xb2   : > { %5695 = shalt.err (!%p5692_p12)
}
  0xb3   : > { %5048 = dma.hbm_to_vmem [thread:$0]  (!%p6139_p0), %s7136_s24, 16, %s510_s3, [#allocation5]  }
  0xb4   : > { %s5696_s13 = scalar_lea.hbm %s7069_s5, 8192 }
  0xb5   : > { %p5697_p3 = scmp.ne.s32.totalorder %s7069_s5, %s5696_s13  ;;  %p5703_p13 = scmp.lt.u32.totalorder %s5696_s13, %s7069_s5 }
  0xb7   : > { %p5699_p9 = pnand %p5697_p3, %p6151_p2 }
  0xb9   : > { %p5700_p10 = pneg %p5699_p9 }
  0xbb   : > { %p5705_p1 = pnand %p5703_p13, %p5700_p10 }
  0xbd   : > { %5708 = shalt.err (!%p5705_p1)
}
  0xbe   : > { %s5709_s20 = scalar_lea.vmem %s536_s2, 8192  ;;  %p5717_p7 = scmp.lt.s32.totalorder %s536_s2, %s536_s2 }
  0xbf   : > { %p5710_p4 = scmp.ne.s32.totalorder %s536_s2, %s5709_s20  ;;  %p5718_p8 = scmp.lt.s32.totalorder %s5709_s20, %s5709_s20 }
  0xc1   : > { %p5712_p5 = pnand %p5710_p4, %p6151_p2  ;;  %p5719_p11 = por %p5718_p8, %p5717_p7 }
  0xc3   : > { %p5713_p6 = pneg %p5712_p5 }
  0xc5   : > { %p5720_p12 = pnand %p5719_p11, %p5713_p6 }
  0xc7   : > { %5723 = shalt.err (!%p5720_p12)
}
  0xc8   : > { %s5932_s3 = smov 256   ;;  %s5933_s8 = smov 16  }
  0xc9   : > { %5054 = dma.hbm_to_vmem [thread:$0]  (!%p6139_p0), %s7069_s5, 8192, %s536_s2, [#allocation8], %s5932_s3, %s5932_s3, %s5933_s8  }
  0xca   : > { %s5934_s7 = smov [#allocation12]   ;;  %s5724_s13 = scalar_lea.hbm %s7073_s9, 2048 }
  0xcb   : > { %s567_s14 = sshll.u32 %s5934_s7, 4  ;;  %p5725_p3 = scmp.ne.s32.totalorder %s7073_s9, %s5724_s13  ;;  %s568_s14 = int_to_ptr.vmem [resolvable:$true] %s567_s14 }
  0xcc   : > { %p5731_p13 = scmp.lt.u32.totalorder %s5724_s13, %s7073_s9 }
  0xcd   : > { %p5727_p9 = pnand %p5725_p3, %p6151_p2 }
  0xcf   : > { %p5728_p10 = pneg %p5727_p9 }
  0xd1   : > { %p5733_p1 = pnand %p5731_p13, %p5728_p10 }
  0xd3   : > { %5736 = shalt.err (!%p5733_p1)
}
  0xd4   : > { %s5737_s2 = scalar_lea.vmem %s568_s14, 2048  ;;  %p5745_p7 = scmp.lt.s32.totalorder %s568_s14, %s568_s14 }
  0xd5   : > { %p5738_p4 = scmp.ne.s32.totalorder %s568_s14, %s5737_s2  ;;  %p5746_p8 = scmp.lt.s32.totalorder %s5737_s2, %s5737_s2 }
  0xd7   : > { %p5740_p5 = pnand %p5738_p4, %p6151_p2  ;;  %p5747_p11 = por %p5746_p8, %p5745_p7 }
  0xd9   : > { %p5741_p6 = pneg %p5740_p5 }
  0xdb   : > { %p5748_p12 = pnand %p5747_p11, %p5741_p6 }
  0xdd   : > { %5751 = shalt.err (!%p5748_p12)
}
  0xde   : > { %s5935_s20 = smov 64   ;;  %s5936_s3 = smov 4  }
  0xdf   : > { %5060 = dma.hbm_to_vmem [thread:$0]  (!%p6139_p0), %s7073_s9, 2048, %s568_s14, [#allocation11], %s5935_s20, %s5935_s20, %s5936_s3  }
  0xe0   : > { %s5937_s26 = smov [#allocation15]   ;;  %s5938_s10 = smov [#allocation18]  }
  0xe1   : > { %s595_s7 = sshll.u32 %s5937_s26, 4  ;;  %s625_s11 = sshll.u32 %s5938_s10, 4  ;;  %s596_s7 = int_to_ptr.vmem [resolvable:$true] %s595_s7  ;;  %s6292_s11 = int_to_ptr.vmem [resolvable:$true] %s625_s11 }
  0xe2   : > { %s5752_s18 = scalar_lea.hbm %s7076_s12, 16 }
  0xe3   : > { %p5753_p3 = scmp.ne.s32.totalorder %s7076_s12, %s5752_s18  ;;  %p5759_p13 = scmp.lt.u32.totalorder %s5752_s18, %s7076_s12 }
  0xe5   : > { %p5755_p9 = pnand %p5753_p3, %p6151_p2 }
  0xe7   : > { %p5756_p10 = pneg %p5755_p9 }
  0xe9   : > { %p5761_p1 = pnand %p5759_p13, %p5756_p10 }
  0xeb   : > { %5764 = shalt.err (!%p5761_p1)
}
  0xec   : > { %s5765_s20 = scalar_lea.vmem %s596_s7, 16  ;;  %s5772_s3 = scalar_lea.vmem %s596_s7, 32 }
  0xed   : > { %p5766_p4 = scmp.ne.s32.totalorder %s596_s7, %s5765_s20  ;;  %p5773_p7 = scmp.lt.s32.totalorder %s596_s7, %s596_s7 }
  0xee   : > { %p5774_p8 = scmp.lt.s32.totalorder %s5772_s3, %s5765_s20 }
  0xef   : > { %p5768_p5 = pnand %p5766_p4, %p6151_p2 }
  0xf0   : > { %p5775_p11 = por %p5774_p8, %p5773_p7 }
  0xf1   : > { %p5769_p6 = pneg %p5768_p5 }
  0xf3   : > { %p5776_p12 = pnand %p5775_p11, %p5769_p6 }
  0xf5   : > { %5779 = shalt.err (!%p5776_p12)
}
  0xf6   : > { %5066 = dma.hbm_to_vmem [thread:$0]  (!%p6139_p0), %s7076_s12, 16, %s596_s7, [#allocation14]  }
  0xf7   : > { %s5780_s13 = scalar_lea.hbm %s7080_s16, 32 }
  0xf8   : > { %p5781_p3 = scmp.ne.s32.totalorder %s7080_s16, %s5780_s13  ;;  %p5787_p13 = scmp.lt.u32.totalorder %s5780_s13, %s7080_s16 }
  0xfa   : > { %p5783_p9 = pnand %p5781_p3, %p6151_p2 }
  0xfc   : > { %p5784_p10 = pneg %p5783_p9 }
  0xfe   : > { %p5789_p1 = pnand %p5787_p13, %p5784_p10 }
 0x100   : > { %5792 = shalt.err (!%p5789_p1)
}
 0x101   : > { %s5793_s7 = scalar_lea.vmem %s6292_s11, 32  ;;  %p5801_p7 = scmp.lt.s32.totalorder %s6292_s11, %s6292_s11 }
 0x102   : > { %p5794_p4 = scmp.ne.s32.totalorder %s6292_s11, %s5793_s7  ;;  %p5802_p8 = scmp.lt.s32.totalorder %s5793_s7, %s5793_s7 }
 0x104   : > { %p5796_p5 = pnand %p5794_p4, %p6151_p2  ;;  %p5803_p11 = por %p5802_p8, %p5801_p7 }
 0x106   : > { %p5797_p6 = pneg %p5796_p5 }
 0x108   : > { %p5804_p12 = pnand %p5803_p11, %p5797_p6 }
 0x10a   : > { %5807 = shalt.err (!%p5804_p12)
}
 0x10b   : > { %5072 = dma.hbm_to_vmem [thread:$0]  (!%p6139_p0), %s7080_s16, 32, %s6292_s11, [#allocation17]  }
 0x10c   : > { %p7137_p3 = scmp.ne.s32.totalorder %s7127_s22, 0 }
 0x10d   : > { %p7138_p9 = scmp.ne.s32.totalorder (!%p7137_p3), %s7128_s25, 0 }
 0x10e   : > { %654 = sbr.rel (%p7137_p3) target bundleno = 2988 (0xbac), region = 96 }
 0x115   : > { %5869 = dma.done.wait (%p7138_p9), [#allocation5], 16  }
 0x116   : > { %5871 = vsyncadd (%p7138_p9), [#allocation5], 4294967280 }
 0x117   : > { %5873 = dma.done.wait (%p7138_p9), [#allocation8], 10240  }
 0x118   : > { %5875 = vsyncadd (%p7138_p9), [#allocation8], 4294957056 }
 0x119   : > { %5877 = dma.done.wait (%p7138_p9), [#allocation11], 10240  }
 0x11a   : > { %5879 = vsyncadd (%p7138_p9), [#allocation11], 4294957056 }
 0x11b   : > { %5881 = dma.done.wait (%p7138_p9), [#allocation14], 32  }
 0x11c   : > { %5883 = vsyncadd (%p7138_p9), [#allocation14], 4294967264 }
 0x11d   : > { %5885 = dma.done.wait (%p7138_p9), [#allocation17], 8224  }
 0x11e   : > { %5887 = vsyncadd (%p7138_p9), [#allocation17], 4294959072  ;;  %p743_p0 = scmp.lt.s32.totalorder %s5910_s1, 1  ;;  %s741_s22 = sand.u32 1, %s5898_s30  }
 0x11f   : > { %s7139_s3 = sld [smem:[#allocation36_spill]]  ;;  %s6367_s17 = scalar_lea.vmem [#allocation19], %s741_s22 }
 0x120   : > { %s744_s23 = scalar_select %p743_p0, %s5910_s1, 1 }
 0x121   : > { %p4485_p2 = scmp.ne.s32.totalorder %s5906_s21, 0 }
 0x122   : > { %s4484_s27 = sshll.u32 %s744_s23, 2  ;;  %s7140_s10 = sld [smem:[#allocation37_spill]] (!%p4485_p2)  ;;  %vm806_vm0 = vcmask (!%p4485_p2), 1040384   ;;  %vm807_vm1 = vcmask (!%p4485_p2), 1041408   ;;  %v5939_v3 = vmov (!%p4485_p2), 65535   ;;  %vm781_vm2 = vcmask (!%p4485_p2), 23552  }
 0x123   : > { %755 = sbr.rel (%p4485_p2) target bundleno = 1879 (0x757), region = 136  ;;  %v808_v4 = vsel (!%p4485_p2), %vm806_vm0, 4294967295, %v5939_v3  ;;  %v5193_v7 = vld [vmem:[#allocation7 + $0x4] ss:$8 sps:$4 sm:$0xff] (!%p4485_p2)   ;;  %v5195_v8 = vld [vmem:[#allocation7] ss:$8 sps:$4 sm:$0xff] (!%p4485_p2)  }
 0x124   : > { %v809_v5 = vsel (!%p4485_p2), %vm807_vm1, %v808_v4, 0  ;;  %v5196_v9 = vld [vmem:[#allocation7 + $0x14] ss:$8 sps:$4 sm:$0xff] (!%p4485_p2)   ;;  %1042 = vmatprep.subr.bf16.mxu1 (!%p4485_p2), %v5193_v7  ;;  %v5198_v10 = vld [vmem:[#allocation7 + $0x10] ss:$8 sps:$4 sm:$0xff] (!%p4485_p2)   ;;  %v5940_v31 = vmov (!%p4485_p2), 0  }
 0x125   : > { %s749_s8 = scalar_lea.vmem %s7139_s3, %s4484_s27  ;;  %1043 = vmatpush1.bf16.msra.mxu1 (!%p4485_p2), %v5195_v8  ;;  %v5199_v11 = vld [vmem:[#allocation7 + $0x24] ss:$8 sps:$4 sm:$0xff] (!%p4485_p2)   ;;  %v5201_v12 = vld [vmem:[#allocation7 + $0x20] ss:$8 sps:$4 sm:$0xff] (!%p4485_p2)   ;;  %v5202_v13 = vld [vmem:[#allocation7 + $0x34] ss:$8 sps:$4 sm:$0xff] (!%p4485_p2)   ;;  %1074 = vmatprep.mubr.bf16.mxu1 (!%p4485_p2), %v5940_v31 }
 0x126   : > { %v6363_v0 = vld [vmem:[%s749_s8] sm:$0x7]  ;;  %1044 = vmatprep.subr.bf16.mxu1 (!%p4485_p2), %v5196_v9  ;;  %v5205_v15 = vld [vmem:[#allocation7 + $0x44] ss:$8 sps:$4 sm:$0xff] (!%p4485_p2)   ;;  %v5207_v16 = vld [vmem:[#allocation7 + $0x40] ss:$8 sps:$4 sm:$0xff] (!%p4485_p2)  }
 0x127   : > { %v758_v1 = vpack.c.bf16 (!%p4485_p2), %v6363_v0, %v6363_v0  ;;  %v5204_v14 = vld [vmem:[#allocation7 + $0x30] ss:$8 sps:$4 sm:$0xff] (!%p4485_p2)   ;;  %v5208_v17 = vld [vmem:[#allocation7 + $0x54] ss:$8 sps:$4 sm:$0xff] (!%p4485_p2)   ;;  %v5211_v27 = vld [vmem:[#allocation7 + $0x64] ss:$8 sps:$4 sm:$0xff] (!%p4485_p2)  }
 0x128   : > { %v756_v2 = vld [vmem:[%s7140_s10] sm:$0x3] (!%p4485_p2)  ;;  %v5213_v28 = vld [vmem:[#allocation7 + $0x60] ss:$8 sps:$4 sm:$0xff] (!%p4485_p2)   ;;  %v5214_v29 = vld [vmem:[#allocation7 + $0x74] ss:$8 sps:$4 sm:$0xff] (!%p4485_p2)  }
 0x129   : > { %765 = vxpose.xlu0.c.b16.start.end [1/1] (short) (!%p4485_p2), %v758_v1, 128  ;;  %v811_v6 = vand.u32 (!%p4485_p2), %v809_v5, %v756_v2  ;;  %1045 = vmatpush1.bf16.msra.mxu1 (!%p4485_p2), %v5198_v10  ;;  %v5210_v18 = vld [vmem:[#allocation7 + $0x50] ss:$8 sps:$4 sm:$0xff] (!%p4485_p2)   ;;  %v5219_v32 = vld [vmem:[#allocation9 + $0xc] ss:$16 sps:$4 sm:$0xff] (!%p4485_p2)   ;;  %v5222_v34 = vld [vmem:[#allocation9 + $0x4] ss:$16 sps:$4 sm:$0xff] (!%p4485_p2)  }
 0x12a   : > { %1046 = vmatprep.subr.bf16.mxu1 %v5199_v11  ;;  %v5216_v30 = vld [vmem:[#allocation7 + $0x70] ss:$8 sps:$4 sm:$0xff]   ;;  %v5228_v35 = vld [vmem:[#allocation9 + $0x24] ss:$16 sps:$4 sm:$0xff]   ;;  %v6384_v61 = vld [vmem:[#allocation4] ss:$0 sm:$0xff] }
 0x12b   : > { %4867 = vmatprep.subr.bf16.mxu0 %v811_v6  ;;  %v5220_v33 = vld [vmem:[#allocation9] ss:$16 sps:$4 sm:$0xff]   ;;  %v5234_v37 = vld [vmem:[#allocation9 + $0x44] ss:$16 sps:$4 sm:$0xff]   ;;  %s7143_s2 = sld [smem:[#allocation41_spill]]  ;;  %s7144_s27 = sld [smem:[#allocation43_spill]] }
 0x12c   : > { %4868 = vmatpush3.bf16.msra.mxu0 %v811_v6  ;;  %v5226_v36 = vld [vmem:[#allocation9 + $0x20] ss:$16 sps:$4 sm:$0xff]   ;;  %v5240_v39 = vld [vmem:[#allocation9 + $0x64] ss:$16 sps:$4 sm:$0xff]   ;;  %vm5944_vm4 = vmmov 0   ;;  %vm2815_vm5 = vcmask 65536  }
 0x12d   : > { %1047 = vmatpush1.bf16.msra.mxu1 %v5201_v12  ;;  %1609 = vmatprep.subr.bf16.mxu0 %v5222_v34  ;;  %v5232_v38 = vld [vmem:[#allocation9 + $0x40] ss:$16 sps:$4 sm:$0xff]   ;;  %v5246_v41 = vld [vmem:[#allocation9 + $0x84] ss:$16 sps:$4 sm:$0xff]   ;;  %v5217_v12 = vld [vmem:[#allocation9 + $0x8] ss:$16 sps:$4 sm:$0xff]  }
 0x12e   : > { %1048 = vmatprep.subr.bf16.mxu1 %v5202_v13  ;;  %v5238_v40 = vld [vmem:[#allocation9 + $0x60] ss:$16 sps:$4 sm:$0xff]   ;;  %v5252_v43 = vld [vmem:[#allocation9 + $0xa4] ss:$16 sps:$4 sm:$0xff]   ;;  %v5237_v34 = vld [vmem:[#allocation9 + $0x6c] ss:$16 sps:$4 sm:$0xff]  }
 0x12f   : > { %v5244_v42 = vld [vmem:[#allocation9 + $0x80] ss:$16 sps:$4 sm:$0xff]   ;;  %v5258_v45 = vld [vmem:[#allocation9 + $0xc4] ss:$16 sps:$4 sm:$0xff]  }
 0x130   : > { %v5250_v44 = vld [vmem:[#allocation9 + $0xa0] ss:$16 sps:$4 sm:$0xff]   ;;  %v5264_v47 = vld [vmem:[#allocation9 + $0xe4] ss:$16 sps:$4 sm:$0xff]  }
 0x131   : > { %1049 = vmatpush1.bf16.msra.mxu1 %v5204_v14  ;;  %v5256_v46 = vld [vmem:[#allocation9 + $0xc0] ss:$16 sps:$4 sm:$0xff]   ;;  %v5270_v49 = vld [vmem:[#allocation9 + $0x104] ss:$16 sps:$4 sm:$0xff]  }
 0x132   : > { %1050 = vmatprep.subr.bf16.mxu1 %v5205_v15  ;;  %v5262_v48 = vld [vmem:[#allocation9 + $0xe0] ss:$16 sps:$4 sm:$0xff]   ;;  %v5276_v51 = vld [vmem:[#allocation9 + $0x124] ss:$16 sps:$4 sm:$0xff]   ;;  %v5225_v15 = vld [vmem:[#allocation9 + $0x2c] ss:$16 sps:$4 sm:$0xff]  }
 0x133   : > { %v5268_v50 = vld [vmem:[#allocation9 + $0x100] ss:$16 sps:$4 sm:$0xff]   ;;  %v5282_v53 = vld [vmem:[#allocation9 + $0x144] ss:$16 sps:$4 sm:$0xff]  }
 0x134   : > { %v5274_v52 = vld [vmem:[#allocation9 + $0x120] ss:$16 sps:$4 sm:$0xff]   ;;  %v5288_v55 = vld [vmem:[#allocation9 + $0x164] ss:$16 sps:$4 sm:$0xff]  }
 0x135   : > { %1051 = vmatpush1.bf16.msra.mxu1 %v5207_v16  ;;  %v5280_v54 = vld [vmem:[#allocation9 + $0x140] ss:$16 sps:$4 sm:$0xff]   ;;  %v5294_v57 = vld [vmem:[#allocation9 + $0x184] ss:$16 sps:$4 sm:$0xff]  }
 0x136   : > { %1052 = vmatprep.subr.bf16.mxu1 %v5208_v17  ;;  %v5286_v56 = vld [vmem:[#allocation9 + $0x160] ss:$16 sps:$4 sm:$0xff]   ;;  %v5300_v59 = vld [vmem:[#allocation9 + $0x1a4] ss:$16 sps:$4 sm:$0xff]  }
 0x137   : > { %v5292_v58 = vld [vmem:[#allocation9 + $0x180] ss:$16 sps:$4 sm:$0xff]  }
 0x138   : > { %v5298_v60 = vld [vmem:[#allocation9 + $0x1a0] ss:$16 sps:$4 sm:$0xff]  }
 0x139   : > { %1053 = vmatpush1.bf16.msra.mxu1 %v5210_v18 }
 0x13a   : > { %1054 = vmatprep.subr.bf16.mxu1 %v5211_v27 }
 0x13d   : > { %1055 = vmatpush1.bf16.msra.mxu1 %v5213_v28 }
 0x13e   : > { %1056 = vmatprep.subr.bf16.mxu1 %v5214_v29 }
 0x141   : > { %1057 = vmatpush1.bf16.msra.mxu1 %v5216_v30  ;;  %v5229_v30 = vld [vmem:[#allocation9 + $0x48] ss:$16 sps:$4 sm:$0xff]  }
 0x142   : > { %1722 = vmatprep.subr.bf16.mxu1 %v5219_v32 }
 0x18f   : > { %v773_v19 = vpop.trf.xlu0 }
 0x190   : > { %4869 = vmatprep.mubr.msk.bf16.mxu0 %vm781_vm2, %v773_v19 }
 0x193   : > { %v774_v20 = vpop.trf.xlu0 }
 0x194   : > { %4870 = vmatmul.mubr.msk.bf16.vlgmr.msra.gmra.mrb[0].mxu0 %vm781_vm2, %v774_v20 }
 0x195   : > { %1610 = vmatpush1.bf16.msra.mxu0 %v5220_v33 }
 0x196   : > { %1611 = vmatprep.subr.bf16.mxu0 %v5228_v35 }
 0x197   : > { %v775_v21 = vpop.trf.xlu0 }
 0x198   : > { %4873 = vmatprep.mubr.msk.bf16.mxu0 %vm781_vm2, %v775_v21 }
 0x199   : > { %1612 = vmatpush1.bf16.msra.mxu0 %v5226_v36 }
 0x19a   : > { %1613 = vmatprep.subr.bf16.mxu0 %v5234_v37 }
 0x19b   : > { %v776_v22 = vpop.trf.xlu0 }
 0x19c   : > { %4874 = vmatmul.mubr.msk.bf16.gmra.mrb[4].mxu0 %vm781_vm2, %v776_v22 }
 0x19d   : > { %1614 = vmatpush1.bf16.msra.mxu0 %v5232_v38 }
 0x19e   : > { %1615 = vmatprep.subr.bf16.mxu0 %v5240_v39 }
 0x19f   : > { %v777_v23 = vpop.trf.xlu0 }
 0x1a0   : > { %4877 = vmatprep.mubr.msk.bf16.mxu0 %vm781_vm2, %v777_v23  ;;  %v5223_v23 = vld [vmem:[#allocation9 + $0x28] ss:$16 sps:$4 sm:$0xff]  }
 0x1a1   : > { %1616 = vmatpush1.bf16.msra.mxu0 %v5238_v40 }
 0x1a2   : > { %1617 = vmatprep.subr.bf16.mxu0 %v5246_v41 }
 0x1a3   : > { %v778_v24 = vpop.trf.xlu0 }
 0x1a4   : > { %4878 = vmatmul.mubr.msk.bf16.gmra.mrb[8].mxu0 %vm781_vm2, %v778_v24 }
 0x1a5   : > { %1618 = vmatpush1.bf16.msra.mxu0 %v5244_v42  ;;  %v5235_v42 = vld [vmem:[#allocation9 + $0x68] ss:$16 sps:$4 sm:$0xff]  }
 0x1a6   : > { %1619 = vmatprep.subr.bf16.mxu0 %v5252_v43 }
 0x1a7   : > { %v779_v25 = vpop.trf.xlu0 }
 0x1a8   : > { %4881 = vmatprep.mubr.msk.bf16.mxu0 %vm781_vm2, %v779_v25 }
 0x1a9   : > { %1620 = vmatpush1.bf16.msra.mxu0 %v5250_v44 }
 0x1aa   : > { %1621 = vmatprep.subr.bf16.mxu0 %v5258_v45  ;;  %v5243_v45 = vld [vmem:[#allocation9 + $0x8c] ss:$16 sps:$4 sm:$0xff]  }
 0x1ab   : > { %v780_v26 = vpop.trf.xlu0 }
 0x1ac   : > { %4882 = vmatmul.mubr.msk.bf16.gmra.mrb[12].mxu0 %vm781_vm2, %v780_v26  ;;  %v5231_v26 = vld [vmem:[#allocation9 + $0x4c] ss:$16 sps:$4 sm:$0xff]  }
 0x1ad   : > { %1622 = vmatpush1.bf16.msra.mxu0 %v5256_v46 }
 0x1ae   : > { %1623 = vmatprep.subr.bf16.mxu0 %v5264_v47 }
 0x1b1   : > { %1624 = vmatpush1.bf16.msra.mxu0 %v5262_v48 }
 0x1b2   : > { %1625 = vmatprep.subr.bf16.mxu0 %v5270_v49  ;;  %v5241_v49 = vld [vmem:[#allocation9 + $0x88] ss:$16 sps:$4 sm:$0xff]  }
 0x1b5   : > { %1626 = vmatpush1.bf16.msra.mxu0 %v5268_v50 }
 0x1b6   : > { %1627 = vmatprep.subr.bf16.mxu0 %v5276_v51 }
 0x1b9   : > { %1628 = vmatpush1.bf16.msra.mxu0 %v5274_v52  ;;  %v5249_v52 = vld [vmem:[#allocation9 + $0xac] ss:$16 sps:$4 sm:$0xff]  }
 0x1ba   : > { %1629 = vmatprep.subr.bf16.mxu0 %v5282_v53 }
 0x1bd   : > { %1630 = vmatpush1.bf16.msra.mxu0 %v5280_v54 }
 0x1be   : > { %1631 = vmatprep.subr.bf16.mxu0 %v5288_v55 }
 0x1c1   : > { %1632 = vmatpush1.bf16.msra.mxu0 %v5286_v56 }
 0x1c2   : > { %1633 = vmatprep.subr.bf16.mxu0 %v5294_v57 }
 0x1c5   : > { %1634 = vmatpush1.bf16.msra.mxu0 %v5292_v58 }
 0x1c6   : > { %1635 = vmatprep.subr.bf16.mxu0 %v5300_v59 }
 0x1c9   : > { %1636 = vmatpush1.bf16.msra.mxu0 %v5298_v60  ;;  %v5247_v60 = vld [vmem:[#allocation9 + $0xa8] ss:$16 sps:$4 sm:$0xff]  }
 0x267   : > { %v4871_v62 = vpop.f32.mrb[0].mxu0 }
 0x268   : > { %v856_v63 = vadd.f32 %v4871_v62, %v6384_v61  ;;  %v847_v1 = vpop.f32.mrb[1].mxu0 }
 0x269   : > { %v848_v2 = vadd.f32 %v6384_v61, %v847_v1  ;;  %v4872_v3 = vpop.f32.mrb[2].mxu0  ;;  %v5255_v1 = vld [vmem:[#allocation9 + $0xcc] ss:$16 sps:$4 sm:$0xff]  }
 0x26a   : > { %v859_v4 = vadd.f32 %v4872_v3, %v6384_v61  ;;  %v850_v5 = vpop.f32.mrb[3].mxu0  ;;  %v912_v7 = vmax.f32 %v856_v63, 0.0 }
 0x26b   : > { %v851_v6 = vadd.f32 %v6384_v61, %v850_v5  ;;  %v910_v9 = vmax.f32 %v848_v2, 0.0  ;;  %v5253_v5 = vld [vmem:[#allocation9 + $0xc8] ss:$16 sps:$4 sm:$0xff]  }
 0x26c   : > { %v913_v8 = vmax.f32 %v859_v4, 0.0 }
 0x26d   : > { %v911_v10 = vmax.f32 %v851_v6, 0.0 }
 0x26e   : > { %v944_v11 = vpack.c.bf16 %v913_v8, %v912_v7  ;;  %v5261_v7 = vld [vmem:[#allocation9 + $0xec] ss:$16 sps:$4 sm:$0xff]   ;;  %v5259_v8 = vld [vmem:[#allocation9 + $0xe8] ss:$16 sps:$4 sm:$0xff]  }
 0x26f   : > { %v943_v13 = vpack.c.bf16 %v911_v10, %v910_v9  ;;  %v4875_v14 = vpop.f32.mrb[4].mxu0  ;;  %v5267_v9 = vld [vmem:[#allocation9 + $0x10c] ss:$16 sps:$4 sm:$0xff]   ;;  %v5265_v10 = vld [vmem:[#allocation9 + $0x108] ss:$16 sps:$4 sm:$0xff]  }
 0x270   : > { %v872_v16 = vadd.f32 %v4875_v14, %v6384_v61  ;;  %v863_v17 = vpop.f32.mrb[5].mxu0  ;;  %v5285_v14 = vld [vmem:[#allocation9 + $0x16c] ss:$16 sps:$4 sm:$0xff]  }
 0x271   : > { %1075 = vmatmul.mubr.bf16.vlgmr.msra.gmra.mrb[0].mxu1 %v943_v13  ;;  %v864_v18 = vadd.f32 %v6384_v61, %v863_v17  ;;  %v4876_v19 = vpop.f32.mrb[6].mxu0  ;;  %v5277_v13 = vld [vmem:[#allocation9 + $0x148] ss:$16 sps:$4 sm:$0xff]  }
 0x272   : > { %v916_v20 = vmax.f32 %v872_v16, 0.0  ;;  %v875_v21 = vadd.f32 %v4876_v19, %v6384_v61  ;;  %v866_v22 = vpop.f32.mrb[7].mxu0  ;;  %1084 = vmatprep.mubr.bf16.mxu1 %v5940_v31  ;;  %1723 = vmatpush1.bf16.msra.mxu1 %v5217_v12  ;;  %v5279_v12 = vld [vmem:[#allocation9 + $0x14c] ss:$16 sps:$4 sm:$0xff]   ;;  %v5289_v17 = vld [vmem:[#allocation9 + $0x188] ss:$16 sps:$4 sm:$0xff]  }
 0x273   : > { %v914_v24 = vmax.f32 %v864_v18, 0.0  ;;  %v867_v25 = vadd.f32 %v6384_v61, %v866_v22  ;;  %1724 = vmatprep.subr.bf16.mxu1 %v5225_v15  ;;  %v5283_v15 = vld [vmem:[#allocation9 + $0x168] ss:$16 sps:$4 sm:$0xff]   ;;  %v5291_v16 = vld [vmem:[#allocation9 + $0x18c] ss:$16 sps:$4 sm:$0xff]  }
 0x274   : > { %v917_v27 = vmax.f32 %v875_v21, 0.0  ;;  %v5297_v18 = vld [vmem:[#allocation9 + $0x1ac] ss:$16 sps:$4 sm:$0xff]   ;;  %v5295_v19 = vld [vmem:[#allocation9 + $0x1a8] ss:$16 sps:$4 sm:$0xff]  }
 0x275   : > { %v915_v28 = vmax.f32 %v867_v25, 0.0  ;;  %v5306_v21 = vld [vmem:[#allocation9 + $0x1c4] ss:$16 sps:$4 sm:$0xff]   ;;  %v5301_v22 = vld [vmem:[#allocation9 + $0x1c8] ss:$16 sps:$4 sm:$0xff]  }
 0x276   : > { %v946_v29 = vpack.c.bf16 %v917_v27, %v916_v20  ;;  %1725 = vmatpush1.bf16.msra.mxu1 %v5223_v23  ;;  %v5303_v20 = vld [vmem:[#allocation9 + $0x1cc] ss:$16 sps:$4 sm:$0xff]   ;;  %v5304_v23 = vld [vmem:[#allocation9 + $0x1c0] ss:$16 sps:$4 sm:$0xff]   ;;  %1637 = vmatprep.subr.bf16.mxu0 %v5306_v21  ;;  %v5312_v25 = vld [vmem:[#allocation9 + $0x1e4] ss:$16 sps:$4 sm:$0xff]  }
 0x277   : > { %v945_v32 = vpack.c.bf16 %v915_v28, %v914_v24  ;;  %v4879_v33 = vpop.f32.mrb[8].mxu0  ;;  %1726 = vmatprep.subr.bf16.mxu1 %v5231_v26  ;;  %1638 = vmatpush1.bf16.msra.mxu0 %v5304_v23  ;;  %v5309_v24 = vld [vmem:[#allocation9 + $0x1ec] ss:$16 sps:$4 sm:$0xff]   ;;  %v5307_v26 = vld [vmem:[#allocation9 + $0x1e8] ss:$16 sps:$4 sm:$0xff]  }
 0x278   : > { %v888_v35 = vadd.f32 %v4879_v33, %v6384_v61  ;;  %v879_v36 = vpop.f32.mrb[9].mxu0  ;;  %v5310_v27 = vld [vmem:[#allocation9 + $0x1e0] ss:$16 sps:$4 sm:$0xff]   ;;  %1639 = vmatprep.subr.bf16.mxu0 %v5312_v25 }
 0x279   : > { %1085 = vmatmul.mubr.bf16.gmra.mrb[4].mxu1 %v944_v11  ;;  %v880_v37 = vadd.f32 %v6384_v61, %v879_v36  ;;  %v4880_v38 = vpop.f32.mrb[10].mxu0  ;;  %v5271_v11 = vld [vmem:[#allocation9 + $0x128] ss:$16 sps:$4 sm:$0xff]  }
 0x27a   : > { %1094 = vmatprep.mubr.bf16.mxu1 %v5940_v31  ;;  %v920_v39 = vmax.f32 %v888_v35, 0.0  ;;  %v891_v40 = vadd.f32 %v4880_v38, %v6384_v61  ;;  %v882_v41 = vpop.f32.mrb[11].mxu0  ;;  %1727 = vmatpush1.bf16.msra.mxu1 %v5229_v30  ;;  %v942_v30 = vld [vmem:[%s7068_s4] sm:$0x3] }
 0x27b   : > { %v918_v43 = vmax.f32 %v880_v37, 0.0  ;;  %v883_v44 = vadd.f32 %v6384_v61, %v882_v41  ;;  %1728 = vmatprep.subr.bf16.mxu1 %v5237_v34  ;;  %1640 = vmatpush1.bf16.msra.mxu0 %v5310_v27 }
 0x27c   : > { %v921_v46 = vmax.f32 %v891_v40, 0.0 }
 0x27d   : > { %v919_v47 = vmax.f32 %v883_v44, 0.0 }
 0x27e   : > { %v948_v48 = vpack.c.bf16 %v921_v46, %v920_v39  ;;  %1729 = vmatpush1.bf16.msra.mxu1 %v5235_v42 }
 0x27f   : > { %v947_v50 = vpack.c.bf16 %v919_v47, %v918_v43  ;;  %v4883_v51 = vpop.f32.mrb[12].mxu0  ;;  %1730 = vmatprep.subr.bf16.mxu1 %v5243_v45 }
 0x280   : > { %v904_v53 = vadd.f32 %v4883_v51, %v6384_v61  ;;  %v895_v54 = vpop.f32.mrb[13].mxu0 }
 0x281   : > { %1095 = vmatmul.mubr.bf16.gmra.mrb[8].mxu1 %v945_v32  ;;  %v896_v55 = vadd.f32 %v6384_v61, %v895_v54  ;;  %v4884_v56 = vpop.f32.mrb[14].mxu0 }
 0x282   : > { %1104 = vmatprep.mubr.bf16.mxu1 %v5940_v31  ;;  %v924_v57 = vmax.f32 %v904_v53, 0.0  ;;  %v907_v58 = vadd.f32 %v4884_v56, %v6384_v61  ;;  %v898_v59 = vpop.f32.mrb[15].mxu0  ;;  %1731 = vmatpush1.bf16.msra.mxu1 %v5241_v49 }
 0x283   : > { %v922_v62 = vmax.f32 %v896_v55, 0.0  ;;  %v899_v63 = vadd.f32 %v6384_v61, %v898_v59  ;;  %1732 = vmatprep.subr.bf16.mxu1 %v5249_v52  ;;  %v5273_v61 = vld [vmem:[#allocation9 + $0x12c] ss:$16 sps:$4 sm:$0xff]  }
 0x284   : > { %v925_v2 = vmax.f32 %v907_v58, 0.0 }
 0x285   : > { %v923_v3 = vmax.f32 %v899_v63, 0.0 }
 0x286   : > { %v950_v4 = vpack.c.bf16 %v925_v2, %v924_v57  ;;  %1733 = vmatpush1.bf16.msra.mxu1 %v5247_v60 }
 0x287   : > { %v949_v6 = vpack.c.bf16 %v923_v3, %v922_v62  ;;  %1734 = vmatprep.subr.bf16.mxu1 %v5255_v1 }
 0x289   : > { %1105 = vmatmul.mubr.bf16.gmra.mrb[12].mxu1 %v946_v29 }
 0x28a   : > { %1114 = vmatprep.mubr.bf16.mxu1 %v5940_v31  ;;  %1735 = vmatpush1.bf16.msra.mxu1 %v5253_v5 }
 0x28b   : > { %1736 = vmatprep.subr.bf16.mxu1 %v5261_v7 }
 0x28e   : > { %1737 = vmatpush1.bf16.msra.mxu1 %v5259_v8 }
 0x28f   : > { %1738 = vmatprep.subr.bf16.mxu1 %v5267_v9 }
 0x291   : > { %1115 = vmatmul.mubr.bf16.gmra.mrb[16].mxu1 %v947_v50 }
 0x292   : > { %1124 = vmatprep.mubr.bf16.mxu1 %v5940_v31  ;;  %1739 = vmatpush1.bf16.msra.mxu1 %v5265_v10 }
 0x293   : > { %1740 = vmatprep.subr.bf16.mxu1 %v5273_v61 }
 0x296   : > { %1741 = vmatpush1.bf16.msra.mxu1 %v5271_v11 }
 0x297   : > { %1742 = vmatprep.subr.bf16.mxu1 %v5279_v12 }
 0x299   : > { %1125 = vmatmul.mubr.bf16.gmra.mrb[20].mxu1 %v948_v48 }
 0x29a   : > { %1134 = vmatprep.mubr.bf16.mxu1 %v5940_v31  ;;  %1743 = vmatpush1.bf16.msra.mxu1 %v5277_v13 }
 0x29b   : > { %1744 = vmatprep.subr.bf16.mxu1 %v5285_v14 }
 0x29e   : > { %1745 = vmatpush1.bf16.msra.mxu1 %v5283_v15 }
 0x29f   : > { %1746 = vmatprep.subr.bf16.mxu1 %v5291_v16 }
 0x2a1   : > { %1135 = vmatmul.mubr.bf16.gmra.mrb[24].mxu1 %v949_v6 }
 0x2a2   : > { %1144 = vmatprep.mubr.bf16.mxu1 %v5940_v31  ;;  %1747 = vmatpush1.bf16.msra.mxu1 %v5289_v17  ;;  %v952_v31 = vlaneseq }
 0x2a3   : > { %1748 = vmatprep.subr.bf16.mxu1 %v5297_v18 }
 0x2a4   : > { %v6410_v28 = vshrl.u32 %v952_v31, 7  ;;  %vm6460_vm3 = vcmp.lt.s32.totalorder %v952_v31, 512  ;;  %v5357_v31 = vld [vmem:[#allocation10 + $0xe4] ss:$8 sps:$4 sm:$0xff]  }
 0x2a6   : > { %1749 = vmatpush1.bf16.msra.mxu1 %v5295_v19  ;;  %v6413_v29 = vsub.s32 0, %v6410_v28  ;;  %v6419_v32 = vsub.s32 1, %v6410_v28 }
 0x2a7   : > { %1750 = vmatprep.subr.bf16.mxu1 %v5303_v20 }
 0x2a8   : > { %v6422_v33 = vrot.slane %v942_v30, %v6413_v29  ;;  %v6425_v34 = vrot.slane %v942_v30, %v6419_v32 }
 0x2a9   : > { %1145 = vmatmul.mubr.bf16.gmra.mrb[28].mxu1 %v950_v4 }
 0x2aa   : > { %1751 = vmatpush1.bf16.msra.mxu1 %v5301_v22 }
 0x2ab   : > { %1752 = vmatprep.subr.bf16.mxu1 %v5309_v24 }
 0x2ae   : > { %1753 = vmatpush1.bf16.msra.mxu1 %v5307_v26 }
 0x344   : > { %v1076_v35 = vpop.f32.mrb[0].mxu1 }
 0x345   : > { %v1077_v36 = vadd.f32 %v1076_v35, %v6422_v33  ;;  %v1078_v37 = vpop.f32.mrb[1].mxu1 }
 0x346   : > { %v1079_v38 = vadd.f32 %v1078_v37, %v6425_v34  ;;  %v1080_v39 = vpop.f32.mrb[2].mxu1 }
 0x347   : > { %v1081_v40 = vadd.f32 %v1080_v39, %v6422_v33  ;;  %v1082_v41 = vpop.f32.mrb[3].mxu1  ;;  %v1155_v43 = vmax.f32 %v1077_v36, 0.0 }
 0x348   : > { %v1083_v42 = vadd.f32 %v1082_v41, %v6425_v34  ;;  %v1156_v45 = vmax.f32 %v1079_v38, 0.0 }
 0x349   : > { %v1157_v44 = vmax.f32 %v1081_v40, 0.0 }
 0x34a   : > { %v1158_v46 = vmax.f32 %v1083_v42, 0.0 }
 0x34b   : > { %v1252_v47 = vpack.c.bf16 %v1157_v44, %v1155_v43 }
 0x34c   : > { %v1253_v48 = vpack.c.bf16 %v1158_v46, %v1156_v45  ;;  %v1086_v49 = vpop.f32.mrb[4].mxu1 }
 0x34d   : > { %v1087_v50 = vadd.f32 %v1086_v49, %v6422_v33  ;;  %v1088_v51 = vpop.f32.mrb[5].mxu1 }
 0x34e   : > { %v1089_v52 = vadd.f32 %v1088_v51, %v6425_v34  ;;  %v1090_v53 = vpop.f32.mrb[6].mxu1  ;;  %1641 = vmatprep.mubr.bf16.mxu0 %v1253_v48  ;;  %1754 = vmatprep.mubr.bf16.mxu1 %v1253_v48 }
 0x34f   : > { %v1091_v54 = vadd.f32 %v1090_v53, %v6422_v33  ;;  %v1092_v55 = vpop.f32.mrb[7].mxu1  ;;  %1642 = vmatmul.mubr.bf16.vlgmr.msra.gmra.mrb[16].mxu0 %v1252_v47  ;;  %1755 = vmatmul.mubr.bf16.vlgmr.msra.gmra.mrb[32].mxu1 %v1252_v47  ;;  %v1159_v57 = vmax.f32 %v1087_v50, 0.0 }
 0x350   : > { %v1093_v56 = vadd.f32 %v1092_v55, %v6425_v34  ;;  %v1160_v59 = vmax.f32 %v1089_v52, 0.0 }
 0x351   : > { %v1161_v58 = vmax.f32 %v1091_v54, 0.0 }
 0x352   : > { %v1162_v60 = vmax.f32 %v1093_v56, 0.0 }
 0x353   : > { %v1254_v62 = vpack.c.bf16 %v1161_v58, %v1159_v57 }
 0x354   : > { %v1255_v63 = vpack.c.bf16 %v1162_v60, %v1160_v59  ;;  %v1096_v1 = vpop.f32.mrb[8].mxu1 }
 0x355   : > { %v1097_v2 = vadd.f32 %v1096_v1, %v6422_v33  ;;  %v1098_v3 = vpop.f32.mrb[9].mxu1 }
 0x356   : > { %v1099_v4 = vadd.f32 %v1098_v3, %v6425_v34  ;;  %v1100_v5 = vpop.f32.mrb[10].mxu1  ;;  %1651 = vmatprep.mubr.bf16.mxu0 %v1255_v63  ;;  %1764 = vmatprep.mubr.bf16.mxu1 %v1255_v63 }
 0x357   : > { %v1101_v6 = vadd.f32 %v1100_v5, %v6422_v33  ;;  %v1102_v7 = vpop.f32.mrb[11].mxu1  ;;  %1652 = vmatmul.mubr.bf16.gmra.mrb[20].mxu0 %v1254_v62  ;;  %1765 = vmatmul.mubr.bf16.gmra.mrb[36].mxu1 %v1254_v62  ;;  %v1163_v9 = vmax.f32 %v1097_v2, 0.0 }
 0x358   : > { %v1103_v8 = vadd.f32 %v1102_v7, %v6425_v34  ;;  %v1164_v61 = vmax.f32 %v1099_v4, 0.0 }
 0x359   : > { %v1165_v10 = vmax.f32 %v1101_v6, 0.0 }
 0x35a   : > { %v1166_v11 = vmax.f32 %v1103_v8, 0.0 }
 0x35b   : > { %v1256_v12 = vpack.c.bf16 %v1165_v10, %v1163_v9 }
 0x35c   : > { %v1257_v13 = vpack.c.bf16 %v1166_v11, %v1164_v61  ;;  %v1106_v14 = vpop.f32.mrb[12].mxu1 }
 0x35d   : > { %v1107_v15 = vadd.f32 %v1106_v14, %v6422_v33  ;;  %v1108_v16 = vpop.f32.mrb[13].mxu1 }
 0x35e   : > { %v1109_v17 = vadd.f32 %v1108_v16, %v6425_v34  ;;  %v1110_v18 = vpop.f32.mrb[14].mxu1  ;;  %1661 = vmatprep.mubr.bf16.mxu0 %v1257_v13  ;;  %1774 = vmatprep.mubr.bf16.mxu1 %v1257_v13 }
 0x35f   : > { %v1111_v19 = vadd.f32 %v1110_v18, %v6422_v33  ;;  %v1112_v20 = vpop.f32.mrb[15].mxu1  ;;  %1662 = vmatmul.mubr.bf16.gmra.mrb[24].mxu0 %v1256_v12  ;;  %1775 = vmatmul.mubr.bf16.gmra.mrb[40].mxu1 %v1256_v12  ;;  %v1167_v22 = vmax.f32 %v1107_v15, 0.0 }
 0x360   : > { %v1113_v21 = vadd.f32 %v1112_v20, %v6425_v34  ;;  %v1168_v24 = vmax.f32 %v1109_v17, 0.0 }
 0x361   : > { %v1169_v23 = vmax.f32 %v1111_v19, 0.0 }
 0x362   : > { %v1170_v25 = vmax.f32 %v1113_v21, 0.0 }
 0x363   : > { %v1258_v26 = vpack.c.bf16 %v1169_v23, %v1167_v22 }
 0x364   : > { %v1259_v27 = vpack.c.bf16 %v1170_v25, %v1168_v24  ;;  %v1116_v30 = vpop.f32.mrb[16].mxu1 }
 0x365   : > { %v1117_v35 = vadd.f32 %v1116_v30, %v6422_v33  ;;  %v1118_v36 = vpop.f32.mrb[17].mxu1  ;;  %v5313_v30 = vld [vmem:[#allocation10] ss:$8 sps:$4 sm:$0xff]  }
 0x366   : > { %v1119_v37 = vadd.f32 %v1118_v36, %v6425_v34  ;;  %v1120_v38 = vpop.f32.mrb[18].mxu1  ;;  %1671 = vmatprep.mubr.bf16.mxu0 %v1259_v27  ;;  %1784 = vmatprep.mubr.bf16.mxu1 %v1259_v27  ;;  %v5315_v27 = vld [vmem:[#allocation10 + $0x4] ss:$8 sps:$4 sm:$0xff]  }
 0x367   : > { %v1121_v39 = vadd.f32 %v1120_v38, %v6422_v33  ;;  %v1122_v40 = vpop.f32.mrb[19].mxu1  ;;  %1672 = vmatmul.mubr.bf16.gmra.mrb[28].mxu0 %v1258_v26  ;;  %1785 = vmatmul.mubr.bf16.gmra.mrb[44].mxu1 %v1258_v26  ;;  %v1171_v42 = vmax.f32 %v1117_v35, 0.0  ;;  %v5316_v35 = vld [vmem:[#allocation10 + $0x10] ss:$8 sps:$4 sm:$0xff]   ;;  %v5321_v36 = vld [vmem:[#allocation10 + $0x24] ss:$8 sps:$4 sm:$0xff]  }
 0x368   : > { %v1123_v41 = vadd.f32 %v1122_v40, %v6425_v34  ;;  %v1172_v44 = vmax.f32 %v1119_v37, 0.0  ;;  %2453 = vmatprep.subr.bf16.mxu0 %v5315_v27  ;;  %v5324_v37 = vld [vmem:[#allocation10 + $0x34] ss:$8 sps:$4 sm:$0xff]   ;;  %v5322_v38 = vld [vmem:[#allocation10 + $0x30] ss:$8 sps:$4 sm:$0xff]  }
 0x369   : > { %v1173_v43 = vmax.f32 %v1121_v39, 0.0  ;;  %2454 = vmatpush1.bf16.msra.mxu0 %v5313_v30  ;;  %v5327_v39 = vld [vmem:[#allocation10 + $0x44] ss:$8 sps:$4 sm:$0xff]   ;;  %v5325_v40 = vld [vmem:[#allocation10 + $0x40] ss:$8 sps:$4 sm:$0xff]  }
 0x36a   : > { %v1174_v45 = vmax.f32 %v1123_v41, 0.0  ;;  %v5330_v41 = vld [vmem:[#allocation10 + $0x54] ss:$8 sps:$4 sm:$0xff]  }
 0x36b   : > { %v1260_v46 = vpack.c.bf16 %v1173_v43, %v1171_v42  ;;  %v5328_v42 = vld [vmem:[#allocation10 + $0x50] ss:$8 sps:$4 sm:$0xff]   ;;  %v5333_v43 = vld [vmem:[#allocation10 + $0x64] ss:$8 sps:$4 sm:$0xff]  }
 0x36c   : > { %v1261_v47 = vpack.c.bf16 %v1174_v45, %v1172_v44  ;;  %v1126_v48 = vpop.f32.mrb[20].mxu1  ;;  %v5331_v44 = vld [vmem:[#allocation10 + $0x60] ss:$8 sps:$4 sm:$0xff]   ;;  %v5336_v45 = vld [vmem:[#allocation10 + $0x74] ss:$8 sps:$4 sm:$0xff]  }
 0x36d   : > { %v1127_v49 = vadd.f32 %v1126_v48, %v6422_v33  ;;  %v1128_v50 = vpop.f32.mrb[21].mxu1  ;;  %v5337_v48 = vld [vmem:[#allocation10 + $0x80] ss:$8 sps:$4 sm:$0xff]  }
 0x36e   : > { %v1129_v51 = vadd.f32 %v1128_v50, %v6425_v34  ;;  %v1130_v52 = vpop.f32.mrb[22].mxu1  ;;  %1681 = vmatprep.mubr.bf16.mxu0 %v1261_v47  ;;  %1794 = vmatprep.mubr.bf16.mxu1 %v1261_v47  ;;  %v5339_v47 = vld [vmem:[#allocation10 + $0x84] ss:$8 sps:$4 sm:$0xff]   ;;  %v5340_v50 = vld [vmem:[#allocation10 + $0x90] ss:$8 sps:$4 sm:$0xff]  }
 0x36f   : > { %v1131_v53 = vadd.f32 %v1130_v52, %v6422_v33  ;;  %v1132_v54 = vpop.f32.mrb[23].mxu1  ;;  %1682 = vmatmul.mubr.bf16.gmra.mrb[32].mxu0 %v1260_v46  ;;  %1795 = vmatmul.mubr.bf16.gmra.mrb[48].mxu1 %v1260_v46  ;;  %v1175_v56 = vmax.f32 %v1127_v49, 0.0  ;;  %v5334_v46 = vld [vmem:[#allocation10 + $0x70] ss:$8 sps:$4 sm:$0xff]   ;;  %v5342_v49 = vld [vmem:[#allocation10 + $0x94] ss:$8 sps:$4 sm:$0xff]  }
 0x370   : > { %v1133_v55 = vadd.f32 %v1132_v54, %v6425_v34  ;;  %v1176_v58 = vmax.f32 %v1129_v51, 0.0  ;;  %v5345_v51 = vld [vmem:[#allocation10 + $0xa4] ss:$8 sps:$4 sm:$0xff]   ;;  %v5343_v52 = vld [vmem:[#allocation10 + $0xa0] ss:$8 sps:$4 sm:$0xff]   ;;  %v5941_v54 = vmov -inf  }
 0x371   : > { %v1177_v57 = vmax.f32 %v1131_v53, 0.0  ;;  %1991 = vst.msk [vmem:[#allocation2] sm:$0xf] %vm6460_vm3, %v5941_v54  ;;  %v5364_v53 = vld [vmem:[#allocation10 + $0x110] ss:$8 sps:$4 sm:$0xff]  }
 0x372   : > { %v1178_v59 = vmax.f32 %v1133_v55, 0.0  ;;  %v5348_v55 = vld [vmem:[#allocation10 + $0xb4] ss:$8 sps:$4 sm:$0xff]  }
 0x373   : > { %v1262_v60 = vpack.c.bf16 %v1177_v57, %v1175_v56  ;;  %v5346_v56 = vld [vmem:[#allocation10 + $0xb0] ss:$8 sps:$4 sm:$0xff]   ;;  %v5351_v57 = vld [vmem:[#allocation10 + $0xc4] ss:$8 sps:$4 sm:$0xff]  }
 0x374   : > { %v1263_v62 = vpack.c.bf16 %v1178_v59, %v1176_v58  ;;  %v1136_v63 = vpop.f32.mrb[24].mxu1  ;;  %v5349_v58 = vld [vmem:[#allocation10 + $0xc0] ss:$8 sps:$4 sm:$0xff]   ;;  %v5354_v59 = vld [vmem:[#allocation10 + $0xd4] ss:$8 sps:$4 sm:$0xff]  }
 0x375   : > { %v1137_v1 = vadd.f32 %v1136_v63, %v6422_v33  ;;  %v1138_v2 = vpop.f32.mrb[25].mxu1  ;;  %v5360_v63 = vld [vmem:[#allocation10 + $0xf4] ss:$8 sps:$4 sm:$0xff]  }
 0x376   : > { %v1139_v3 = vadd.f32 %v1138_v2, %v6425_v34  ;;  %v1140_v4 = vpop.f32.mrb[26].mxu1  ;;  %1691 = vmatprep.mubr.bf16.mxu0 %v1263_v62  ;;  %1804 = vmatprep.mubr.bf16.mxu1 %v1263_v62  ;;  %v5355_v62 = vld [vmem:[#allocation10 + $0xe0] ss:$8 sps:$4 sm:$0xff]   ;;  %v5363_v2 = vld [vmem:[#allocation10 + $0x104] ss:$8 sps:$4 sm:$0xff]  }
 0x377   : > { %v1141_v5 = vadd.f32 %v1140_v4, %v6422_v33  ;;  %v1142_v6 = vpop.f32.mrb[27].mxu1  ;;  %1692 = vmatmul.mubr.bf16.gmra.mrb[36].mxu0 %v1262_v60  ;;  %1805 = vmatmul.mubr.bf16.gmra.mrb[52].mxu1 %v1262_v60  ;;  %v1179_v8 = vmax.f32 %v1137_v1, 0.0  ;;  %v5352_v60 = vld [vmem:[#allocation10 + $0xd0] ss:$8 sps:$4 sm:$0xff]  }
 0x378   : > { %v1143_v7 = vadd.f32 %v1142_v6, %v6425_v34  ;;  %v1180_v10 = vmax.f32 %v1139_v3, 0.0  ;;  %v5358_v1 = vld [vmem:[#allocation10 + $0xf0] ss:$8 sps:$4 sm:$0xff]   ;;  %v1279_v3 = vsub.s32 2, %v6410_v28 }
 0x379   : > { %v1181_v9 = vmax.f32 %v1141_v5, 0.0  ;;  %v1251_v4 = vld [vmem:[%s7070_s6] sm:$0xf]  ;;  %v1283_v5 = vsub.s32 3, %v6410_v28 }
 0x37a   : > { %v1182_v61 = vmax.f32 %v1143_v7, 0.0  ;;  %v6472_v6 = vrot.slane %v1251_v4, %v6413_v29  ;;  %v6476_v7 = vrot.slane %v1251_v4, %v1279_v3 }
 0x37b   : > { %v1264_v11 = vpack.c.bf16 %v1181_v9, %v1179_v8  ;;  %v6479_v8 = vrot.slane %v1251_v4, %v6419_v32  ;;  %v6483_v9 = vrot.slane %v1251_v4, %v1283_v5 }
 0x37c   : > { %v1265_v12 = vpack.c.bf16 %v1182_v61, %v1180_v10  ;;  %v1146_v13 = vpop.f32.mrb[28].mxu1 }
 0x37d   : > { %v1147_v14 = vadd.f32 %v1146_v13, %v6422_v33  ;;  %v1148_v15 = vpop.f32.mrb[29].mxu1 }
 0x37e   : > { %v1149_v16 = vadd.f32 %v1148_v15, %v6425_v34  ;;  %v1150_v17 = vpop.f32.mrb[30].mxu1  ;;  %1701 = vmatprep.mubr.bf16.mxu0 %v1265_v12  ;;  %1814 = vmatprep.mubr.bf16.mxu1 %v1265_v12 }
 0x37f   : > { %v1151_v18 = vadd.f32 %v1150_v17, %v6422_v33  ;;  %v1152_v19 = vpop.f32.mrb[31].mxu1  ;;  %1702 = vmatmul.mubr.bf16.gmra.mrb[40].mxu0 %v1264_v11  ;;  %1815 = vmatmul.mubr.bf16.gmra.mrb[56].mxu1 %v1264_v11  ;;  %v1183_v21 = vmax.f32 %v1147_v14, 0.0  ;;  %v5318_v33 = vld [vmem:[#allocation10 + $0x14] ss:$8 sps:$4 sm:$0xff]  }
 0x380   : > { %v1153_v20 = vadd.f32 %v1152_v19, %v6425_v34  ;;  %v1184_v23 = vmax.f32 %v1149_v16, 0.0  ;;  %2455 = vmatprep.subr.bf16.mxu0 %v5318_v33  ;;  %v5319_v34 = vld [vmem:[#allocation10 + $0x20] ss:$8 sps:$4 sm:$0xff]  }
 0x381   : > { %v1185_v22 = vmax.f32 %v1151_v18, 0.0  ;;  %2456 = vmatpush1.bf16.msra.mxu0 %v5316_v35 }
 0x382   : > { %v1186_v24 = vmax.f32 %v1153_v20, 0.0  ;;  %2457 = vmatprep.subr.bf16.mxu0 %v5321_v36 }
 0x383   : > { %v1266_v25 = vpack.c.bf16 %v1185_v22, %v1183_v21 }
 0x384   : > { %v1267_v26 = vpack.c.bf16 %v1186_v24, %v1184_v23 }
 0x385   : > { %2458 = vmatpush1.bf16.msra.mxu0 %v5319_v34 }
 0x386   : > { %1711 = vmatprep.mubr.bf16.mxu0 %v1267_v26  ;;  %1824 = vmatprep.mubr.bf16.mxu1 %v1267_v26 }
 0x387   : > { %1712 = vmatmul.mubr.bf16.gmra.mrb[44].mxu0 %v1266_v25  ;;  %1825 = vmatmul.mubr.bf16.gmra.mrb[60].mxu1 %v1266_v25 }
 0x388   : > { %2459 = vmatprep.subr.bf16.mxu0 %v5324_v37 }
 0x389   : > { %2460 = vmatpush1.bf16.msra.mxu0 %v5322_v38 }
 0x38a   : > { %2461 = vmatprep.subr.bf16.mxu0 %v5327_v39 }
 0x38d   : > { %2462 = vmatpush1.bf16.msra.mxu0 %v5325_v40 }
 0x38e   : > { %2463 = vmatprep.subr.bf16.mxu0 %v5330_v41 }
 0x391   : > { %2464 = vmatpush1.bf16.msra.mxu0 %v5328_v42 }
 0x392   : > { %2465 = vmatprep.subr.bf16.mxu0 %v5333_v43 }
 0x395   : > { %2466 = vmatpush1.bf16.msra.mxu0 %v5331_v44 }
 0x396   : > { %2467 = vmatprep.subr.bf16.mxu0 %v5336_v45 }
 0x399   : > { %2468 = vmatpush1.bf16.msra.mxu0 %v5334_v46 }
 0x39a   : > { %2469 = vmatprep.subr.bf16.mxu0 %v5339_v47 }
 0x39d   : > { %2470 = vmatpush1.bf16.msra.mxu0 %v5337_v48 }
 0x39e   : > { %2471 = vmatprep.subr.bf16.mxu0 %v5342_v49 }
 0x3a1   : > { %2472 = vmatpush1.bf16.msra.mxu0 %v5340_v50 }
 0x3a2   : > { %2473 = vmatprep.subr.bf16.mxu0 %v5345_v51 }
 0x3a5   : > { %2474 = vmatpush1.bf16.msra.mxu0 %v5343_v52 }
 0x3a6   : > { %2475 = vmatprep.subr.bf16.mxu0 %v5348_v55 }
 0x3a9   : > { %2476 = vmatpush1.bf16.msra.mxu0 %v5346_v56 }
 0x3aa   : > { %2477 = vmatprep.subr.bf16.mxu0 %v5351_v57 }
 0x3ad   : > { %2478 = vmatpush1.bf16.msra.mxu0 %v5349_v58 }
 0x3ae   : > { %2479 = vmatprep.subr.bf16.mxu0 %v5354_v59 }
 0x3b1   : > { %2480 = vmatpush1.bf16.msra.mxu0 %v5352_v60 }
 0x3b2   : > { %2481 = vmatprep.subr.bf16.mxu0 %v5357_v31 }
 0x3b5   : > { %2482 = vmatpush1.bf16.msra.mxu0 %v5355_v62 }
 0x3b6   : > { %2483 = vmatprep.subr.bf16.mxu0 %v5360_v63 }
 0x3b9   : > { %2484 = vmatpush1.bf16.msra.mxu0 %v5358_v1 }
 0x3ba   : > { %2494 = vmatprep.subr.bf16.mxu0 %v5363_v2 }
 0x422   : > { %v1643_v10 = vpop.f32.mrb[16].mxu0  ;;  %v1756_v61 = vpop.f32.mrb[32].mxu1 }
 0x423   : > { %v1644_v11 = vadd.f32 %v1643_v10, %v6472_v6  ;;  %v1757_v12 = vadd.f32 %v1756_v61, %v6476_v7  ;;  %v1645_v13 = vpop.f32.mrb[17].mxu0  ;;  %v1758_v14 = vpop.f32.mrb[33].mxu1 }
 0x424   : > { %v1646_v15 = vadd.f32 %v1645_v13, %v6479_v8  ;;  %v1759_v16 = vadd.f32 %v1758_v14, %v6483_v9  ;;  %v1647_v17 = vpop.f32.mrb[18].mxu0  ;;  %v1760_v18 = vpop.f32.mrb[34].mxu1 }
 0x425   : > { %v1648_v19 = vadd.f32 %v1647_v17, %v6472_v6  ;;  %v1761_v20 = vadd.f32 %v1760_v18, %v6476_v7  ;;  %v1649_v21 = vpop.f32.mrb[19].mxu0  ;;  %v1762_v22 = vpop.f32.mrb[35].mxu1  ;;  %v1835_v25 = vmax.f32 %v1644_v11, 0.0  ;;  %v1837_v26 = vmax.f32 %v1757_v12, 0.0 }
 0x426   : > { %v1650_v23 = vadd.f32 %v1649_v21, %v6479_v8  ;;  %v1763_v24 = vadd.f32 %v1762_v22, %v6483_v9  ;;  %v1836_v33 = vmax.f32 %v1646_v15, 0.0  ;;  %v1838_v35 = vmax.f32 %v1759_v16, 0.0 }
 0x427   : > { %v1839_v27 = vmax.f32 %v1648_v19, 0.0  ;;  %v1841_v30 = vmax.f32 %v1761_v20, 0.0 }
 0x428   : > { %v1840_v36 = vmax.f32 %v1650_v23, 0.0  ;;  %v1842_v34 = vmax.f32 %v1763_v24, 0.0 }
 0x429   : > { %v1899_v37 = vmax.f32 %v1835_v25, %v1839_v27  ;;  %v1941_v38 = vmax.f32 %v1837_v26, %v1841_v30 }
 0x42a   : > { %v1920_v39 = vmax.f32 %v1836_v33, %v1840_v36  ;;  %v1962_v40 = vmax.f32 %v1838_v35, %v1842_v34  ;;  %v1653_v41 = vpop.f32.mrb[20].mxu0  ;;  %v1766_v42 = vpop.f32.mrb[36].mxu1 }
 0x42b   : > { %v1654_v43 = vadd.f32 %v1653_v41, %v6472_v6  ;;  %v1767_v44 = vadd.f32 %v1766_v42, %v6476_v7  ;;  %v1655_v45 = vpop.f32.mrb[21].mxu0  ;;  %v1768_v46 = vpop.f32.mrb[37].mxu1 }
 0x42c   : > { %v1656_v47 = vadd.f32 %v1655_v45, %v6479_v8  ;;  %v1769_v48 = vadd.f32 %v1768_v46, %v6483_v9  ;;  %v1657_v49 = vpop.f32.mrb[22].mxu0  ;;  %v1770_v50 = vpop.f32.mrb[38].mxu1 }
 0x42d   : > { %v1843_v51 = vmax.f32 %v1654_v43, 0.0  ;;  %v1845_v52 = vmax.f32 %v1767_v44, 0.0  ;;  %v1658_v54 = vadd.f32 %v1657_v49, %v6472_v6  ;;  %v1771_v55 = vadd.f32 %v1770_v50, %v6476_v7  ;;  %v1659_v56 = vpop.f32.mrb[23].mxu0  ;;  %v1772_v57 = vpop.f32.mrb[39].mxu1 }
 0x42e   : > { %v1844_v58 = vmax.f32 %v1656_v47, 0.0  ;;  %v1846_v59 = vmax.f32 %v1769_v48, 0.0  ;;  %v1660_v60 = vadd.f32 %v1659_v56, %v6479_v8  ;;  %v1773_v31 = vadd.f32 %v1772_v57, %v6483_v9 }
 0x42f   : > { %v1900_v62 = vmax.f32 %v1899_v37, %v1843_v51  ;;  %v1942_v63 = vmax.f32 %v1941_v38, %v1845_v52  ;;  %v1847_v1 = vmax.f32 %v1658_v54, 0.0  ;;  %v1849_v2 = vmax.f32 %v1771_v55, 0.0 }
 0x430   : > { %v1921_v4 = vmax.f32 %v1920_v39, %v1844_v58  ;;  %v1963_v10 = vmax.f32 %v1962_v40, %v1846_v59  ;;  %v1848_v61 = vmax.f32 %v1660_v60, 0.0  ;;  %v1850_v11 = vmax.f32 %v1773_v31, 0.0 }
 0x431   : > { %v1901_v12 = vmax.f32 %v1900_v62, %v1847_v1  ;;  %v1943_v13 = vmax.f32 %v1942_v63, %v1849_v2 }
 0x432   : > { %v1922_v14 = vmax.f32 %v1921_v4, %v1848_v61  ;;  %v1964_v15 = vmax.f32 %v1963_v10, %v1850_v11  ;;  %v1663_v16 = vpop.f32.mrb[24].mxu0  ;;  %v1776_v17 = vpop.f32.mrb[40].mxu1 }
 0x433   : > { %v1664_v18 = vadd.f32 %v1663_v16, %v6472_v6  ;;  %v1777_v19 = vadd.f32 %v1776_v17, %v6476_v7  ;;  %v1665_v20 = vpop.f32.mrb[25].mxu0  ;;  %v1778_v21 = vpop.f32.mrb[41].mxu1 }
 0x434   : > { %v1666_v22 = vadd.f32 %v1665_v20, %v6479_v8  ;;  %v1779_v23 = vadd.f32 %v1778_v21, %v6483_v9  ;;  %v1667_v24 = vpop.f32.mrb[26].mxu0  ;;  %v1780_v25 = vpop.f32.mrb[42].mxu1 }
 0x435   : > { %v1851_v26 = vmax.f32 %v1664_v18, 0.0  ;;  %v1853_v27 = vmax.f32 %v1777_v19, 0.0  ;;  %v1668_v30 = vadd.f32 %v1667_v24, %v6472_v6  ;;  %v1781_v33 = vadd.f32 %v1780_v25, %v6476_v7  ;;  %v1669_v35 = vpop.f32.mrb[27].mxu0  ;;  %v1782_v36 = vpop.f32.mrb[43].mxu1 }
 0x436   : > { %v1852_v34 = vmax.f32 %v1666_v22, 0.0  ;;  %v1854_v37 = vmax.f32 %v1779_v23, 0.0  ;;  %v1670_v38 = vadd.f32 %v1669_v35, %v6479_v8  ;;  %v1783_v39 = vadd.f32 %v1782_v36, %v6483_v9 }
 0x437   : > { %v1902_v40 = vmax.f32 %v1901_v12, %v1851_v26  ;;  %v1944_v41 = vmax.f32 %v1943_v13, %v1853_v27  ;;  %v1855_v42 = vmax.f32 %v1668_v30, 0.0  ;;  %v1857_v43 = vmax.f32 %v1781_v33, 0.0 }
 0x438   : > { %v1923_v44 = vmax.f32 %v1922_v14, %v1852_v34  ;;  %v1965_v45 = vmax.f32 %v1964_v15, %v1854_v37  ;;  %v1856_v46 = vmax.f32 %v1670_v38, 0.0  ;;  %v1858_v47 = vmax.f32 %v1783_v39, 0.0 }
 0x439   : > { %v1903_v48 = vmax.f32 %v1902_v40, %v1855_v42  ;;  %v1945_v49 = vmax.f32 %v1944_v41, %v1857_v43 }
 0x43a   : > { %v1924_v50 = vmax.f32 %v1923_v44, %v1856_v46  ;;  %v1966_v51 = vmax.f32 %v1965_v45, %v1858_v47  ;;  %v1673_v52 = vpop.f32.mrb[28].mxu0  ;;  %v1786_v54 = vpop.f32.mrb[44].mxu1 }
 0x43b   : > { %v1674_v55 = vadd.f32 %v1673_v52, %v6472_v6  ;;  %v1787_v56 = vadd.f32 %v1786_v54, %v6476_v7  ;;  %v1675_v57 = vpop.f32.mrb[29].mxu0  ;;  %v1788_v58 = vpop.f32.mrb[45].mxu1 }
 0x43c   : > { %v1676_v59 = vadd.f32 %v1675_v57, %v6479_v8  ;;  %v1789_v60 = vadd.f32 %v1788_v58, %v6483_v9  ;;  %v1677_v31 = vpop.f32.mrb[30].mxu0  ;;  %v1790_v62 = vpop.f32.mrb[46].mxu1  ;;  %v5410_v57 = vld [vmem:[#allocation12] sm:$0xff]   ;;  %v5411_v58 = vld [vmem:[#allocation12 + $0x48] sm:$0xff]  }
 0x43d   : > { %v1859_v63 = vmax.f32 %v1674_v55, 0.0  ;;  %v1861_v1 = vmax.f32 %v1787_v56, 0.0  ;;  %v1678_v2 = vadd.f32 %v1677_v31, %v6472_v6  ;;  %v1791_v4 = vadd.f32 %v1790_v62, %v6476_v7  ;;  %v1679_v10 = vpop.f32.mrb[31].mxu0  ;;  %v1792_v61 = vpop.f32.mrb[47].mxu1  ;;  %v5409_v56 = vld [vmem:[#allocation12 + $0x40] sm:$0xff]  }
 0x43e   : > { %v1860_v11 = vmax.f32 %v1676_v59, 0.0  ;;  %v1862_v12 = vmax.f32 %v1789_v60, 0.0  ;;  %v1680_v13 = vadd.f32 %v1679_v10, %v6479_v8  ;;  %v1793_v14 = vadd.f32 %v1792_v61, %v6483_v9  ;;  %4772 = vmatprep.subr.bf16.mxu1 %v5409_v56 }
 0x43f   : > { %v1904_v15 = vmax.f32 %v1903_v48, %v1859_v63  ;;  %v1946_v16 = vmax.f32 %v1945_v49, %v1861_v1  ;;  %v1863_v17 = vmax.f32 %v1678_v2, 0.0  ;;  %v1865_v18 = vmax.f32 %v1791_v4, 0.0  ;;  %4773 = vmatpush3.bf16.msra.mxu1 %v5410_v57  ;;  %v5417_v57 = vld [vmem:[#allocation12 + $0x60] sm:$0xff]  }
 0x440   : > { %v1925_v19 = vmax.f32 %v1924_v50, %v1860_v11  ;;  %v1967_v20 = vmax.f32 %v1966_v51, %v1862_v12  ;;  %v1864_v21 = vmax.f32 %v1680_v13, 0.0  ;;  %v1866_v22 = vmax.f32 %v1793_v14, 0.0  ;;  %v5412_v11 = vld [vmem:[#allocation12 + $0x8] sm:$0xff]   ;;  %4774 = vmatprep.subr.bf16.mxu1 %v5411_v58 }
 0x441   : > { %v1905_v23 = vmax.f32 %v1904_v15, %v1863_v17  ;;  %v1947_v24 = vmax.f32 %v1946_v16, %v1865_v18  ;;  %v5413_v16 = vld [vmem:[#allocation12 + $0x50] sm:$0xff]  }
 0x442   : > { %v1926_v25 = vmax.f32 %v1925_v19, %v1864_v21  ;;  %v1968_v26 = vmax.f32 %v1967_v20, %v1866_v22  ;;  %v1683_v27 = vpop.f32.mrb[32].mxu0  ;;  %v1796_v30 = vpop.f32.mrb[48].mxu1 }
 0x443   : > { %v1684_v33 = vadd.f32 %v1683_v27, %v6472_v6  ;;  %v1797_v35 = vadd.f32 %v1796_v30, %v6476_v7  ;;  %v1685_v36 = vpop.f32.mrb[33].mxu0  ;;  %v1798_v34 = vpop.f32.mrb[49].mxu1  ;;  %4775 = vmatpush3.bf16.msra.mxu1 %v5412_v11 }
 0x444   : > { %v1686_v37 = vadd.f32 %v1685_v36, %v6479_v8  ;;  %v1799_v38 = vadd.f32 %v1798_v34, %v6483_v9  ;;  %v1687_v39 = vpop.f32.mrb[34].mxu0  ;;  %v1800_v40 = vpop.f32.mrb[50].mxu1  ;;  %v5414_v36 = vld [vmem:[#allocation12 + $0x10] sm:$0xff]   ;;  %4776 = vmatprep.subr.bf16.mxu1 %v5413_v16 }
 0x445   : > { %v1867_v41 = vmax.f32 %v1684_v33, 0.0  ;;  %v1869_v42 = vmax.f32 %v1797_v35, 0.0  ;;  %v1688_v43 = vadd.f32 %v1687_v39, %v6472_v6  ;;  %v1801_v44 = vadd.f32 %v1800_v40, %v6476_v7  ;;  %v1689_v45 = vpop.f32.mrb[35].mxu0  ;;  %v1802_v46 = vpop.f32.mrb[51].mxu1  ;;  %v5415_v40 = vld [vmem:[#allocation12 + $0x58] sm:$0xff]  }
 0x446   : > { %v1868_v47 = vmax.f32 %v1686_v37, 0.0  ;;  %v1870_v48 = vmax.f32 %v1799_v38, 0.0  ;;  %v1690_v49 = vadd.f32 %v1689_v45, %v6479_v8  ;;  %v1803_v50 = vadd.f32 %v1802_v46, %v6483_v9 }
 0x447   : > { %v1906_v51 = vmax.f32 %v1905_v23, %v1867_v41  ;;  %v1948_v52 = vmax.f32 %v1947_v24, %v1869_v42  ;;  %v1871_v54 = vmax.f32 %v1688_v43, 0.0  ;;  %v1873_v55 = vmax.f32 %v1801_v44, 0.0  ;;  %4777 = vmatpush3.bf16.msra.mxu1 %v5414_v36 }
 0x448   : > { %v1927_v59 = vmax.f32 %v1926_v25, %v1868_v47  ;;  %v1969_v60 = vmax.f32 %v1968_v26, %v1870_v48  ;;  %v1872_v31 = vmax.f32 %v1690_v49, 0.0  ;;  %v1874_v62 = vmax.f32 %v1803_v50, 0.0  ;;  %4778 = vmatprep.subr.bf16.mxu1 %v5415_v40 }
 0x449   : > { %v1907_v63 = vmax.f32 %v1906_v51, %v1871_v54  ;;  %v1949_v1 = vmax.f32 %v1948_v52, %v1873_v55  ;;  %v5416_v51 = vld [vmem:[#allocation12 + $0x18] sm:$0xff]  }
 0x44a   : > { %v1928_v2 = vmax.f32 %v1927_v59, %v1872_v31  ;;  %v1970_v4 = vmax.f32 %v1969_v60, %v1874_v62  ;;  %v1693_v10 = vpop.f32.mrb[36].mxu0  ;;  %v1806_v61 = vpop.f32.mrb[52].mxu1 }
 0x44b   : > { %v1694_v12 = vadd.f32 %v1693_v10, %v6472_v6  ;;  %v1807_v13 = vadd.f32 %v1806_v61, %v6476_v7  ;;  %v1695_v14 = vpop.f32.mrb[37].mxu0  ;;  %v1808_v15 = vpop.f32.mrb[53].mxu1  ;;  %4779 = vmatpush3.bf16.msra.mxu1 %v5416_v51 }
 0x44c   : > { %v1696_v17 = vadd.f32 %v1695_v14, %v6479_v8  ;;  %v1809_v18 = vadd.f32 %v1808_v15, %v6483_v9  ;;  %v1697_v19 = vpop.f32.mrb[38].mxu0  ;;  %v1810_v20 = vpop.f32.mrb[54].mxu1  ;;  %v5418_v14 = vld [vmem:[#allocation12 + $0x20] sm:$0xff]   ;;  %4780 = vmatprep.subr.bf16.mxu1 %v5417_v57 }
 0x44d   : > { %v1875_v21 = vmax.f32 %v1694_v12, 0.0  ;;  %v1877_v22 = vmax.f32 %v1807_v13, 0.0  ;;  %v1698_v23 = vadd.f32 %v1697_v19, %v6472_v6  ;;  %v1811_v24 = vadd.f32 %v1810_v20, %v6476_v7  ;;  %v1699_v25 = vpop.f32.mrb[39].mxu0  ;;  %v1812_v26 = vpop.f32.mrb[55].mxu1  ;;  %v5419_v19 = vld [vmem:[#allocation12 + $0x68] sm:$0xff]  }
 0x44e   : > { %v1876_v27 = vmax.f32 %v1696_v17, 0.0  ;;  %v1878_v30 = vmax.f32 %v1809_v18, 0.0  ;;  %v1700_v33 = vadd.f32 %v1699_v25, %v6479_v8  ;;  %v1813_v35 = vadd.f32 %v1812_v26, %v6483_v9 }
 0x44f   : > { %v1908_v34 = vmax.f32 %v1907_v63, %v1875_v21  ;;  %v1950_v37 = vmax.f32 %v1949_v1, %v1877_v22  ;;  %v1879_v38 = vmax.f32 %v1698_v23, 0.0  ;;  %v1881_v39 = vmax.f32 %v1811_v24, 0.0  ;;  %4781 = vmatpush3.bf16.msra.mxu1 %v5418_v14 }
 0x450   : > { %v1929_v41 = vmax.f32 %v1928_v2, %v1876_v27  ;;  %v1971_v42 = vmax.f32 %v1970_v4, %v1878_v30  ;;  %v1880_v43 = vmax.f32 %v1700_v33, 0.0  ;;  %v1882_v44 = vmax.f32 %v1813_v35, 0.0  ;;  %v5420_v35 = vld [vmem:[#allocation12 + $0x28] sm:$0xff]   ;;  %4782 = vmatprep.subr.bf16.mxu1 %v5419_v19 }
 0x451   : > { %v1909_v45 = vmax.f32 %v1908_v34, %v1879_v38  ;;  %v1951_v46 = vmax.f32 %v1950_v37, %v1881_v39  ;;  %v5421_v39 = vld [vmem:[#allocation12 + $0x70] sm:$0xff]  }
 0x452   : > { %v1930_v47 = vmax.f32 %v1929_v41, %v1880_v43  ;;  %v1972_v48 = vmax.f32 %v1971_v42, %v1882_v44  ;;  %v1703_v49 = vpop.f32.mrb[40].mxu0  ;;  %v1816_v50 = vpop.f32.mrb[56].mxu1 }
 0x453   : > { %v1704_v52 = vadd.f32 %v1703_v49, %v6472_v6  ;;  %v1817_v54 = vadd.f32 %v1816_v50, %v6476_v7  ;;  %v1705_v55 = vpop.f32.mrb[41].mxu0  ;;  %v1818_v56 = vpop.f32.mrb[57].mxu1  ;;  %4783 = vmatpush3.bf16.msra.mxu1 %v5420_v35 }
 0x454   : > { %v1706_v58 = vadd.f32 %v1705_v55, %v6479_v8  ;;  %v1819_v59 = vadd.f32 %v1818_v56, %v6483_v9  ;;  %v1707_v60 = vpop.f32.mrb[42].mxu0  ;;  %v1820_v31 = vpop.f32.mrb[58].mxu1  ;;  %v5422_v55 = vld [vmem:[#allocation12 + $0x30] sm:$0xff]   ;;  %4784 = vmatprep.subr.bf16.mxu1 %v5421_v39 }
 0x455   : > { %v1883_v62 = vmax.f32 %v1704_v52, 0.0  ;;  %v1885_v63 = vmax.f32 %v1817_v54, 0.0  ;;  %v1708_v1 = vadd.f32 %v1707_v60, %v6472_v6  ;;  %v1821_v2 = vadd.f32 %v1820_v31, %v6476_v7  ;;  %v1709_v4 = vpop.f32.mrb[43].mxu0  ;;  %v1822_v10 = vpop.f32.mrb[59].mxu1 }
 0x456   : > { %v1884_v61 = vmax.f32 %v1706_v58, 0.0  ;;  %v1886_v11 = vmax.f32 %v1819_v59, 0.0  ;;  %v1710_v12 = vadd.f32 %v1709_v4, %v6479_v8  ;;  %v1823_v13 = vadd.f32 %v1822_v10, %v6483_v9 }
 0x457   : > { %v1910_v15 = vmax.f32 %v1909_v45, %v1883_v62  ;;  %v1952_v16 = vmax.f32 %v1951_v46, %v1885_v63  ;;  %v1887_v17 = vmax.f32 %v1708_v1, 0.0  ;;  %v1889_v18 = vmax.f32 %v1821_v2, 0.0  ;;  %4785 = vmatpush3.bf16.msra.mxu1 %v5422_v55 }
 0x458   : > { %v1931_v20 = vmax.f32 %v1930_v47, %v1884_v61  ;;  %v1973_v21 = vmax.f32 %v1972_v48, %v1886_v11  ;;  %v1888_v22 = vmax.f32 %v1710_v12, 0.0  ;;  %v1890_v23 = vmax.f32 %v1823_v13, 0.0 }
 0x459   : > { %v1911_v24 = vmax.f32 %v1910_v15, %v1887_v17  ;;  %v1953_v25 = vmax.f32 %v1952_v16, %v1889_v18  ;;  %v5942_v13 = vmov 1966171168  }
 0x45a   : > { %v1932_v26 = vmax.f32 %v1931_v20, %v1888_v22  ;;  %v1974_v27 = vmax.f32 %v1973_v21, %v1890_v23  ;;  %v1713_v30 = vpop.f32.mrb[44].mxu0  ;;  %v1826_v33 = vpop.f32.mrb[60].mxu1  ;;  %v2000_v14 = vunpack.c.l.s4 %v5942_v13  ;;  %v5399_v13 = vld [vmem:[#allocation10 + $0x1c4] ss:$8 sps:$4 sm:$0xff]  }
 0x45b   : > { %v1714_v36 = vadd.f32 %v1713_v30, %v6472_v6  ;;  %v1827_v34 = vadd.f32 %v1826_v33, %v6476_v7  ;;  %v1715_v37 = vpop.f32.mrb[45].mxu0  ;;  %v1828_v38 = vpop.f32.mrb[61].mxu1 }
 0x45c   : > { %v1716_v40 = vadd.f32 %v1715_v37, %v6479_v8  ;;  %v1829_v41 = vadd.f32 %v1828_v38, %v6483_v9  ;;  %v1717_v42 = vpop.f32.mrb[46].mxu0  ;;  %v1830_v43 = vpop.f32.mrb[62].mxu1  ;;  %v2001_v23 = vunpack.c.0.s8 %v2000_v14  ;;  %v5397_v14 = vld [vmem:[#allocation10 + $0x1c0] ss:$8 sps:$4 sm:$0xff]  }
 0x45d   : > { %v1891_v44 = vmax.f32 %v1714_v36, 0.0  ;;  %v1893_v45 = vmax.f32 %v1827_v34, 0.0  ;;  %v1718_v46 = vadd.f32 %v1717_v42, %v6472_v6  ;;  %v1831_v47 = vadd.f32 %v1830_v43, %v6476_v7  ;;  %v1719_v48 = vpop.f32.mrb[47].mxu0  ;;  %v1832_v49 = vpop.f32.mrb[63].mxu1  ;;  %v1992_v43 = vld [vmem:[#allocation2] sm:$0xf] }
 0x45e   : > { %v1892_v50 = vmax.f32 %v1716_v40, 0.0  ;;  %v1894_v51 = vmax.f32 %v1829_v41, 0.0  ;;  %v1720_v52 = vadd.f32 %v1719_v48, %v6479_v8  ;;  %v1833_v54 = vadd.f32 %v1832_v49, %v6483_v9 }
 0x45f   : > { %v1912_v56 = vmax.f32 %v1911_v24, %v1891_v44  ;;  %v1954_v57 = vmax.f32 %v1953_v25, %v1893_v45  ;;  %v1895_v58 = vmax.f32 %v1718_v46, 0.0  ;;  %v1897_v59 = vmax.f32 %v1831_v47, 0.0 }
 0x460   : > { %v1933_v60 = vmax.f32 %v1932_v26, %v1892_v50  ;;  %v1975_v31 = vmax.f32 %v1974_v27, %v1894_v51  ;;  %v1896_v6 = vmax.f32 %v1720_v52, 0.0  ;;  %v1898_v62 = vmax.f32 %v1833_v54, 0.0  ;;  %v5361_v51 = vld [vmem:[#allocation10 + $0x100] ss:$8 sps:$4 sm:$0xff]   ;;  %v5366_v54 = vld [vmem:[#allocation10 + $0x114] ss:$8 sps:$4 sm:$0xff]  }
 0x461   : > { %v1913_v7 = vmax.f32 %v1912_v56, %v1895_v58  ;;  %v1955_v63 = vmax.f32 %v1954_v57, %v1897_v59  ;;  %v2004_v34 = vsub.s32 %v2001_v23, %v6410_v28  ;;  %v5369_v56 = vld [vmem:[#allocation10 + $0x124] ss:$8 sps:$4 sm:$0xff]   ;;  %v5367_v57 = vld [vmem:[#allocation10 + $0x120] ss:$8 sps:$4 sm:$0xff]   ;;  %v5372_v58 = vld [vmem:[#allocation10 + $0x134] ss:$8 sps:$4 sm:$0xff]  }
 0x462   : > { %v1934_v1 = vmax.f32 %v1933_v60, %v1896_v6  ;;  %v1976_v2 = vmax.f32 %v1975_v31, %v1898_v62  ;;  %v5370_v59 = vld [vmem:[#allocation10 + $0x130] ss:$8 sps:$4 sm:$0xff]   ;;  %v5373_v60 = vld [vmem:[#allocation10 + $0x140] ss:$8 sps:$4 sm:$0xff]   ;;  %v5378_v31 = vld [vmem:[#allocation10 + $0x154] ss:$8 sps:$4 sm:$0xff]  }
 0x463   : > { %v1914_v4 = vrot.slane %v1913_v7, 4  ;;  %v1956_v8 = vrot.slane %v1955_v63, 4  ;;  %v5376_v6 = vld [vmem:[#allocation10 + $0x150] ss:$8 sps:$4 sm:$0xff]   ;;  %v5381_v62 = vld [vmem:[#allocation10 + $0x164] ss:$8 sps:$4 sm:$0xff]  }
 0x464   : > { %v1935_v10 = vrot.slane %v1934_v1, 4  ;;  %v1977_v9 = vrot.slane %v1976_v2, 4  ;;  %v5423_v23 = vld [vmem:[#allocation12 + $0x78] sm:$0xff]  }
 0x465   : > { %v1915_v61 = vmax.f32 %v1913_v7, %v1914_v4  ;;  %v1957_v11 = vmax.f32 %v1955_v63, %v1956_v8  ;;  %v5379_v7 = vld [vmem:[#allocation10 + $0x160] ss:$8 sps:$4 sm:$0xff]   ;;  %v5384_v63 = vld [vmem:[#allocation10 + $0x174] ss:$8 sps:$4 sm:$0xff]   ;;  %4786 = vmatprep.subr.bf16.mxu1 %v5423_v23 }
 0x466   : > { %v1936_v12 = vmax.f32 %v1934_v1, %v1935_v10  ;;  %v1978_v15 = vmax.f32 %v1976_v2, %v1977_v9  ;;  %v5382_v1 = vld [vmem:[#allocation10 + $0x170] ss:$8 sps:$4 sm:$0xff]   ;;  %v5387_v2 = vld [vmem:[#allocation10 + $0x184] ss:$8 sps:$4 sm:$0xff]   ;;  %v5385_v4 = vld [vmem:[#allocation10 + $0x180] ss:$8 sps:$4 sm:$0xff]  }
 0x467   : > { %v1916_v16 = vrot.slane %v1915_v61, 2  ;;  %v1958_v17 = vrot.slane %v1957_v11, 2  ;;  %v5390_v8 = vld [vmem:[#allocation10 + $0x194] ss:$8 sps:$4 sm:$0xff]   ;;  %v5388_v10 = vld [vmem:[#allocation10 + $0x190] ss:$8 sps:$4 sm:$0xff]  }
 0x468   : > { %v1937_v18 = vrot.slane %v1936_v12, 2  ;;  %v1979_v19 = vrot.slane %v1978_v15, 2  ;;  %v5393_v9 = vld [vmem:[#allocation10 + $0x1a4] ss:$8 sps:$4 sm:$0xff]  }
 0x469   : > { %v1917_v20 = vmax.f32 %v1915_v61, %v1916_v16  ;;  %v1959_v21 = vmax.f32 %v1957_v11, %v1958_v17  ;;  %v5391_v61 = vld [vmem:[#allocation10 + $0x1a0] ss:$8 sps:$4 sm:$0xff]   ;;  %v5396_v11 = vld [vmem:[#allocation10 + $0x1b4] ss:$8 sps:$4 sm:$0xff]   ;;  %v5400_v16 = vld [vmem:[#allocation10 + $0x1d0] ss:$8 sps:$4 sm:$0xff]  }
 0x46a   : > { %v1938_v22 = vmax.f32 %v1936_v12, %v1937_v18  ;;  %v1980_v24 = vmax.f32 %v1978_v15, %v1979_v19  ;;  %v5394_v12 = vld [vmem:[#allocation10 + $0x1b0] ss:$8 sps:$4 sm:$0xff]   ;;  %v5402_v15 = vld [vmem:[#allocation10 + $0x1d4] ss:$8 sps:$4 sm:$0xff]   ;;  %v5405_v17 = vld [vmem:[#allocation10 + $0x1e4] ss:$8 sps:$4 sm:$0xff]  }
 0x46b   : > { %v1918_v25 = vrot.slane %v1917_v20, 1  ;;  %v1960_v26 = vrot.slane %v1959_v21, 1  ;;  %v5403_v18 = vld [vmem:[#allocation10 + $0x1e0] ss:$8 sps:$4 sm:$0xff]   ;;  %v5408_v19 = vld [vmem:[#allocation10 + $0x1f4] ss:$8 sps:$4 sm:$0xff]  }
 0x46c   : > { %v1939_v27 = vrot.slane %v1938_v22, 1  ;;  %v1981_v30 = vrot.slane %v1980_v24, 1 }
 0x46d   : > { %v1919_v33 = vmax.f32 %v1917_v20, %v1918_v25  ;;  %v1961_v35 = vmax.f32 %v1959_v21, %v1960_v26  ;;  %v5406_v20 = vld [vmem:[#allocation10 + $0x1f0] ss:$8 sps:$4 sm:$0xff]   ;;  %v5943_v25 = vmov 0.0  }
 0x46e   : > { %v1940_v36 = vmax.f32 %v1938_v22, %v1939_v27  ;;  %v1982_v37 = vmax.f32 %v1980_v24, %v1981_v30  ;;  %v5424_v24 = vld [vmem:[#allocation12 + $0x38] sm:$0xff]   ;;  %v2096_v26 = vld [vmem:[%s7143_s2] sm:$0x3] }
 0x46f   : > { %4787 = vmatpush3.bf16.msra.mxu1 %v5424_v24  ;;  %v2446_v27 = vrot.slane %v2096_v26, %v6413_v29  ;;  %v2450_v30 = vrot.slane %v2096_v26, %v6419_v32 }
 0x470   : > { %v1997_v38 = vcombine.low %v1919_v33, %v1940_v36  ;;  %v1998_v39 = vcombine.low %v1961_v35, %v1982_v37  ;;  %4885 = vmatprep.subr.bf16.mxu1 %v5943_v25 }
 0x472   : > { %v2005_v40 = vrot.slane %v1997_v38, %v2004_v34  ;;  %v2012_v41 = vrot.slane %v1998_v39, %v2004_v34 }
 0x474   : > { %v2013_v42 = vcombine.low %v2005_v40, %v2012_v41  ;;  %v5425_v40 = vld [vmem:[%s7144_s27] sm:$0xff]  }
 0x476   : > { %v2020_v44 = vrot.slane %v2013_v42, %v2004_v34  ;;  %v5428_v42 = vld [vmem:[%s7144_s27 + $0x18] sm:$0xff]  }
 0x478   : > { %v2022_v45 = vmax.f32 %v1992_v43, %v2020_v44  ;;  %v5429_v43 = vld [vmem:[%s7144_s27 + $0x20] sm:$0xff]   ;;  %v5430_v44 = vld [vmem:[%s7144_s27 + $0x28] sm:$0xff]  }
 0x47a   : > { %2027 = vst.msk [vmem:[#allocation2] sm:$0xf] %vm6460_vm3, %v2022_v45  ;;  %v5431_v45 = vld [vmem:[%s7144_s27 + $0x30] sm:$0xff]  }
 0x481   : > { %v6552_v46 = vld [vmem:[#allocation2] sm:$0xf] }
 0x482   : > { %v2105_v47 = vrot.slane %v6552_v46, %v6419_v32  ;;  %v2101_v48 = vrot.slane %v6552_v46, %v6413_v29  ;;  %v2113_v49 = vrot.slane %v6552_v46, %v1283_v5  ;;  %v5375_v5 = vld [vmem:[#allocation10 + $0x144] ss:$8 sps:$4 sm:$0xff]   ;;  %v2109_v21 = vrot.slane %v6552_v46, %v1279_v3  ;;  %v5426_v29 = vld [vmem:[%s7144_s27 + $0x8] sm:$0xff]  }
 0x483   : > { %v5427_v32 = vld [vmem:[%s7144_s27 + $0x10] sm:$0xff]   ;;  %v5432_v46 = vld [vmem:[%s7144_s27 + $0x38] sm:$0xff]  }
 0x484   : > { %v2119_v50 = vpack.c.bf16 %v2105_v47, %v2105_v47  ;;  %v2118_v52 = vpack.c.bf16 %v2101_v48, %v2101_v48  ;;  %v2121_v55 = vpack.c.bf16 %v2113_v49, %v2113_v49  ;;  %v2120_v22 = vpack.c.bf16 %v2109_v21, %v2109_v21  ;;  %v2569_v48 = vld [vmem:[#allocation13] sm:$0x1] }
 0x486   : > { %2485 = vmatprep.mubr.bf16.mxu0 %v2119_v50 }
 0x487   : > { %2486 = vmatmul.mubr.bf16.vlgmr.msra.gmra.mrb[48].mxu0 %v2118_v52 }
 0x488   : > { %2495 = vmatpush1.bf16.msra.mxu0 %v5361_v51  ;;  %2526 = vmatprep.mubr.bf16.mxu0 %v2121_v55 }
 0x489   : > { %2496 = vmatprep.subr.bf16.mxu0 %v5366_v54 }
 0x48c   : > { %2497 = vmatpush1.bf16.msra.mxu0 %v5364_v53 }
 0x48d   : > { %2498 = vmatprep.subr.bf16.mxu0 %v5369_v56  ;;  %v2725_v56 = vld [vmem:[#allocation15] sm:$0x1] }
 0x490   : > { %2499 = vmatpush1.bf16.msra.mxu0 %v5367_v57 }
 0x491   : > { %2500 = vmatprep.subr.bf16.mxu0 %v5372_v58 }
 0x494   : > { %2501 = vmatpush1.bf16.msra.mxu0 %v5370_v59 }
 0x495   : > { %2502 = vmatprep.subr.bf16.mxu0 %v5375_v5 }
 0x498   : > { %2503 = vmatpush1.bf16.msra.mxu0 %v5373_v60 }
 0x499   : > { %2504 = vmatprep.subr.bf16.mxu0 %v5378_v31 }
 0x49c   : > { %2505 = vmatpush1.bf16.msra.mxu0 %v5376_v6 }
 0x49d   : > { %2506 = vmatprep.subr.bf16.mxu0 %v5381_v62 }
 0x4a0   : > { %2507 = vmatpush1.bf16.msra.mxu0 %v5379_v7 }
 0x4a1   : > { %2508 = vmatprep.subr.bf16.mxu0 %v5384_v63 }
 0x4a4   : > { %2509 = vmatpush1.bf16.msra.mxu0 %v5382_v1 }
 0x4a5   : > { %2510 = vmatprep.subr.bf16.mxu0 %v5387_v2 }
 0x4a8   : > { %2511 = vmatpush1.bf16.msra.mxu0 %v5385_v4 }
 0x4a9   : > { %2512 = vmatprep.subr.bf16.mxu0 %v5390_v8 }
 0x4ac   : > { %2513 = vmatpush1.bf16.msra.mxu0 %v5388_v10 }
 0x4ad   : > { %2514 = vmatprep.subr.bf16.mxu0 %v5393_v9 }
 0x4b0   : > { %2515 = vmatpush1.bf16.msra.mxu0 %v5391_v61 }
 0x4b1   : > { %2516 = vmatprep.subr.bf16.mxu0 %v5396_v11 }
 0x4b4   : > { %2517 = vmatpush1.bf16.msra.mxu0 %v5394_v12 }
 0x4b5   : > { %2518 = vmatprep.subr.bf16.mxu0 %v5399_v13 }
 0x4b8   : > { %2519 = vmatpush1.bf16.msra.mxu0 %v5397_v14 }
 0x4b9   : > { %2520 = vmatprep.subr.bf16.mxu0 %v5402_v15 }
 0x4bc   : > { %2521 = vmatpush1.bf16.msra.mxu0 %v5400_v16 }
 0x4bd   : > { %2522 = vmatprep.subr.bf16.mxu0 %v5405_v17 }
 0x4c0   : > { %2523 = vmatpush1.bf16.msra.mxu0 %v5403_v18 }
 0x4c1   : > { %2524 = vmatprep.subr.bf16.mxu0 %v5408_v19 }
 0x4c4   : > { %2525 = vmatpush1.bf16.msra.mxu0 %v5406_v20 }
 0x4c7   : > { %2527 = vmatmul.mubr.bf16.vlgmr.msra.gmra.mrb[48].mxu0 %v2120_v22 }
 0x59a   : > { %v2528_v28 = vpop.f32.mrb[48].mxu0 }
 0x59b   : > { %v4905_v33 = vadd.f32 %v2528_v28, %v2446_v27  ;;  %v2530_v3 = vpop.f32.mrb[49].mxu0 }
 0x59c   : > { %v4906_v35 = vadd.f32 %v2530_v3, %v2450_v30  ;;  %v2532_v36 = vpop.f32.mrb[50].mxu0 }
 0x59d   : > { %v2535_v34 = vmax.f32 %v4905_v33, 0.0  ;;  %v2533_v37 = vpop.f32.mrb[51].mxu0 }
 0x59e   : > { %v2536_v38 = vmax.f32 %v4906_v35, 0.0 }
 0x59f   : > { %v2570_v41 = vpack.c.bf16 %v2535_v34, %v2535_v34 }
 0x5a0   : > { %v2571_v39 = vpack.c.bf16 %v2536_v38, %v2536_v38 }
 0x5a2   : > { %2700 = vmatprep.mubr.bf16.mxu1 %v2571_v39 }
 0x5a3   : > { %2701 = vmatmul.mubr.bf16.vlgmr.msra.gmra.mrb[64].mxu1 %v2570_v41 }
 0x5a4   : > { %4886 = vmatpush3.bf16.msra.mxu1 %v5425_v40  ;;  %4901 = vmatprep.mubr.msk.bf16.mxu1 %vm5944_vm4, %v5943_v25 }
 0x5a5   : > { %4887 = vmatprep.subr.bf16.mxu1 %v5943_v25 }
 0x5a8   : > { %4888 = vmatpush3.bf16.msra.mxu1 %v5426_v29 }
 0x5a9   : > { %4889 = vmatprep.subr.bf16.mxu1 %v5943_v25 }
 0x5ac   : > { %4890 = vmatpush3.bf16.msra.mxu1 %v5427_v32 }
 0x5ad   : > { %4891 = vmatprep.subr.bf16.mxu1 %v5943_v25 }
 0x5b0   : > { %4892 = vmatpush3.bf16.msra.mxu1 %v5428_v42 }
 0x5b1   : > { %4893 = vmatprep.subr.bf16.mxu1 %v5943_v25 }
 0x5b4   : > { %4894 = vmatpush3.bf16.msra.mxu1 %v5429_v43 }
 0x5b5   : > { %4895 = vmatprep.subr.bf16.mxu1 %v5943_v25 }
 0x5b8   : > { %4896 = vmatpush3.bf16.msra.mxu1 %v5430_v44 }
 0x5b9   : > { %4897 = vmatprep.subr.bf16.mxu1 %v5943_v25 }
 0x5bc   : > { %4898 = vmatpush3.bf16.msra.mxu1 %v5431_v45 }
 0x5bd   : > { %4899 = vmatprep.subr.bf16.mxu1 %v5943_v25 }
 0x5c0   : > { %4900 = vmatpush3.bf16.msra.mxu1 %v5432_v46 }
 0x676   : > { %v4788_v47 = vpop.f32.mrb[64].mxu1 }
 0x677   : > { %v4789_v49 = vpop.f32.mrb[65].mxu1 }
 0x678   : > { %v4790_v50 = vadd.f32 %v4789_v49, %v4788_v47  ;;  %v4791_v51 = vpop.f32.mrb[66].mxu1 }
 0x679   : > { %v4792_v52 = vpop.f32.mrb[67].mxu1 }
 0x67a   : > { %v2703_v54 = vadd.f32 %v4790_v50, %v2569_v48 }
 0x67c   : > { %v2708_v55 = vmax.f32 %v2703_v54, 0.0 }
 0x67e   : > { %v2726_v53 = vpack.c.bf16 %v2708_v55, %v2708_v55 }
 0x680   : > { %4902 = vmatmul.mubr.bf16.vlgmr.msra.gmra.mrb[68].mxu1 %v2726_v53 }
 0x753   : > { %v2809_v57 = vpop.f32.mrb[68].mxu1 }
 0x754   : > { %v2810_v58 = vadd.f32 %v2809_v57, %v2725_v56  ;;  %v4903_v59 = vpop.f32.mrb[69].mxu1 }
 0x755   : > { %v2812_v5 = vpop.f32.mrb[70].mxu1 }
 0x756   : > { %2816 = vst.msk [vmem:[#allocation3] sm:$0x1] %vm2815_vm5, %v2810_v58  ;;  %v4904_v60 = vpop.f32.mrb[71].mxu1 }
 0x757 PF: > { %p4663_p10 = scmp.ne.s32.totalorder %s5906_s21, 1 }
 0x758   : > { %v5945_v6 = vmov (!%p4663_p10), 3   ;;  %v5946_v62 = vmov (!%p4663_p10), 4   ;;  %v5947_v7 = vmov (!%p4663_p10), 0   ;;  %v5948_v63 = vmov (!%p4663_p10), 1   ;;  %s7145_s23 = sld [smem:[#allocation44_spill]] (!%p4663_p10)  ;;  %s7146_s3 = sld [smem:[#allocation45_spill]] (!%p4663_p10) }
 0x759   : > { %2820 = sbr.rel (%p4663_p10) target bundleno = 2961 (0xb91), region = 148  ;;  %5435 = vset.pattern.permute.xlu1 (!%p4663_p10), %v5945_v6  ;;  %5433 = vset.pattern.permute.xlu0 (!%p4663_p10), %v5946_v62  ;;  %v5949_v1 = vmov (!%p4663_p10), 5   ;;  %v5950_v2 = vmov (!%p4663_p10), 7   ;;  %v5951_v4 = vmov (!%p4663_p10), 2   ;;  %v5952_v8 = vmov (!%p4663_p10), 8   ;;  %s7147_s26 = sld [smem:[#allocation46_spill]] (!%p4663_p10) }
 0x75a   : > { %3067 = vmatprep.mubr.bf16.mxu0 (!%p4663_p10), %v5947_v7  ;;  %3180 = vmatprep.mubr.bf16.mxu1 (!%p4663_p10), %v5947_v7  ;;  %v5953_v10 = vmov (!%p4663_p10), 6   ;;  %v2827_v9 = vlaneseq (!%p4663_p10)  ;;  %v5954_v11 = vmov (!%p4663_p10), 1983009808   ;;  %vm2934_vm6 = vcmask (!%p4663_p10), 1040384   ;;  %s7148_s10 = sld [smem:[#allocation47_spill]] (!%p4663_p10) }
 0x75b   : > { %v2981_v12 = vunpack.c.l.s4 (!%p4663_p10), %v5954_v11  ;;  %v5955_v16 = vmov (!%p4663_p10), 65535   ;;  %vm2936_vm7 = vcmask (!%p4663_p10), 1041408   ;;  %v5446_v11 = vld [vmem:[#allocation16 + $0x4] ss:$8 sps:$4 sm:$0xff] (!%p4663_p10)   ;;  %vm2996_vm8 = vcmask (!%p4663_p10), 23552  }
 0x75c   : > { %v6600_v13 = vshrl.u32 (!%p4663_p10), %v2827_v9, 7  ;;  %v3021_v17 = vsel (!%p4663_p10), %vm2934_vm6, 4294967295, %v5955_v16  ;;  %v5449_v16 = vld [vmem:[#allocation16 + $0x14] ss:$8 sps:$4 sm:$0xff] (!%p4663_p10)  }
 0x75d   : > { %v2821_v31 = vld [vmem:[#allocation3] sm:$0x1] (!%p4663_p10)  ;;  %v2982_v14 = vunpack.c.0.s8 (!%p4663_p10), %v2981_v12  ;;  %v3022_v20 = vsel (!%p4663_p10), %vm2936_vm7, %v3021_v17, 0  ;;  %v6628_v12 = vld [vmem:[#allocation16 + $0x104] ss:$8 sps:$4 sm:$0xff] (!%p4663_p10)  }
 0x75e   : > { %2833 = vperm.xlu1 (!%p4663_p10), %5435, %v2821_v31   ;;  %2868 = vperm.xlu0 (!%p4663_p10), %5433, %v2821_v31   ;;  %v2938_v61 = vld [vmem:[%s7145_s23] sm:$0xff] (!%p4663_p10)  ;;  %v6606_v35 = vsub.s32 (!%p4663_p10), 0, %v6600_v13 }
 0x75f   : > { %v2979_v15 = vcombine.high (!%p4663_p10), %v2938_v61, %v2938_v61  ;;  %v2985_v18 = vsub.s32 (!%p4663_p10), %v2982_v14, %v6600_v13  ;;  %v6631_v14 = vld [vmem:[#allocation16 + $0x100] ss:$8 sps:$4 sm:$0xff] (!%p4663_p10)   ;;  %v6633_v17 = vld [vmem:[#allocation16 + $0x114] ss:$8 sps:$4 sm:$0xff] (!%p4663_p10)  }
 0x761   : > { %v2986_v19 = vrot.slane %v2938_v61, %v2985_v18  ;;  %v2993_v21 = vrot.slane %v2979_v15, %v2985_v18  ;;  %v5447_v18 = vld [vmem:[#allocation16 + $0x10] ss:$8 sps:$4 sm:$0xff]  }
 0x762   : > { %5436 = vset.pattern.permute.xlu1 %v5948_v63  ;;  %5434 = vset.pattern.permute.xlu0 %v5949_v1 }
 0x763   : > { %2859 = vperm.xlu1 %5436, %v2821_v31   ;;  %2903 = vperm.xlu0 %5434, %v2821_v31   ;;  %v2994_v22 = vcombine.high %v2986_v19, %v2986_v19  ;;  %v2995_v23 = vcombine.high %v2993_v21, %v2993_v21  ;;  %v3024_v24 = vand.u32 %v3022_v20, %v2986_v19  ;;  %v6640_v19 = vld [vmem:[#allocation16 + $0x110] ss:$8 sps:$4 sm:$0xff]  }
 0x764   : > { %v3030_v25 = vand.u32 %v3022_v20, %v2993_v21  ;;  %v6643_v21 = vld [vmem:[#allocation16 + $0x124] ss:$8 sps:$4 sm:$0xff]  }
 0x765   : > { %v3027_v26 = vand.u32 %v3022_v20, %v2994_v22  ;;  %v3033_v27 = vand.u32 %v3022_v20, %v2995_v23  ;;  %v5452_v20 = vld [vmem:[#allocation16 + $0x24] ss:$8 sps:$4 sm:$0xff]   ;;  %v5450_v23 = vld [vmem:[#allocation16 + $0x20] ss:$8 sps:$4 sm:$0xff]  }
 0x767   : > { %5437 = vset.pattern.permute.xlu1 %v5950_v2  ;;  %5438 = vset.pattern.permute.xlu0 %v5951_v4 }
 0x768   : > { %2881 = vperm.xlu1 %5437, %v2821_v31   ;;  %2894 = vperm.xlu0 %5438, %v2821_v31  }
 0x769   : > { %3035 = vmatprep.subr.bf16.mxu0 %v3027_v26  ;;  %3148 = vmatprep.subr.bf16.mxu1 %v3033_v27  ;;  %v6649_v26 = vld [vmem:[#allocation16 + $0x134] ss:$8 sps:$4 sm:$0xff]   ;;  %v5453_v27 = vld [vmem:[#allocation16 + $0x30] ss:$8 sps:$4 sm:$0xff]  }
 0x76a   : > { %3036 = vmatpush1.bf16.msra.mxu0 %v3024_v24  ;;  %3149 = vmatpush1.bf16.msra.mxu1 %v3030_v25  ;;  %v6646_v24 = vld [vmem:[#allocation16 + $0x120] ss:$8 sps:$4 sm:$0xff]   ;;  %v5455_v25 = vld [vmem:[#allocation16 + $0x34] ss:$8 sps:$4 sm:$0xff]  }
 0x76b   : > { %3753 = vmatprep.subr.bf16.mxu0 %v5446_v11  ;;  %4911 = vmatprep.subr.bf16.mxu1 %v6628_v12  ;;  %v6725_v11 = vld [vmem:[#allocation16 + $0x1b4] ss:$8 sps:$4 sm:$0xff]  }
 0x76c   : > { %5439 = vset.pattern.permute.xlu1 %v5952_v8  ;;  %5441 = vset.pattern.permute.xlu0 %v5953_v10 }
 0x76d   : > { %2916 = vperm.xlu1 %5439, %v2821_v31   ;;  %2846 = vperm.xlu0 %5441, %v2821_v31  }
 0x771   : > { %5440 = vset.pattern.permute.xlu1 %v5947_v7  ;;  %5442 = vset.pattern.permute.xlu0 %v5952_v8 }
 0x772   : > { %2824 = vperm.xlu1 %5440, %v2821_v31  }
 0x7dd   : > { %v2834_v30 = vpop.permute.xlu1 %2833  ;;  %v2869_v28 = vpop.permute.xlu0 %2868 }
 0x7de   : > { %v2874_v36 = vrot.slane %v2869_v28, %v6606_v35  ;;  %v2839_v42 = vrot.slane %v2834_v30, %v6606_v35  ;;  %v6656_v30 = vld [vmem:[#allocation16 + $0x130] ss:$8 sps:$4 sm:$0xff]   ;;  %v5458_v28 = vld [vmem:[#allocation16 + $0x44] ss:$8 sps:$4 sm:$0xff]  }
 0x7e0   : > { %v2875_v40 = vmul.f32 %v2874_v36, %v6363_v0  ;;  %v2840_v54 = vmul.f32 %v2839_v42, %v6363_v0  ;;  %v5456_v36 = vld [vmem:[#allocation16 + $0x40] ss:$8 sps:$4 sm:$0xff]   ;;  %v5467_v42 = vld [vmem:[#allocation16 + $0x74] ss:$8 sps:$4 sm:$0xff]  }
 0x7e2   : > { %v2860_v33 = vpop.permute.xlu1 %2859  ;;  %v2904_v3 = vpop.permute.xlu0 %2903  ;;  %v2877_v48 = vrot.slane %v2875_v40, 1  ;;  %v2842_v60 = vrot.slane %v2840_v54, 1  ;;  %v6672_v40 = vld [vmem:[#allocation16 + $0x150] ss:$8 sps:$4 sm:$0xff]  }
 0x7e3   : > { %v2909_v34 = vrot.slane %v2904_v3, %v6606_v35  ;;  %v2865_v41 = vrot.slane %v2860_v33, %v6606_v35  ;;  %v6659_v33 = vld [vmem:[#allocation16 + $0x144] ss:$8 sps:$4 sm:$0xff]   ;;  %v5486_v54 = vld [vmem:[#allocation16 + $0xb0] ss:$8 sps:$4 sm:$0xff]  }
 0x7e5   : > { %v2910_v29 = vmul.f32 %v2909_v34, %v6363_v0  ;;  %v2866_v49 = vmul.f32 %v2865_v41, %v6363_v0  ;;  %v6662_v34 = vld [vmem:[#allocation16 + $0x140] ss:$8 sps:$4 sm:$0xff]   ;;  %v5464_v41 = vld [vmem:[#allocation16 + $0x64] ss:$8 sps:$4 sm:$0xff]  }
 0x7e7   : > { %v2882_v37 = vpop.permute.xlu1 %2881  ;;  %v2895_v39 = vpop.permute.xlu0 %2894  ;;  %v2912_v50 = vrot.slane %v2910_v29, 1  ;;  %v2879_v58 = vadd.f32 %v2877_v48, %v2866_v49  ;;  %v5474_v48 = vld [vmem:[#allocation16 + $0x90] ss:$8 sps:$4 sm:$0xff]   ;;  %v5482_v49 = vld [vmem:[#allocation16 + $0xa4] ss:$8 sps:$4 sm:$0xff]  }
 0x7e8   : > { %v2887_v38 = vrot.slane %v2882_v37, %v6606_v35  ;;  %v2900_v32 = vrot.slane %v2895_v39, %v6606_v35  ;;  %v5461_v37 = vld [vmem:[#allocation16 + $0x54] ss:$8 sps:$4 sm:$0xff]   ;;  %v5459_v39 = vld [vmem:[#allocation16 + $0x50] ss:$8 sps:$4 sm:$0xff]  }
 0x7ea   : > { %v2888_v43 = vmul.f32 %v2887_v38, %v6363_v0  ;;  %v2901_v51 = vmul.f32 %v2900_v32, %v6363_v0  ;;  %v6665_v38 = vld [vmem:[#allocation16 + $0x154] ss:$8 sps:$4 sm:$0xff]   ;;  %v5462_v32 = vld [vmem:[#allocation16 + $0x60] ss:$8 sps:$4 sm:$0xff]  }
 0x7ec   : > { %v2917_v44 = vpop.permute.xlu1 %2916  ;;  %v2847_v45 = vpop.permute.xlu0 %2846  ;;  %v2890_v55 = vrot.slane %v2888_v43, 2  ;;  %v2914_v5 = vadd.f32 %v2912_v50, %v2901_v51  ;;  %v5465_v43 = vld [vmem:[#allocation16 + $0x70] ss:$8 sps:$4 sm:$0xff]   ;;  %v5480_v51 = vld [vmem:[#allocation16 + $0xa0] ss:$8 sps:$4 sm:$0xff]  }
 0x7ed   : > { %v2922_v46 = vrot.slane %v2917_v44, %v6606_v35  ;;  %v2852_v47 = vrot.slane %v2847_v45, %v6606_v35  ;;  %v5470_v44 = vld [vmem:[#allocation16 + $0x84] ss:$8 sps:$4 sm:$0xff]  }
 0x7ee   : > { %v2892_v31 = vadd.f32 %v2890_v55, %v2879_v58  ;;  %v5494_v55 = vld [vmem:[#allocation16 + $0xc4] ss:$8 sps:$4 sm:$0xff]   ;;  %v5498_v58 = vld [vmem:[#allocation16 + $0xd0] ss:$8 sps:$4 sm:$0xff]  }
 0x7ef   : > { %v2923_v52 = vmul.f32 %v2922_v46, %v6363_v0  ;;  %v2853_v53 = vmul.f32 %v2852_v47, %v6363_v0  ;;  %v5468_v46 = vld [vmem:[#allocation16 + $0x80] ss:$8 sps:$4 sm:$0xff]   ;;  %v5476_v47 = vld [vmem:[#allocation16 + $0x94] ss:$8 sps:$4 sm:$0xff]  }
 0x7f0   : > { %v2929_v2 = vrot.slane %v2892_v31, 7  ;;  %v5504_v31 = vld [vmem:[#allocation16 + $0xe0] ss:$8 sps:$4 sm:$0xff]  }
 0x7f1   : > { %v2925_v56 = vrot.slane %v2923_v52, 2  ;;  %v2825_v57 = vpop.permute.xlu1 %2824  ;;  %v2855_v62 = vrot.slane %v2853_v53, 2  ;;  %v5488_v52 = vld [vmem:[#allocation16 + $0xb4] ss:$8 sps:$4 sm:$0xff]  }
 0x7f2   : > { %v2830_v59 = vrot.slane %v2825_v57, %v6606_v35  ;;  %v5500_v57 = vld [vmem:[#allocation16 + $0xd4] ss:$8 sps:$4 sm:$0xff]  }
 0x7f3   : > { %v2927_v63 = vadd.f32 %v2925_v56, %v2914_v5  ;;  %v5492_v56 = vld [vmem:[#allocation16 + $0xc0] ss:$8 sps:$4 sm:$0xff]   ;;  %v5506_v5 = vld [vmem:[#allocation16 + $0xe4] ss:$8 sps:$4 sm:$0xff]  }
 0x7f4   : > { %v2831_v6 = vmul.f32 %v2830_v59, %v6363_v0  ;;  %v5444_v0 = vld [vmem:[#allocation16] ss:$8 sps:$4 sm:$0xff]  }
 0x7f5   : > { %v2932_v8 = vrot.slane %v2927_v63, 6  ;;  %v5510_v63 = vld [vmem:[#allocation16 + $0xf0] ss:$8 sps:$4 sm:$0xff]  }
 0x7f6   : > { %v2844_v1 = vadd.f32 %v2842_v60, %v2831_v6  ;;  %v6694_v60 = vld [vmem:[#allocation16 + $0x164] ss:$8 sps:$4 sm:$0xff]   ;;  %v6696_v6 = vld [vmem:[#allocation16 + $0x160] ss:$8 sps:$4 sm:$0xff]  }
 0x7f8   : > { %v2857_v4 = vadd.f32 %v2855_v62, %v2844_v1  ;;  %v6700_v62 = vld [vmem:[#allocation16 + $0x174] ss:$8 sps:$4 sm:$0xff]   ;;  %v6702_v1 = vld [vmem:[#allocation16 + $0x170] ss:$8 sps:$4 sm:$0xff]  }
 0x7fa   : > { %v2935_v10 = vsel %vm2934_vm6, %v2857_v4, %v2929_v2  ;;  %v6707_v2 = vld [vmem:[#allocation16 + $0x184] ss:$8 sps:$4 sm:$0xff]   ;;  %v6709_v4 = vld [vmem:[#allocation16 + $0x180] ss:$8 sps:$4 sm:$0xff]  }
 0x7fb   : > { %v2937_v9 = vsel %vm2936_vm7, %v2935_v10, %v2932_v8  ;;  %v6713_v8 = vld [vmem:[#allocation16 + $0x194] ss:$8 sps:$4 sm:$0xff]   ;;  %v6715_v10 = vld [vmem:[#allocation16 + $0x190] ss:$8 sps:$4 sm:$0xff]  }
 0x7fc   : > { %v2940_v61 = vpack.c.bf16 %v2937_v9, %v2937_v9  ;;  %v6719_v9 = vld [vmem:[#allocation16 + $0x1a4] ss:$8 sps:$4 sm:$0xff]  }
 0x7fe   : > { %2962 = vxpose.xlu1.c.b16.start.end [1/1] (short) %v2940_v61, 128  ;;  %v6721_v61 = vld [vmem:[#allocation16 + $0x1a0] ss:$8 sps:$4 sm:$0xff]  }
 0x864   : > { %v2970_v15 = vpop.trf.xlu1 }
 0x865   : > { %4664 = vmatmul.mubr.msk.bf16.vlgmr.msra.gmra.mrb[0].mxu0 %vm2996_vm8, %v2970_v15  ;;  %4672 = vmatmul.mubr.msk.bf16.vlgmr.msra.gmra.mrb[0].mxu1 %vm2996_vm8, %v2970_v15  ;;  %v6733_v15 = vld [vmem:[#allocation16 + $0x1c0] ss:$8 sps:$4 sm:$0xff]  }
 0x866   : > { %3077 = vmatprep.mubr.bf16.mxu0 %v5947_v7  ;;  %3190 = vmatprep.mubr.bf16.mxu1 %v5947_v7 }
 0x867   : > { %3754 = vmatpush1.bf16.msra.mxu0 %v5444_v0  ;;  %4927 = vmatpush1.bf16.msra.mxu1 %v6631_v14  ;;  %v6731_v0 = vld [vmem:[#allocation16 + $0x1c4] ss:$8 sps:$4 sm:$0xff]  }
 0x868   : > { %3755 = vmatprep.subr.bf16.mxu0 %v5449_v16  ;;  %4912 = vmatprep.subr.bf16.mxu1 %v6633_v17  ;;  %v2971_v22 = vpop.trf.xlu1  ;;  %v6737_v16 = vld [vmem:[#allocation16 + $0x1d4] ss:$8 sps:$4 sm:$0xff]  }
 0x86b   : > { %3756 = vmatpush1.bf16.msra.mxu0 %v5447_v18  ;;  %4928 = vmatpush1.bf16.msra.mxu1 %v6640_v19  ;;  %v6739_v18 = vld [vmem:[#allocation16 + $0x1d0] ss:$8 sps:$4 sm:$0xff]  }
 0x86c   : > { %3757 = vmatprep.subr.bf16.mxu0 %v5452_v20  ;;  %4913 = vmatprep.subr.bf16.mxu1 %v6643_v21  ;;  %v2972_v3 = vpop.trf.xlu1  ;;  %v6743_v20 = vld [vmem:[#allocation16 + $0x1e4] ss:$8 sps:$4 sm:$0xff]  }
 0x86d   : > { %4665 = vmatmul.mubr.msk.bf16.gmra.mrb[4].mxu0 %vm2996_vm8, %v2971_v22  ;;  %4673 = vmatmul.mubr.msk.bf16.gmra.mrb[4].mxu1 %vm2996_vm8, %v2971_v22  ;;  %v6745_v22 = vld [vmem:[#allocation16 + $0x1e0] ss:$8 sps:$4 sm:$0xff]  }
 0x86e   : > { %3087 = vmatprep.mubr.bf16.mxu0 %v5947_v7  ;;  %3200 = vmatprep.mubr.bf16.mxu1 %v5947_v7 }
 0x86f   : > { %3758 = vmatpush1.bf16.msra.mxu0 %v5450_v23  ;;  %4929 = vmatpush1.bf16.msra.mxu1 %v6646_v24  ;;  %v6749_v23 = vld [vmem:[#allocation16 + $0x1f4] ss:$8 sps:$4 sm:$0xff]  }
 0x870   : > { %3759 = vmatprep.subr.bf16.mxu0 %v5455_v25  ;;  %4914 = vmatprep.subr.bf16.mxu1 %v6649_v26  ;;  %v2973_v29 = vpop.trf.xlu1  ;;  %v6751_v25 = vld [vmem:[#allocation16 + $0x1f0] ss:$8 sps:$4 sm:$0xff]  }
 0x873   : > { %3760 = vmatpush1.bf16.msra.mxu0 %v5453_v27  ;;  %4930 = vmatpush1.bf16.msra.mxu1 %v6656_v30  ;;  %v2952_v27 = vsub.s32 2, %v6600_v13 }
 0x874   : > { %3761 = vmatprep.subr.bf16.mxu0 %v5458_v28  ;;  %4915 = vmatprep.subr.bf16.mxu1 %v6659_v33  ;;  %v2974_v45 = vpop.trf.xlu1  ;;  %v2939_v28 = vld [vmem:[%s7146_s3] sm:$0xf] }
 0x875   : > { %4666 = vmatmul.mubr.msk.bf16.gmra.mrb[8].mxu0 %vm2996_vm8, %v2972_v3  ;;  %4674 = vmatmul.mubr.msk.bf16.gmra.mrb[8].mxu1 %vm2996_vm8, %v2972_v3  ;;  %v2948_v3 = vsub.s32 1, %v6600_v13 }
 0x876   : > { %3097 = vmatprep.mubr.bf16.mxu0 %v5947_v7  ;;  %3210 = vmatprep.mubr.bf16.mxu1 %v5947_v7 }
 0x877   : > { %3762 = vmatpush1.bf16.msra.mxu0 %v5456_v36  ;;  %4931 = vmatpush1.bf16.msra.mxu1 %v6662_v34  ;;  %v2956_v36 = vsub.s32 3, %v6600_v13 }
 0x878   : > { %3763 = vmatprep.subr.bf16.mxu0 %v5461_v37  ;;  %4916 = vmatprep.subr.bf16.mxu1 %v6665_v38  ;;  %v2975_v50 = vpop.trf.xlu1  ;;  %v6762_v37 = vrot.slane %v2939_v28, %v6606_v35 }
 0x87b   : > { %3764 = vmatpush1.bf16.msra.mxu0 %v5459_v39  ;;  %4932 = vmatpush1.bf16.msra.mxu1 %v6672_v40  ;;  %v6764_v39 = vrot.slane %v2939_v28, %v2952_v27 }
 0x87c   : > { %3765 = vmatprep.subr.bf16.mxu0 %v5464_v41  ;;  %v2976_v53 = vpop.trf.xlu1  ;;  %4917 = vmatprep.subr.bf16.mxu1 %v6694_v60  ;;  %v6768_v41 = vrot.slane %v2939_v28, %v2948_v3 }
 0x87d   : > { %4667 = vmatmul.mubr.msk.bf16.gmra.mrb[12].mxu0 %vm2996_vm8, %v2973_v29  ;;  %4675 = vmatmul.mubr.msk.bf16.gmra.mrb[12].mxu1 %vm2996_vm8, %v2973_v29  ;;  %v6770_v29 = vrot.slane %v2939_v28, %v2956_v36 }
 0x87e   : > { %3107 = vmatprep.mubr.bf16.mxu0 %v5947_v7  ;;  %3220 = vmatprep.mubr.bf16.mxu1 %v5947_v7 }
 0x87f   : > { %3766 = vmatpush1.bf16.msra.mxu0 %v5462_v32  ;;  %4933 = vmatpush1.bf16.msra.mxu1 %v6696_v6 }
 0x880   : > { %3767 = vmatprep.subr.bf16.mxu0 %v5467_v42  ;;  %v2977_v59 = vpop.trf.xlu1  ;;  %4918 = vmatprep.subr.bf16.mxu1 %v6700_v62 }
 0x883   : > { %3768 = vmatpush1.bf16.msra.mxu0 %v5465_v43  ;;  %4934 = vmatpush1.bf16.msra.mxu1 %v6702_v1 }
 0x884   : > { %3769 = vmatprep.subr.bf16.mxu0 %v5470_v44  ;;  %4919 = vmatprep.subr.bf16.mxu1 %v6707_v2 }
 0x885   : > { %4668 = vmatmul.mubr.msk.bf16.gmra.mrb[16].mxu0 %vm2996_vm8, %v2974_v45  ;;  %4676 = vmatmul.mubr.msk.bf16.gmra.mrb[16].mxu1 %vm2996_vm8, %v2974_v45 }
 0x886   : > { %3117 = vmatprep.mubr.bf16.mxu0 %v5947_v7  ;;  %3230 = vmatprep.mubr.bf16.mxu1 %v5947_v7 }
 0x887   : > { %3770 = vmatpush1.bf16.msra.mxu0 %v5468_v46  ;;  %4935 = vmatpush1.bf16.msra.mxu1 %v6709_v4 }
 0x888   : > { %3771 = vmatprep.subr.bf16.mxu0 %v5476_v47  ;;  %4920 = vmatprep.subr.bf16.mxu1 %v6713_v8 }
 0x88b   : > { %3772 = vmatpush1.bf16.msra.mxu0 %v5474_v48  ;;  %4936 = vmatpush1.bf16.msra.mxu1 %v6715_v10 }
 0x88c   : > { %3773 = vmatprep.subr.bf16.mxu0 %v5482_v49  ;;  %4921 = vmatprep.subr.bf16.mxu1 %v6719_v9 }
 0x88d   : > { %4669 = vmatmul.mubr.msk.bf16.gmra.mrb[20].mxu0 %vm2996_vm8, %v2975_v50  ;;  %4677 = vmatmul.mubr.msk.bf16.gmra.mrb[20].mxu1 %vm2996_vm8, %v2975_v50 }
 0x88e   : > { %3127 = vmatprep.mubr.bf16.mxu0 %v5947_v7  ;;  %3240 = vmatprep.mubr.bf16.mxu1 %v5947_v7 }
 0x88f   : > { %3774 = vmatpush1.bf16.msra.mxu0 %v5480_v51  ;;  %4937 = vmatpush1.bf16.msra.mxu1 %v6721_v61 }
 0x890   : > { %3775 = vmatprep.subr.bf16.mxu0 %v5488_v52  ;;  %4922 = vmatprep.subr.bf16.mxu1 %v6725_v11 }
 0x893   : > { %3776 = vmatpush1.bf16.msra.mxu0 %v5486_v54 }
 0x894   : > { %3777 = vmatprep.subr.bf16.mxu0 %v5494_v55 }
 0x895   : > { %4670 = vmatmul.mubr.msk.bf16.gmra.mrb[24].mxu0 %vm2996_vm8, %v2976_v53  ;;  %4678 = vmatmul.mubr.msk.bf16.gmra.mrb[24].mxu1 %vm2996_vm8, %v2976_v53 }
 0x896   : > { %3137 = vmatprep.mubr.bf16.mxu0 %v5947_v7  ;;  %3250 = vmatprep.mubr.bf16.mxu1 %v5947_v7  ;;  %v5512_v7 = vld [vmem:[#allocation16 + $0xf4] ss:$8 sps:$4 sm:$0xff]  }
 0x897   : > { %3778 = vmatpush1.bf16.msra.mxu0 %v5492_v56 }
 0x898   : > { %3779 = vmatprep.subr.bf16.mxu0 %v5500_v57 }
 0x89b   : > { %3780 = vmatpush1.bf16.msra.mxu0 %v5498_v58 }
 0x89c   : > { %3781 = vmatprep.subr.bf16.mxu0 %v5506_v5 }
 0x89d   : > { %4671 = vmatmul.mubr.msk.bf16.gmra.mrb[28].mxu0 %vm2996_vm8, %v2977_v59  ;;  %4679 = vmatmul.mubr.msk.bf16.gmra.mrb[28].mxu1 %vm2996_vm8, %v2977_v59 }
 0x89f   : > { %3782 = vmatpush1.bf16.msra.mxu0 %v5504_v31 }
 0x8a0   : > { %3783 = vmatprep.subr.bf16.mxu0 %v5512_v7 }
 0x8a3   : > { %3784 = vmatpush1.bf16.msra.mxu0 %v5510_v63 }
 0x8a4   : > { %3866 = vmatprep.subr.bf16.mxu0 %v6628_v12  ;;  %v6727_v12 = vld [vmem:[#allocation16 + $0x1b0] ss:$8 sps:$4 sm:$0xff]  }
 0x8a5   : > { %4938 = vmatpush1.bf16.msra.mxu1 %v6727_v12 }
 0x8a6   : > { %4923 = vmatprep.subr.bf16.mxu1 %v6731_v0 }
 0x8a9   : > { %4939 = vmatpush1.bf16.msra.mxu1 %v6733_v15 }
 0x8aa   : > { %4924 = vmatprep.subr.bf16.mxu1 %v6737_v16 }
 0x8ad   : > { %4940 = vmatpush1.bf16.msra.mxu1 %v6739_v18 }
 0x8ae   : > { %4925 = vmatprep.subr.bf16.mxu1 %v6743_v20 }
 0x8b1   : > { %4941 = vmatpush1.bf16.msra.mxu1 %v6745_v22 }
 0x8b2   : > { %4926 = vmatprep.subr.bf16.mxu1 %v6749_v23 }
 0x8b5   : > { %4942 = vmatpush1.bf16.msra.mxu1 %v6751_v25 }
 0x938   : > { %v3069_v32 = vpop.f32.mrb[0].mxu0  ;;  %v3182_v42 = vpop.f32.mrb[0].mxu1 }
 0x939   : > { %v3070_v43 = vadd.f32 %v3069_v32, %v6762_v37  ;;  %v3183_v44 = vadd.f32 %v3182_v42, %v6764_v39  ;;  %v3071_v45 = vpop.f32.mrb[1].mxu0  ;;  %v3184_v46 = vpop.f32.mrb[1].mxu1 }
 0x93a   : > { %v3072_v47 = vadd.f32 %v3071_v45, %v6768_v41  ;;  %v3185_v48 = vadd.f32 %v3184_v46, %v6770_v29  ;;  %v3073_v49 = vpop.f32.mrb[2].mxu0  ;;  %v3186_v50 = vpop.f32.mrb[2].mxu1 }
 0x93b   : > { %v3074_v51 = vadd.f32 %v3073_v49, %v6762_v37  ;;  %v3187_v52 = vadd.f32 %v3186_v50, %v6764_v39  ;;  %v3075_v54 = vpop.f32.mrb[3].mxu0  ;;  %v3188_v55 = vpop.f32.mrb[3].mxu1  ;;  %v3261_v57 = vmax.f32 %v3070_v43, 0.0  ;;  %v3263_v58 = vmax.f32 %v3183_v44, 0.0 }
 0x93c   : > { %v3076_v53 = vadd.f32 %v3075_v54, %v6768_v41  ;;  %v3189_v56 = vadd.f32 %v3188_v55, %v6770_v29  ;;  %v3262_v31 = vmax.f32 %v3072_v47, 0.0  ;;  %v3264_v7 = vmax.f32 %v3185_v48, 0.0 }
 0x93d   : > { %v3265_v59 = vmax.f32 %v3074_v51, 0.0  ;;  %v3267_v5 = vmax.f32 %v3187_v52, 0.0 }
 0x93e   : > { %v3266_v63 = vmax.f32 %v3076_v53, 0.0  ;;  %v3268_v27 = vmax.f32 %v3189_v56, 0.0 }
 0x93f   : > { %v3390_v28 = vpack.c.bf16 %v3265_v59, %v3261_v57  ;;  %v6780_v36 = vpack.c.bf16 %v3267_v5, %v3263_v58 }
 0x940   : > { %v3391_v32 = vpack.c.bf16 %v3266_v63, %v3262_v31  ;;  %v6782_v42 = vpack.c.bf16 %v3268_v27, %v3264_v7  ;;  %v3079_v45 = vpop.f32.mrb[4].mxu0  ;;  %v3192_v46 = vpop.f32.mrb[4].mxu1 }
 0x941   : > { %v3080_v49 = vadd.f32 %v3079_v45, %v6762_v37  ;;  %v3193_v50 = vadd.f32 %v3192_v46, %v6764_v39  ;;  %v3081_v43 = vpop.f32.mrb[5].mxu0  ;;  %v3194_v44 = vpop.f32.mrb[5].mxu1 }
 0x942   : > { %v3082_v51 = vadd.f32 %v3081_v43, %v6768_v41  ;;  %v3195_v47 = vadd.f32 %v3194_v44, %v6770_v29  ;;  %v3083_v48 = vpop.f32.mrb[6].mxu0  ;;  %v3196_v52 = vpop.f32.mrb[6].mxu1  ;;  %3785 = vmatprep.mubr.bf16.mxu0 %v3391_v32 }
 0x943   : > { %v3084_v54 = vadd.f32 %v3083_v48, %v6762_v37  ;;  %v3197_v55 = vadd.f32 %v3196_v52, %v6764_v39  ;;  %v3085_v53 = vpop.f32.mrb[7].mxu0  ;;  %v3198_v56 = vpop.f32.mrb[7].mxu1  ;;  %3786 = vmatmul.mubr.bf16.vlgmr.msra.gmra.mrb[32].mxu0 %v3390_v28  ;;  %v3269_v59 = vmax.f32 %v3080_v49, 0.0  ;;  %v3271_v5 = vmax.f32 %v3193_v50, 0.0 }
 0x944   : > { %v3086_v57 = vadd.f32 %v3085_v53, %v6768_v41  ;;  %v3199_v58 = vadd.f32 %v3198_v56, %v6770_v29  ;;  %3867 = vmatpush1.bf16.msra.mxu0 %v6631_v14  ;;  %v3270_v63 = vmax.f32 %v3082_v51, 0.0  ;;  %v3272_v27 = vmax.f32 %v3195_v47, 0.0 }
 0x945   : > { %v3273_v31 = vmax.f32 %v3084_v54, 0.0  ;;  %v3275_v7 = vmax.f32 %v3197_v55, 0.0  ;;  %3868 = vmatprep.subr.bf16.mxu0 %v6633_v17 }
 0x946   : > { %v3274_v32 = vmax.f32 %v3086_v57, 0.0  ;;  %v3276_v45 = vmax.f32 %v3199_v58, 0.0 }
 0x947   : > { %v3394_v46 = vpack.c.bf16 %v3273_v31, %v3269_v59  ;;  %v6794_v43 = vpack.c.bf16 %v3275_v7, %v3271_v5 }
 0x948   : > { %v3395_v28 = vpack.c.bf16 %v3274_v32, %v3270_v63  ;;  %v6796_v44 = vpack.c.bf16 %v3276_v45, %v3272_v27  ;;  %3869 = vmatpush1.bf16.msra.mxu0 %v6640_v19  ;;  %v3089_v48 = vpop.f32.mrb[8].mxu0  ;;  %v3202_v14 = vpop.f32.mrb[8].mxu1 }
 0x949   : > { %v3090_v49 = vadd.f32 %v3089_v48, %v6762_v37  ;;  %v3203_v50 = vadd.f32 %v3202_v14, %v6764_v39  ;;  %v3091_v52 = vpop.f32.mrb[9].mxu0  ;;  %v3204_v17 = vpop.f32.mrb[9].mxu1  ;;  %3870 = vmatprep.subr.bf16.mxu0 %v6643_v21 }
 0x94a   : > { %v3092_v51 = vadd.f32 %v3091_v52, %v6768_v41  ;;  %v3205_v47 = vadd.f32 %v3204_v17, %v6770_v29  ;;  %v3093_v54 = vpop.f32.mrb[10].mxu0  ;;  %v3206_v55 = vpop.f32.mrb[10].mxu1  ;;  %3795 = vmatprep.mubr.bf16.mxu0 %v3395_v28 }
 0x94b   : > { %v3094_v53 = vadd.f32 %v3093_v54, %v6762_v37  ;;  %v3207_v19 = vadd.f32 %v3206_v55, %v6764_v39  ;;  %v3095_v56 = vpop.f32.mrb[11].mxu0  ;;  %v3208_v57 = vpop.f32.mrb[11].mxu1  ;;  %3796 = vmatmul.mubr.bf16.gmra.mrb[36].mxu0 %v3394_v46  ;;  %v3277_v21 = vmax.f32 %v3090_v49, 0.0  ;;  %v3279_v5 = vmax.f32 %v3203_v50, 0.0 }
 0x94c   : > { %v3096_v58 = vadd.f32 %v3095_v56, %v6768_v41  ;;  %v3209_v59 = vadd.f32 %v3208_v57, %v6770_v29  ;;  %3871 = vmatpush1.bf16.msra.mxu0 %v6646_v24  ;;  %v3278_v63 = vmax.f32 %v3092_v51, 0.0  ;;  %v3280_v27 = vmax.f32 %v3205_v47, 0.0 }
 0x94d   : > { %v3281_v31 = vmax.f32 %v3094_v53, 0.0  ;;  %v3283_v7 = vmax.f32 %v3207_v19, 0.0  ;;  %3872 = vmatprep.subr.bf16.mxu0 %v6649_v26 }
 0x94e   : > { %v3282_v32 = vmax.f32 %v3096_v58, 0.0  ;;  %v3284_v45 = vmax.f32 %v3209_v59, 0.0 }
 0x94f   : > { %v3398_v28 = vpack.c.bf16 %v3281_v31, %v3277_v21  ;;  %v6810_v48 = vpack.c.bf16 %v3283_v7, %v3279_v5 }
 0x950   : > { %v3399_v46 = vpack.c.bf16 %v3282_v32, %v3278_v63  ;;  %v6812_v14 = vpack.c.bf16 %v3284_v45, %v3280_v27  ;;  %3873 = vmatpush1.bf16.msra.mxu0 %v6656_v30  ;;  %v3099_v52 = vpop.f32.mrb[12].mxu0  ;;  %v3212_v24 = vpop.f32.mrb[12].mxu1 }
 0x951   : > { %v3100_v49 = vadd.f32 %v3099_v52, %v6762_v37  ;;  %v3213_v50 = vadd.f32 %v3212_v24, %v6764_v39  ;;  %v3101_v17 = vpop.f32.mrb[13].mxu0  ;;  %v3214_v26 = vpop.f32.mrb[13].mxu1  ;;  %3874 = vmatprep.subr.bf16.mxu0 %v6659_v33 }
 0x952   : > { %v3102_v51 = vadd.f32 %v3101_v17, %v6768_v41  ;;  %v3215_v47 = vadd.f32 %v3214_v26, %v6770_v29  ;;  %v3103_v54 = vpop.f32.mrb[14].mxu0  ;;  %v3216_v55 = vpop.f32.mrb[14].mxu1  ;;  %3805 = vmatprep.mubr.bf16.mxu0 %v3399_v46 }
 0x953   : > { %v3104_v53 = vadd.f32 %v3103_v54, %v6762_v37  ;;  %v3217_v30 = vadd.f32 %v3216_v55, %v6764_v39  ;;  %v3105_v19 = vpop.f32.mrb[15].mxu0  ;;  %v3218_v56 = vpop.f32.mrb[15].mxu1  ;;  %3806 = vmatmul.mubr.bf16.gmra.mrb[40].mxu0 %v3398_v28  ;;  %v3285_v33 = vmax.f32 %v3100_v49, 0.0  ;;  %v3287_v59 = vmax.f32 %v3213_v50, 0.0 }
 0x954   : > { %v3106_v57 = vadd.f32 %v3105_v19, %v6768_v41  ;;  %v3219_v58 = vadd.f32 %v3218_v56, %v6770_v29  ;;  %3875 = vmatpush1.bf16.msra.mxu0 %v6662_v34  ;;  %v3286_v31 = vmax.f32 %v3102_v51, 0.0  ;;  %v3288_v7 = vmax.f32 %v3215_v47, 0.0 }
 0x955   : > { %v3289_v21 = vmax.f32 %v3104_v53, 0.0  ;;  %v3291_v5 = vmax.f32 %v3217_v30, 0.0  ;;  %3876 = vmatprep.subr.bf16.mxu0 %v6665_v38 }
 0x956   : > { %v3290_v63 = vmax.f32 %v3106_v57, 0.0  ;;  %v3292_v27 = vmax.f32 %v3219_v58, 0.0 }
 0x957   : > { %v3402_v32 = vpack.c.bf16 %v3289_v21, %v3285_v33  ;;  %v6826_v45 = vpack.c.bf16 %v3291_v5, %v3287_v59 }
 0x958   : > { %v3403_v28 = vpack.c.bf16 %v3290_v63, %v3286_v31  ;;  %v6828_v46 = vpack.c.bf16 %v3292_v27, %v3288_v7  ;;  %3877 = vmatpush1.bf16.msra.mxu0 %v6672_v40  ;;  %v3109_v52 = vpop.f32.mrb[16].mxu0  ;;  %v3222_v34 = vpop.f32.mrb[16].mxu1 }
 0x959   : > { %v3110_v24 = vadd.f32 %v3109_v52, %v6762_v37  ;;  %v3223_v49 = vadd.f32 %v3222_v34, %v6764_v39  ;;  %v3111_v50 = vpop.f32.mrb[17].mxu0  ;;  %v3224_v38 = vpop.f32.mrb[17].mxu1  ;;  %3878 = vmatprep.subr.bf16.mxu0 %v6694_v60 }
 0x95a   : > { %v3112_v17 = vadd.f32 %v3111_v50, %v6768_v41  ;;  %v3225_v26 = vadd.f32 %v3224_v38, %v6770_v29  ;;  %v3113_v51 = vpop.f32.mrb[18].mxu0  ;;  %v3226_v47 = vpop.f32.mrb[18].mxu1  ;;  %3815 = vmatprep.mubr.bf16.mxu0 %v3403_v28 }
 0x95b   : > { %v3114_v54 = vadd.f32 %v3113_v51, %v6762_v37  ;;  %v3227_v40 = vadd.f32 %v3226_v47, %v6764_v39  ;;  %v3115_v55 = vpop.f32.mrb[19].mxu0  ;;  %v3228_v53 = vpop.f32.mrb[19].mxu1  ;;  %3816 = vmatmul.mubr.bf16.gmra.mrb[44].mxu0 %v3402_v32  ;;  %v3293_v60 = vmax.f32 %v3110_v24, 0.0  ;;  %v3295_v56 = vmax.f32 %v3223_v49, 0.0 }
 0x95c   : > { %v3116_v30 = vadd.f32 %v3115_v55, %v6768_v41  ;;  %v3229_v19 = vadd.f32 %v3228_v53, %v6770_v29  ;;  %3879 = vmatpush1.bf16.msra.mxu0 %v6696_v6  ;;  %v3294_v33 = vmax.f32 %v3112_v17, 0.0  ;;  %v3296_v59 = vmax.f32 %v3225_v26, 0.0 }
 0x95d   : > { %v3297_v57 = vmax.f32 %v3114_v54, 0.0  ;;  %v3299_v58 = vmax.f32 %v3227_v40, 0.0  ;;  %3880 = vmatprep.subr.bf16.mxu0 %v6700_v62 }
 0x95e   : > { %v3298_v21 = vmax.f32 %v3116_v30, 0.0  ;;  %v3300_v5 = vmax.f32 %v3229_v19, 0.0 }
 0x95f   : > { %v3406_v31 = vpack.c.bf16 %v3297_v57, %v3293_v60  ;;  %v3408_v7 = vpack.c.bf16 %v3299_v58, %v3295_v56 }
 0x960   : > { %v3407_v63 = vpack.c.bf16 %v3298_v21, %v3294_v33  ;;  %v3409_v27 = vpack.c.bf16 %v3300_v5, %v3296_v59  ;;  %3881 = vmatpush1.bf16.msra.mxu0 %v6702_v1  ;;  %v3119_v32 = vpop.f32.mrb[20].mxu0  ;;  %v3232_v28 = vpop.f32.mrb[20].mxu1 }
 0x961   : > { %v3120_v6 = vadd.f32 %v3119_v32, %v6762_v37  ;;  %v3233_v52 = vadd.f32 %v3232_v28, %v6764_v39  ;;  %v3121_v34 = vpop.f32.mrb[21].mxu0  ;;  %v3234_v24 = vpop.f32.mrb[21].mxu1  ;;  %3882 = vmatprep.subr.bf16.mxu0 %v6707_v2 }
 0x962   : > { %v3122_v62 = vadd.f32 %v3121_v34, %v6768_v41  ;;  %v3235_v49 = vadd.f32 %v3234_v24, %v6770_v29  ;;  %v3123_v50 = vpop.f32.mrb[22].mxu0  ;;  %v3236_v38 = vpop.f32.mrb[22].mxu1  ;;  %3825 = vmatprep.mubr.bf16.mxu0 %v3407_v63  ;;  %3938 = vmatprep.mubr.bf16.mxu1 %v3409_v27 }
 0x963   : > { %v3124_v1 = vadd.f32 %v3123_v50, %v6762_v37  ;;  %v3237_v17 = vadd.f32 %v3236_v38, %v6764_v39  ;;  %v3125_v26 = vpop.f32.mrb[23].mxu0  ;;  %v3238_v51 = vpop.f32.mrb[23].mxu1  ;;  %3826 = vmatmul.mubr.bf16.gmra.mrb[48].mxu0 %v3406_v31  ;;  %3939 = vmatmul.mubr.bf16.vlgmr.msra.gmra.mrb[32].mxu1 %v3408_v7  ;;  %v3301_v54 = vmax.f32 %v3120_v6, 0.0  ;;  %v3303_v40 = vmax.f32 %v3233_v52, 0.0 }
 0x964   : > { %v3126_v47 = vadd.f32 %v3125_v26, %v6768_v41  ;;  %v3239_v2 = vadd.f32 %v3238_v51, %v6770_v29  ;;  %3883 = vmatpush1.bf16.msra.mxu0 %v6709_v4  ;;  %v3302_v30 = vmax.f32 %v3122_v62, 0.0  ;;  %v3304_v19 = vmax.f32 %v3235_v49, 0.0 }
 0x965   : > { %v3305_v55 = vmax.f32 %v3124_v1, 0.0  ;;  %v3307_v53 = vmax.f32 %v3237_v17, 0.0  ;;  %3884 = vmatprep.subr.bf16.mxu0 %v6713_v8 }
 0x966   : > { %v3306_v60 = vmax.f32 %v3126_v47, 0.0  ;;  %v3308_v56 = vmax.f32 %v3239_v2, 0.0 }
 0x967   : > { %v3410_v57 = vpack.c.bf16 %v3305_v55, %v3301_v54  ;;  %v3412_v58 = vpack.c.bf16 %v3307_v53, %v3303_v40 }
 0x968   : > { %v3411_v33 = vpack.c.bf16 %v3306_v60, %v3302_v30  ;;  %v3413_v59 = vpack.c.bf16 %v3308_v56, %v3304_v19  ;;  %3885 = vmatpush1.bf16.msra.mxu0 %v6715_v10  ;;  %v3129_v21 = vpop.f32.mrb[24].mxu0  ;;  %v3242_v5 = vpop.f32.mrb[24].mxu1 }
 0x969   : > { %v3130_v4 = vadd.f32 %v3129_v21, %v6762_v37  ;;  %v3243_v31 = vadd.f32 %v3242_v5, %v6764_v39  ;;  %v3131_v7 = vpop.f32.mrb[25].mxu0  ;;  %v3244_v63 = vpop.f32.mrb[25].mxu1  ;;  %3886 = vmatprep.subr.bf16.mxu0 %v6719_v9 }
 0x96a   : > { %v3132_v8 = vadd.f32 %v3131_v7, %v6768_v41  ;;  %v3245_v27 = vadd.f32 %v3244_v63, %v6770_v29  ;;  %v3133_v32 = vpop.f32.mrb[26].mxu0  ;;  %v3246_v28 = vpop.f32.mrb[26].mxu1  ;;  %3835 = vmatprep.mubr.bf16.mxu0 %v3411_v33  ;;  %3948 = vmatprep.mubr.bf16.mxu1 %v3413_v59 }
 0x96b   : > { %v3134_v10 = vadd.f32 %v3133_v32, %v6762_v37  ;;  %v3247_v6 = vadd.f32 %v3246_v28, %v6764_v39  ;;  %v3135_v52 = vpop.f32.mrb[27].mxu0  ;;  %v3248_v34 = vpop.f32.mrb[27].mxu1  ;;  %3836 = vmatmul.mubr.bf16.gmra.mrb[52].mxu0 %v3410_v57  ;;  %3949 = vmatmul.mubr.bf16.gmra.mrb[36].mxu1 %v3412_v58  ;;  %v3309_v62 = vmax.f32 %v3130_v4, 0.0  ;;  %v3311_v49 = vmax.f32 %v3243_v31, 0.0 }
 0x96c   : > { %v3136_v24 = vadd.f32 %v3135_v52, %v6768_v41  ;;  %v3249_v9 = vadd.f32 %v3248_v34, %v6770_v29  ;;  %3887 = vmatpush1.bf16.msra.mxu0 %v6721_v61  ;;  %v3310_v1 = vmax.f32 %v3132_v8, 0.0  ;;  %v3312_v17 = vmax.f32 %v3245_v27, 0.0 }
 0x96d   : > { %v3313_v50 = vmax.f32 %v3134_v10, 0.0  ;;  %v3315_v38 = vmax.f32 %v3247_v6, 0.0  ;;  %3888 = vmatprep.subr.bf16.mxu0 %v6725_v11 }
 0x96e   : > { %v3314_v26 = vmax.f32 %v3136_v24, 0.0  ;;  %v3316_v51 = vmax.f32 %v3249_v9, 0.0 }
 0x96f   : > { %v3414_v47 = vpack.c.bf16 %v3313_v50, %v3309_v62  ;;  %v3416_v2 = vpack.c.bf16 %v3315_v38, %v3311_v49 }
 0x970   : > { %v3415_v54 = vpack.c.bf16 %v3314_v26, %v3310_v1  ;;  %v3417_v40 = vpack.c.bf16 %v3316_v51, %v3312_v17  ;;  %3889 = vmatpush1.bf16.msra.mxu0 %v6727_v12  ;;  %v3139_v55 = vpop.f32.mrb[28].mxu0  ;;  %v3252_v53 = vpop.f32.mrb[28].mxu1 }
 0x971   : > { %v3140_v61 = vadd.f32 %v3139_v55, %v6762_v37  ;;  %v3253_v30 = vadd.f32 %v3252_v53, %v6764_v39  ;;  %v3141_v19 = vpop.f32.mrb[29].mxu0  ;;  %v3254_v60 = vpop.f32.mrb[29].mxu1  ;;  %3890 = vmatprep.subr.bf16.mxu0 %v6731_v0 }
 0x972   : > { %v3142_v11 = vadd.f32 %v3141_v19, %v6768_v41  ;;  %v3255_v56 = vadd.f32 %v3254_v60, %v6770_v29  ;;  %v3143_v57 = vpop.f32.mrb[30].mxu0  ;;  %v3256_v58 = vpop.f32.mrb[30].mxu1  ;;  %3845 = vmatprep.mubr.bf16.mxu0 %v3415_v54  ;;  %3958 = vmatprep.mubr.bf16.mxu1 %v3417_v40 }
 0x973   : > { %v3144_v12 = vadd.f32 %v3143_v57, %v6762_v37  ;;  %v3257_v33 = vadd.f32 %v3256_v58, %v6764_v39  ;;  %v3145_v59 = vpop.f32.mrb[31].mxu0  ;;  %v3258_v21 = vpop.f32.mrb[31].mxu1  ;;  %3846 = vmatmul.mubr.bf16.gmra.mrb[56].mxu0 %v3414_v47  ;;  %3959 = vmatmul.mubr.bf16.gmra.mrb[40].mxu1 %v3416_v2  ;;  %v3317_v4 = vmax.f32 %v3140_v61, 0.0  ;;  %v3319_v31 = vmax.f32 %v3253_v30, 0.0 }
 0x974   : > { %v3146_v5 = vadd.f32 %v3145_v59, %v6768_v41  ;;  %v3259_v0 = vadd.f32 %v3258_v21, %v6770_v29  ;;  %3891 = vmatpush1.bf16.msra.mxu0 %v6733_v15  ;;  %v3318_v8 = vmax.f32 %v3142_v11, 0.0  ;;  %v3320_v37 = vmax.f32 %v3255_v56, 0.0  ;;  %v5540_v15 = vld [vmem:[%s7147_s26 + $0x40] sm:$0xff]   ;;  %v5547_v41 = vld [vmem:[%s7147_s26 + $0x18] sm:$0xff]  }
 0x975   : > { %v3321_v7 = vmax.f32 %v3144_v12, 0.0  ;;  %v3323_v63 = vmax.f32 %v3257_v33, 0.0  ;;  %3892 = vmatprep.subr.bf16.mxu0 %v6737_v16  ;;  %v5541_v16 = vld [vmem:[%s7147_s26] sm:$0xff]   ;;  %4803 = vmatprep.subr.bf16.mxu1 %v5540_v15 }
 0x976   : > { %v3322_v27 = vmax.f32 %v3146_v5, 0.0  ;;  %v3324_v39 = vmax.f32 %v3259_v0, 0.0  ;;  %4804 = vmatpush3.bf16.msra.mxu1 %v5541_v16  ;;  %v5548_v29 = vld [vmem:[%s7147_s26 + $0x60] sm:$0xff]  }
 0x977   : > { %v3418_v32 = vpack.c.bf16 %v3321_v7, %v3317_v4  ;;  %v3420_v28 = vpack.c.bf16 %v3323_v63, %v3319_v31 }
 0x978   : > { %v3419_v10 = vpack.c.bf16 %v3322_v27, %v3318_v8  ;;  %v3421_v6 = vpack.c.bf16 %v3324_v39, %v3320_v37  ;;  %3893 = vmatpush1.bf16.msra.mxu0 %v6739_v18  ;;  %v5542_v18 = vld [vmem:[%s7147_s26 + $0x48] sm:$0xff]  }
 0x979   : > { %3894 = vmatprep.subr.bf16.mxu0 %v6743_v20  ;;  %v5543_v20 = vld [vmem:[%s7147_s26 + $0x8] sm:$0xff]   ;;  %4805 = vmatprep.subr.bf16.mxu1 %v5542_v18 }
 0x97a   : > { %3855 = vmatprep.mubr.bf16.mxu0 %v3419_v10  ;;  %3968 = vmatprep.mubr.bf16.mxu1 %v3421_v6 }
 0x97b   : > { %3856 = vmatmul.mubr.bf16.gmra.mrb[60].mxu0 %v3418_v32  ;;  %3969 = vmatmul.mubr.bf16.gmra.mrb[44].mxu1 %v3420_v28 }
 0x97c   : > { %3895 = vmatpush1.bf16.msra.mxu0 %v6745_v22  ;;  %3898 = vmatprep.mubr.bf16.mxu0 %v6782_v42  ;;  %v5544_v22 = vld [vmem:[%s7147_s26 + $0x50] sm:$0xff]   ;;  %v5550_v42 = vld [vmem:[%s7147_s26 + $0x68] sm:$0xff]  }
 0x97d   : > { %3896 = vmatprep.subr.bf16.mxu0 %v6749_v23  ;;  %4806 = vmatpush3.bf16.msra.mxu1 %v5543_v20  ;;  %v5545_v23 = vld [vmem:[%s7147_s26 + $0x10] sm:$0xff]  }
 0x97e   : > { %4807 = vmatprep.subr.bf16.mxu1 %v5544_v22 }
 0x980   : > { %3897 = vmatpush1.bf16.msra.mxu0 %v6751_v25  ;;  %v5546_v25 = vld [vmem:[%s7147_s26 + $0x58] sm:$0xff]  }
 0x981   : > { %4808 = vmatpush3.bf16.msra.mxu1 %v5545_v23 }
 0x982   : > { %4809 = vmatprep.subr.bf16.mxu1 %v5546_v25 }
 0x983   : > { %3899 = vmatmul.mubr.bf16.vlgmr.msra.gmra.mrb[32].mxu0 %v6780_v36  ;;  %v5549_v36 = vld [vmem:[%s7147_s26 + $0x20] sm:$0xff]  }
 0x984   : > { %3908 = vmatprep.mubr.bf16.mxu0 %v6796_v44  ;;  %v5552_v44 = vld [vmem:[%s7147_s26 + $0x70] sm:$0xff]  }
 0x985   : > { %4810 = vmatpush3.bf16.msra.mxu1 %v5547_v41 }
 0x986   : > { %4811 = vmatprep.subr.bf16.mxu1 %v5548_v29 }
 0x989   : > { %4812 = vmatpush3.bf16.msra.mxu1 %v5549_v36 }
 0x98a   : > { %4813 = vmatprep.subr.bf16.mxu1 %v5550_v42 }
 0x98b   : > { %3909 = vmatmul.mubr.bf16.gmra.mrb[36].mxu0 %v6794_v43  ;;  %v5551_v43 = vld [vmem:[%s7147_s26 + $0x28] sm:$0xff]  }
 0x98c   : > { %3918 = vmatprep.mubr.bf16.mxu0 %v6812_v14  ;;  %v5554_v14 = vld [vmem:[%s7147_s26 + $0x78] sm:$0xff]  }
 0x98d   : > { %4814 = vmatpush3.bf16.msra.mxu1 %v5551_v43 }
 0x98e   : > { %4815 = vmatprep.subr.bf16.mxu1 %v5552_v44 }
 0x993   : > { %3919 = vmatmul.mubr.bf16.gmra.mrb[40].mxu0 %v6810_v48  ;;  %v5553_v48 = vld [vmem:[%s7147_s26 + $0x30] sm:$0xff]  }
 0x994   : > { %3928 = vmatprep.mubr.bf16.mxu0 %v6828_v46  ;;  %4816 = vmatpush3.bf16.msra.mxu1 %v5553_v48  ;;  %v3389_v46 = vld [vmem:[#allocation18] sm:$0x3] }
 0x995   : > { %4817 = vmatprep.subr.bf16.mxu1 %v5554_v14  ;;  %v6940_v52 = vrot.slane %v3389_v46, %v6606_v35  ;;  %v6944_v34 = vrot.slane %v3389_v46, %v2948_v3 }
 0x99b   : > { %3929 = vmatmul.mubr.bf16.gmra.mrb[44].mxu0 %v6826_v45  ;;  %v5555_v45 = vld [vmem:[%s7147_s26 + $0x38] sm:$0xff]  }
 0x99c   : > { %4818 = vmatpush3.bf16.msra.mxu1 %v5555_v45 }
 0xa36   : > { %v3827_v24 = vpop.f32.mrb[48].mxu0  ;;  %v3940_v9 = vpop.f32.mrb[32].mxu1 }
 0xa37   : > { %v3828_v62 = vadd.f32 %v3827_v24, %v6940_v52  ;;  %v3829_v49 = vpop.f32.mrb[49].mxu0  ;;  %v3942_v50 = vpop.f32.mrb[33].mxu1 }
 0xa38   : > { %v3830_v38 = vadd.f32 %v3829_v49, %v6944_v34  ;;  %v3831_v1 = vpop.f32.mrb[50].mxu0  ;;  %v3944_v17 = vpop.f32.mrb[34].mxu1 }
 0xa39   : > { %v3941_v26 = vadd.f32 %v3940_v9, %v3828_v62  ;;  %v3832_v51 = vadd.f32 %v3831_v1, %v6940_v52  ;;  %v3833_v47 = vpop.f32.mrb[51].mxu0  ;;  %v3946_v35 = vpop.f32.mrb[35].mxu1 }
 0xa3a   : > { %v3943_v2 = vadd.f32 %v3942_v50, %v3830_v38  ;;  %v3834_v13 = vadd.f32 %v3833_v47, %v6944_v34 }
 0xa3b   : > { %v3945_v3 = vadd.f32 %v3944_v17, %v3832_v51  ;;  %v3995_v40 = vmax.f32 %v3941_v26, 0.0 }
 0xa3c   : > { %v3947_v54 = vadd.f32 %v3946_v35, %v3834_v13  ;;  %v3996_v53 = vmax.f32 %v3943_v2, 0.0 }
 0xa3d   : > { %v3997_v55 = vmax.f32 %v3945_v3, 0.0 }
 0xa3e   : > { %v3998_v61 = vmax.f32 %v3947_v54, 0.0  ;;  %v3837_v30 = vpop.f32.mrb[52].mxu0  ;;  %v3950_v19 = vpop.f32.mrb[36].mxu1 }
 0xa3f   : > { %v6950_v60 = vpack.c.bf16 %v3997_v55, %v3995_v40  ;;  %v3838_v11 = vadd.f32 %v3837_v30, %v6940_v52  ;;  %v3839_v56 = vpop.f32.mrb[53].mxu0  ;;  %v3952_v57 = vpop.f32.mrb[37].mxu1 }
 0xa40   : > { %v6953_v58 = vpack.c.bf16 %v3998_v61, %v3996_v53  ;;  %v3840_v12 = vadd.f32 %v3839_v56, %v6944_v34  ;;  %v3841_v33 = vpop.f32.mrb[54].mxu0  ;;  %v3954_v59 = vpop.f32.mrb[38].mxu1 }
 0xa41   : > { %v3951_v21 = vadd.f32 %v3950_v19, %v3838_v11  ;;  %v3842_v5 = vadd.f32 %v3841_v33, %v6940_v52  ;;  %v3843_v0 = vpop.f32.mrb[55].mxu0  ;;  %v3956_v4 = vpop.f32.mrb[39].mxu1 }
 0xa42   : > { %v3953_v31 = vadd.f32 %v3952_v57, %v3840_v12  ;;  %v3844_v7 = vadd.f32 %v3843_v0, %v6944_v34 }
 0xa43   : > { %v3955_v63 = vadd.f32 %v3954_v59, %v3842_v5  ;;  %v3999_v37 = vmax.f32 %v3951_v21, 0.0 }
 0xa44   : > { %v3957_v8 = vadd.f32 %v3956_v4, %v3844_v7  ;;  %v4000_v39 = vmax.f32 %v3953_v31, 0.0 }
 0xa45   : > { %v4001_v27 = vmax.f32 %v3955_v63, 0.0 }
 0xa46   : > { %v4002_v32 = vmax.f32 %v3957_v8, 0.0  ;;  %v3847_v28 = vpop.f32.mrb[56].mxu0  ;;  %v3960_v10 = vpop.f32.mrb[40].mxu1 }
 0xa47   : > { %v6958_v6 = vpack.c.bf16 %v4001_v27, %v3999_v37  ;;  %v3848_v15 = vadd.f32 %v3847_v28, %v6940_v52  ;;  %v3849_v16 = vpop.f32.mrb[57].mxu0  ;;  %v3962_v18 = vpop.f32.mrb[41].mxu1 }
 0xa48   : > { %v6961_v20 = vpack.c.bf16 %v4002_v32, %v4000_v39  ;;  %v3850_v22 = vadd.f32 %v3849_v16, %v6944_v34  ;;  %v3851_v23 = vpop.f32.mrb[58].mxu0  ;;  %v3964_v25 = vpop.f32.mrb[42].mxu1 }
 0xa49   : > { %v3961_v41 = vadd.f32 %v3960_v10, %v3848_v15  ;;  %v3852_v29 = vadd.f32 %v3851_v23, %v6940_v52  ;;  %v3853_v36 = vpop.f32.mrb[59].mxu0  ;;  %v3966_v42 = vpop.f32.mrb[43].mxu1 }
 0xa4a   : > { %v3963_v43 = vadd.f32 %v3962_v18, %v3850_v22  ;;  %v3854_v44 = vadd.f32 %v3853_v36, %v6944_v34 }
 0xa4b   : > { %v3965_v48 = vadd.f32 %v3964_v25, %v3852_v29  ;;  %v4003_v45 = vmax.f32 %v3961_v41, 0.0 }
 0xa4c   : > { %v3967_v14 = vadd.f32 %v3966_v42, %v3854_v44  ;;  %v4004_v24 = vmax.f32 %v3963_v43, 0.0 }
 0xa4d   : > { %v4005_v46 = vmax.f32 %v3965_v48, 0.0 }
 0xa4e   : > { %v4006_v9 = vmax.f32 %v3967_v14, 0.0  ;;  %v3857_v62 = vpop.f32.mrb[60].mxu0  ;;  %v3970_v49 = vpop.f32.mrb[44].mxu1 }
 0xa4f   : > { %v6966_v50 = vpack.c.bf16 %v4005_v46, %v4003_v45  ;;  %v3858_v38 = vadd.f32 %v3857_v62, %v6940_v52  ;;  %v3859_v1 = vpop.f32.mrb[61].mxu0  ;;  %v3972_v17 = vpop.f32.mrb[45].mxu1 }
 0xa50   : > { %v6969_v26 = vpack.c.bf16 %v4006_v9, %v4004_v24  ;;  %v3860_v51 = vadd.f32 %v3859_v1, %v6944_v34  ;;  %v3861_v47 = vpop.f32.mrb[62].mxu0  ;;  %v3974_v35 = vpop.f32.mrb[46].mxu1 }
 0xa51   : > { %v3971_v2 = vadd.f32 %v3970_v49, %v3858_v38  ;;  %v3862_v13 = vadd.f32 %v3861_v47, %v6940_v52  ;;  %v3863_v3 = vpop.f32.mrb[63].mxu0  ;;  %v3976_v54 = vpop.f32.mrb[47].mxu1 }
 0xa52   : > { %v3973_v40 = vadd.f32 %v3972_v17, %v3860_v51  ;;  %v3864_v55 = vadd.f32 %v3863_v3, %v6944_v34 }
 0xa53   : > { %v3975_v53 = vadd.f32 %v3974_v35, %v3862_v13  ;;  %v4007_v30 = vmax.f32 %v3971_v2, 0.0 }
 0xa54   : > { %v3977_v61 = vadd.f32 %v3976_v54, %v3864_v55  ;;  %v4008_v11 = vmax.f32 %v3973_v40, 0.0 }
 0xa55   : > { %v4009_v19 = vmax.f32 %v3975_v53, 0.0 }
 0xa56   : > { %v4010_v56 = vmax.f32 %v3977_v61, 0.0  ;;  %v3900_v57 = vpop.f32.mrb[32].mxu0 }
 0xa57   : > { %v6974_v12 = vpack.c.bf16 %v4009_v19, %v4007_v30  ;;  %v4943_v33 = vadd.f32 %v3900_v57, %v6940_v52  ;;  %v3902_v59 = vpop.f32.mrb[33].mxu0 }
 0xa58   : > { %v6977_v21 = vpack.c.bf16 %v4010_v56, %v4008_v11  ;;  %v4944_v5 = vadd.f32 %v3902_v59, %v6944_v34  ;;  %v3904_v0 = vpop.f32.mrb[34].mxu0 }
 0xa59   : > { %v4945_v4 = vadd.f32 %v3904_v0, %v6940_v52  ;;  %v3906_v31 = vpop.f32.mrb[35].mxu0  ;;  %v3979_v63 = vmax.f32 %v4943_v33, 0.0 }
 0xa5a   : > { %v4946_v7 = vadd.f32 %v3906_v31, %v6944_v34  ;;  %v3980_v37 = vmax.f32 %v4944_v5, 0.0 }
 0xa5b   : > { %v3981_v8 = vmax.f32 %v4945_v4, 0.0 }
 0xa5c   : > { %v3982_v27 = vmax.f32 %v4946_v7, 0.0 }
 0xa5d   : > { %v4043_v39 = vpack.c.bf16 %v3981_v8, %v3979_v63 }
 0xa5e   : > { %v4044_v32 = vpack.c.bf16 %v3982_v27, %v3980_v37  ;;  %v3910_v28 = vpop.f32.mrb[36].mxu0 }
 0xa5f   : > { %v4947_v10 = vadd.f32 %v3910_v28, %v6940_v52  ;;  %v3912_v15 = vpop.f32.mrb[37].mxu0 }
 0xa60   : > { %v4948_v16 = vadd.f32 %v3912_v15, %v6944_v34  ;;  %v3914_v18 = vpop.f32.mrb[38].mxu0  ;;  %4187 = vmatprep.mubr.bf16.mxu1 %v4044_v32 }
 0xa61   : > { %v4949_v22 = vadd.f32 %v3914_v18, %v6940_v52  ;;  %v3916_v23 = vpop.f32.mrb[39].mxu0  ;;  %4188 = vmatmul.mubr.bf16.vlgmr.msra.gmra.mrb[48].mxu1 %v4043_v39  ;;  %v3983_v41 = vmax.f32 %v4947_v10, 0.0 }
 0xa62   : > { %v4950_v25 = vadd.f32 %v3916_v23, %v6944_v34  ;;  %v3984_v36 = vmax.f32 %v4948_v16, 0.0 }
 0xa63   : > { %v3985_v29 = vmax.f32 %v4949_v22, 0.0 }
 0xa64   : > { %v3986_v42 = vmax.f32 %v4950_v25, 0.0 }
 0xa65   : > { %v4045_v43 = vpack.c.bf16 %v3985_v29, %v3983_v41 }
 0xa66   : > { %v4046_v44 = vpack.c.bf16 %v3986_v42, %v3984_v36  ;;  %v3920_v48 = vpop.f32.mrb[40].mxu0 }
 0xa67   : > { %v4951_v14 = vadd.f32 %v3920_v48, %v6940_v52  ;;  %v3922_v45 = vpop.f32.mrb[41].mxu0 }
 0xa68   : > { %v4952_v46 = vadd.f32 %v3922_v45, %v6944_v34  ;;  %v3924_v24 = vpop.f32.mrb[42].mxu0  ;;  %4195 = vmatprep.mubr.bf16.mxu1 %v4046_v44 }
 0xa69   : > { %v4953_v9 = vadd.f32 %v3924_v24, %v6940_v52  ;;  %v3926_v62 = vpop.f32.mrb[43].mxu0  ;;  %4196 = vmatmul.mubr.bf16.gmra.mrb[52].mxu1 %v4045_v43  ;;  %v3987_v38 = vmax.f32 %v4951_v14, 0.0 }
 0xa6a   : > { %v4954_v49 = vadd.f32 %v3926_v62, %v6944_v34  ;;  %v3988_v17 = vmax.f32 %v4952_v46, 0.0 }
 0xa6b   : > { %v3989_v1 = vmax.f32 %v4953_v9, 0.0 }
 0xa6c   : > { %v3990_v51 = vmax.f32 %v4954_v49, 0.0 }
 0xa6d   : > { %v4047_v47 = vpack.c.bf16 %v3989_v1, %v3987_v38 }
 0xa6e   : > { %v4048_v35 = vpack.c.bf16 %v3990_v51, %v3988_v17  ;;  %v3930_v2 = vpop.f32.mrb[44].mxu0 }
 0xa6f   : > { %v4955_v13 = vadd.f32 %v3930_v2, %v6940_v52  ;;  %v3932_v3 = vpop.f32.mrb[45].mxu0 }
 0xa70   : > { %v4956_v54 = vadd.f32 %v3932_v3, %v6944_v34  ;;  %v3934_v40 = vpop.f32.mrb[46].mxu0  ;;  %4203 = vmatprep.mubr.bf16.mxu1 %v4048_v35 }
 0xa71   : > { %v4957_v55 = vadd.f32 %v3934_v40, %v6940_v52  ;;  %v3936_v53 = vpop.f32.mrb[47].mxu0  ;;  %4204 = vmatmul.mubr.bf16.gmra.mrb[56].mxu1 %v4047_v47  ;;  %v3991_v30 = vmax.f32 %v4955_v13, 0.0  ;;  %v5956_v52 = vmov -inf  }
 0xa72   : > { %v4958_v61 = vadd.f32 %v3936_v53, %v6944_v34  ;;  %v3992_v11 = vmax.f32 %v4956_v54, 0.0  ;;  %4277 = vst [vmem:[%s6367_s17] sm:$0x1] %v5956_v52 }
 0xa73   : > { %v3993_v19 = vmax.f32 %v4957_v55, 0.0 }
 0xa74   : > { %v3994_v56 = vmax.f32 %v4958_v61, 0.0 }
 0xa75   : > { %v4049_v57 = vpack.c.bf16 %v3993_v19, %v3991_v30 }
 0xa76   : > { %v4050_v33 = vpack.c.bf16 %v3994_v56, %v3992_v11 }
 0xa78   : > { %4211 = vmatprep.mubr.bf16.mxu1 %v4050_v33 }
 0xa79   : > { %4212 = vmatmul.mubr.bf16.gmra.mrb[60].mxu1 %v4049_v57 }
 0xa7a   : > { %4219 = vmatprep.mubr.bf16.mxu1 %v6953_v58 }
 0xa81   : > { %4220 = vmatmul.mubr.bf16.gmra.mrb[64].mxu1 %v6950_v60 }
 0xa82   : > { %4227 = vmatprep.mubr.bf16.mxu1 %v6961_v20 }
 0xa89   : > { %4228 = vmatmul.mubr.bf16.gmra.mrb[68].mxu1 %v6958_v6 }
 0xa8a   : > { %4235 = vmatprep.mubr.bf16.mxu1 %v6969_v26 }
 0xa91   : > { %4236 = vmatmul.mubr.bf16.gmra.mrb[72].mxu1 %v6966_v50 }
 0xa92   : > { %4243 = vmatprep.mubr.bf16.mxu1 %v6977_v21 }
 0xa99   : > { %4244 = vmatmul.mubr.bf16.gmra.mrb[76].mxu1 %v6974_v12 }
 0xb34   : > { %v4819_v34 = vpop.f32.mrb[48].mxu1 }
 0xb35   : > { %v4820_v59 = vpop.f32.mrb[49].mxu1 }
 0xb36   : > { %v4821_v5 = vadd.f32 %v4820_v59, %v4819_v34  ;;  %v4822_v58 = vpop.f32.mrb[50].mxu1 }
 0xb37   : > { %v4823_v0 = vpop.f32.mrb[51].mxu1 }
 0xb38   : > { %v4824_v60 = vadd.f32 %v4823_v0, %v4822_v58  ;;  %v4278_v0 = vld [vmem:[%s6367_s17] sm:$0x1] }
 0xb3c   : > { %v4825_v4 = vpop.f32.mrb[52].mxu1 }
 0xb3d   : > { %v4826_v20 = vpop.f32.mrb[53].mxu1 }
 0xb3e   : > { %v4827_v31 = vadd.f32 %v4826_v20, %v4825_v4  ;;  %v4828_v6 = vpop.f32.mrb[54].mxu1  ;;  %v4285_v20 = vld [vmem:[%s7148_s10] sm:$0x1] }
 0xb3f   : > { %v4829_v7 = vpop.f32.mrb[55].mxu1 }
 0xb40   : > { %v4830_v26 = vadd.f32 %v4829_v7, %v4828_v6 }
 0xb44   : > { %v4831_v63 = vpop.f32.mrb[56].mxu1 }
 0xb45   : > { %v4832_v50 = vpop.f32.mrb[57].mxu1 }
 0xb46   : > { %v4833_v8 = vadd.f32 %v4832_v50, %v4831_v63  ;;  %v4834_v21 = vpop.f32.mrb[58].mxu1 }
 0xb47   : > { %v4835_v37 = vpop.f32.mrb[59].mxu1 }
 0xb48   : > { %v4252_v12 = vmax.f32 %v4821_v5, %v4833_v8  ;;  %v4836_v27 = vadd.f32 %v4835_v37, %v4834_v21 }
 0xb4a   : > { %v4253_v39 = vmax.f32 %v4824_v60, %v4836_v27 }
 0xb4c   : > { %v4837_v32 = vpop.f32.mrb[60].mxu1 }
 0xb4d   : > { %v4838_v28 = vpop.f32.mrb[61].mxu1 }
 0xb4e   : > { %v4839_v10 = vadd.f32 %v4838_v28, %v4837_v32  ;;  %v4840_v15 = vpop.f32.mrb[62].mxu1 }
 0xb4f   : > { %v4841_v16 = vpop.f32.mrb[63].mxu1 }
 0xb50   : > { %v4254_v18 = vmax.f32 %v4827_v31, %v4839_v10  ;;  %v4842_v22 = vadd.f32 %v4841_v16, %v4840_v15 }
 0xb52   : > { %v4255_v23 = vmax.f32 %v4830_v26, %v4842_v22 }
 0xb54   : > { %v4843_v25 = vpop.f32.mrb[64].mxu1 }
 0xb55   : > { %v4844_v41 = vpop.f32.mrb[65].mxu1 }
 0xb56   : > { %v4845_v29 = vadd.f32 %v4844_v41, %v4843_v25  ;;  %v4846_v36 = vpop.f32.mrb[66].mxu1 }
 0xb57   : > { %v4847_v42 = vpop.f32.mrb[67].mxu1 }
 0xb58   : > { %v4256_v43 = vmax.f32 %v4252_v12, %v4845_v29  ;;  %v4848_v44 = vadd.f32 %v4847_v42, %v4846_v36 }
 0xb5a   : > { %v4257_v48 = vmax.f32 %v4253_v39, %v4848_v44 }
 0xb5c   : > { %v4849_v14 = vpop.f32.mrb[68].mxu1 }
 0xb5d   : > { %v4850_v45 = vpop.f32.mrb[69].mxu1 }
 0xb5e   : > { %v4851_v46 = vadd.f32 %v4850_v45, %v4849_v14  ;;  %v4852_v24 = vpop.f32.mrb[70].mxu1 }
 0xb5f   : > { %v4853_v9 = vpop.f32.mrb[71].mxu1 }
 0xb60   : > { %v4258_v62 = vmax.f32 %v4254_v18, %v4851_v46  ;;  %v4854_v49 = vadd.f32 %v4853_v9, %v4852_v24 }
 0xb62   : > { %v4259_v38 = vmax.f32 %v4255_v23, %v4854_v49 }
 0xb64   : > { %v4855_v1 = vpop.f32.mrb[72].mxu1 }
 0xb65   : > { %v4856_v17 = vpop.f32.mrb[73].mxu1 }
 0xb66   : > { %v4857_v51 = vadd.f32 %v4856_v17, %v4855_v1  ;;  %v4858_v47 = vpop.f32.mrb[74].mxu1 }
 0xb67   : > { %v4859_v35 = vpop.f32.mrb[75].mxu1 }
 0xb68   : > { %v4260_v2 = vmax.f32 %v4256_v43, %v4857_v51  ;;  %v4860_v13 = vadd.f32 %v4859_v35, %v4858_v47 }
 0xb6a   : > { %v4261_v3 = vmax.f32 %v4257_v48, %v4860_v13 }
 0xb6c   : > { %v4264_v54 = vmax.f32 %v4260_v2, %v4261_v3  ;;  %v4861_v40 = vpop.f32.mrb[76].mxu1 }
 0xb6d   : > { %v4862_v55 = vpop.f32.mrb[77].mxu1 }
 0xb6e   : > { %v4863_v53 = vadd.f32 %v4862_v55, %v4861_v40  ;;  %v4864_v61 = vpop.f32.mrb[78].mxu1 }
 0xb6f   : > { %v4865_v30 = vpop.f32.mrb[79].mxu1 }
 0xb70   : > { %v4262_v19 = vmax.f32 %v4258_v62, %v4863_v53  ;;  %v4866_v11 = vadd.f32 %v4865_v30, %v4864_v61 }
 0xb72   : > { %v4263_v56 = vmax.f32 %v4259_v38, %v4866_v11 }
 0xb74   : > { %v4265_v57 = vmax.f32 %v4262_v19, %v4263_v56 }
 0xb76   : > { %v4266_v33 = vmax.f32 %v4264_v54, %v4265_v57 }
 0xb78   : > { %v4267_v52 = vrot.slane %v4266_v33, 4 }
 0xb7a   : > { %v4268_v34 = vmax.f32 %v4266_v33, %v4267_v52 }
 0xb7c   : > { %v4269_v59 = vrot.slane %v4268_v34, 2 }
 0xb7e   : > { %v4270_v5 = vmax.f32 %v4268_v34, %v4269_v59 }
 0xb80   : > { %v4271_v58 = vrot.slane %v4270_v5, 1 }
 0xb82   : > { %v4272_v60 = vmax.f32 %v4270_v5, %v4271_v58 }
 0xb84   : > { %v4279_v4 = vmax.f32 %v4278_v0, %v4272_v60 }
 0xb86   : > { %4280 = vst [vmem:[%s6367_s17] sm:$0x1] %v4279_v4 }
 0xb8d   : > { %v4284_v31 = vld [vmem:[%s6367_s17] sm:$0x1] }
 0xb8e   : > { %v4286_v6 = vadd.f32 %v4285_v20, %v4284_v31 }
 0xb90   : > { %4287 = vst [vmem:[%s6367_s17] sm:$0x1] %v4286_v6 }
 0xb91 PF: > { %s7149_s13 = sld [smem:[#allocation32_spill]]  ;;  %s4760_s29 = sshll.u32 %s5910_s1, 4 }
 0xb92   : > { %s7150_s0 = sld [smem:[#allocation48_spill]]  ;;  %s4301_s21 = sshll.u32 %s6367_s17, 4  ;;  %s4302_s21 = int_to_ptr.vmem [resolvable:$true] %s4301_s21 }
 0xb93   : > { %s4289_s14 = scalar_lea.sflag [#allocation6], %s741_s22  ;;  %s5808_s23 = scalar_lea.vmem %s4302_s21, 16 }
 0xb94   : > { %p5809_p13 = scmp.ne.s32.totalorder %s4302_s21, %s5808_s23  ;;  %s5957_s11 = smov [#allocation19]  }
 0xb95   : > { %s5812_s20 = sshll.u32 %s5957_s11, 4  ;;  %s5813_s20 = int_to_ptr.vmem [resolvable:$false] %s5812_s20 }
 0xb96   : > { %s5814_s3 = scalar_lea.vmem %s5813_s20, 32  ;;  %p5815_p6 = scmp.lt.s32.totalorder %s4302_s21, %s5813_s20 }
 0xb97   : > { %p7152_p1 = scmp.ne.s32.totalorder %s7149_s13, 0  ;;  %p5816_p7 = scmp.lt.s32.totalorder %s5814_s3, %s5808_s23 }
 0xb98   : > { %s7151_s7 = smov %s7150_s0  ;;  %s7014_s2 = scalar_lea.hbm %s7150_s0, %s4760_s29 }
 0xb99   : > { %p5810_p4 = pnand %p5809_p13, %p7152_p1  ;;  %p5817_p8 = por %p5816_p7, %p5815_p6 }
 0xb9b   : > { %p5811_p5 = pneg %p5810_p4 }
 0xb9d   : > { %p5818_p11 = pnand %p5817_p8, %p5811_p5 }
 0xb9f   : > { %5821 = shalt.err (!%p5818_p11)
}
 0xba0   : > { %s5822_s1 = scalar_lea.hbm %s7014_s2, 16  ;;  %s5826_s8 = scalar_lea.hbm %s7151_s7, 32 }
 0xba1   : > { %p5823_p12 = scmp.ne.s32.totalorder %s7014_s2, %s5822_s1  ;;  %p5827_p0 = scmp.lt.u32.totalorder %s7014_s2, %s7151_s7 }
 0xba2   : > { %p5828_p2 = scmp.lt.u32.totalorder %s5826_s8, %s5822_s1  ;;  %p5830_p13 = scmp.lt.u32.totalorder %s5822_s1, %s7014_s2 }
 0xba3   : > { %p5824_p3 = pnand %p5823_p12, %p7152_p1 }
 0xba4   : > { %p5829_p10 = por %p5828_p2, %p5827_p0 }
 0xba5   : > { %p5825_p9 = pneg %p5824_p3 }
 0xba6   : > { %p5831_p4 = por %p5830_p13, %p5829_p10 }
 0xba8   : > { %p5832_p5 = pnand %p5831_p4, %p5825_p9 }
 0xbaa   : > { %5835 = shalt.err (!%p5832_p5)
}
 0xbab   : > { %5043 = dma.vmem_to_hbm [thread:$0]  (%p7152_p1), %s4302_s21, 16, %s7014_s2, %s4289_s14  }
 0xbac PF: > { %s7153_s29 = sld [smem:[#allocation30_spill]]  ;;  %s7154_s18 = sld [smem:[#allocation26_spill]] }
 0xbad   : > { %s7155_s19 = sld [smem:[#allocation34_spill]] }
 0xbb2   : > { %p5095_p6 = scmp.ge.s32.totalorder %s7153_s29, 2  ;;  %s4313_s0 = sand.u32 1, %s7154_s18  }
 0xbb3   : > { %p7156_p7 = scmp.ne.s32.totalorder %s7155_s19, 0  ;;  %s4314_s23 = scalar_lea.sflag [#allocation6], %s4313_s0 }
 0xbb5   : > { %p5074_p8 = pnand %p5095_p6, %p7156_p7 }
 0xbb7   : > { %5889 = dma.done.wait (!%p5074_p8), %s4314_s23, 16  }
 0xbb8   : > { %5891 = vsyncadd (!%p5074_p8), %s4314_s23, 4294967280  ;;  %s37_s23 = sadd.s32 1, %s7153_s29   ;;  %s7157_s11 = sld [smem:[#allocation27_spill]] }
 0xbb9   : > { %p34_p11 = scmp.ge.s32.totalorder %s37_s23, 6   ;;  %s7158_s20 = sld [smem:[#allocation35_spill]] }
 0xbba   : > { %s7159_s21 = sld [smem:[#allocation28_spill]]  ;;  %s7160_s1 = sld [smem:[#allocation29_spill]] }
 0xbbb   : > { %s7161_s22 = sld [smem:[#allocation31_spill]]  ;;  %s7162_s2 = sld [smem:[#allocation33_spill]] }
 0xbbc   : > { %s7163_s0 = smov %s5898_s30  ;;  %36 = sbr.rel (!%p34_p11) target bundleno = 24 (0x18), region = 192 }
 0xbbe   : > { %s7164_s30 = smov %s7157_s11 }
 0xbc3   :  { %4318 = vsyncpa [#allocation5], 1 }
 0xbc4   :  { %4320 = vsyncpa [#allocation5 + $0x1], 1 }
 0xbc5   :  { %4321 = vsyncpa [#allocation8], 1 }
 0xbc6   :  { %4322 = vsyncpa [#allocation11], 1 }
 0xbc7   :  { %4323 = vsyncpa [#allocation14], 1 }
 0xbc8   :  { %4324 = vsyncpa [#allocation17], 1 }
 0xbc9   :  { %4325 = vsyncpa [#allocation6], 1 }
 0xbca   :  { %4327 = vsyncpa [#allocation6 + $0x1], 1 }

</bundles_post_ra>
